<compile_context>
chip_gen: v7x
topology: tpu7x:2x2x1
jax: 0.10.0
libtpu: 0.0.40
codegen_flags: <defaults>
</compile_context>

<pallas_src>
import jax
import jax.numpy as jnp
from jax import lax
from jax.experimental import pallas as pl
from jax.experimental.pallas import tpu as pltpu

EPS = 1e-5
LANE = 128                       # channel padding target (lane width)
MAX_TILE_H = 8                   # output rows per grid step
VMEM_LIMIT = 32 * 1024 * 1024    # scoped-VMEM limit, safe on v5e/v6e/v7x


def _round_up(x, m):
    return (x + m - 1) // m * m


def _pick_tile_h(H):
    for t in (MAX_TILE_H, 16, 32, 4, 2, 1):
        if t <= H and H % t == 0:
            return t
    return H


# ---------------------------------------------------------------------------
# Kernel 1/2: 3x3 conv on an in-kernel reflect-padded halo tile
#             (+ optional fused BN/ReLU of the previous stage)
#             + per-tile partial batch-norm statistics.
# ---------------------------------------------------------------------------
def _make_conv_stats_kernel(TH, H, W, Cp, pre_norm):
    def kernel(*refs):
        if pre_norm:
            (x_hbm, w_ref, scale_ref, shift_ref,
             y_ref, s_ref, ss_ref, xtile, sems) = refs
        else:
            x_hbm, w_ref, y_ref, s_ref, ss_ref, xtile, sems = refs
            scale_ref = shift_ref = None

        n = pl.program_id(0)
        h = pl.program_id(1)
        HT = pl.num_programs(1)
        slot = lax.rem(h, 2)

        def issue_halo(hi, sl):
            # Reflect-padded halo rows for output rows [hi*TH, hi*TH + TH):
            #   row 0      <- x[reflect(r0 - 1)]   (= 1      if r0 == 0 else r0-1)
            #   rows 1..TH <- x[r0 .. r0+TH-1]
            #   row TH+1   <- x[reflect(r0 + TH)]  (= H - 2  if r0+TH == H else r0+TH)
            # Columns land in [1, W+1) of the (W+2)-wide VMEM tile; the two
            # boundary columns are filled in-register after the wait.
            r0 = pl.multiple_of(hi * TH, TH)
            top = jnp.where(r0 == 0, 1, r0 - 1)
            bot = jnp.where(r0 + TH == H, H - 2, r0 + TH)
            pltpu.make_async_copy(x_hbm.at[n, pl.ds(top, 1)],
                                  xtile.at[sl, pl.ds(0, 1), pl.ds(1, W)],
                                  sems.at[sl, 0]).start()
            pltpu.make_async_copy(x_hbm.at[n, pl.ds(r0, TH)],
                                  xtile.at[sl, pl.ds(1, TH), pl.ds(1, W)],
                                  sems.at[sl, 1]).start()
            pltpu.make_async_copy(x_hbm.at[n, pl.ds(bot, 1)],
                                  xtile.at[sl, pl.ds(TH + 1, 1), pl.ds(1, W)],
                                  sems.at[sl, 2]).start()

        # Prime the double buffer at the first tile of each image.
        @pl.when(h == 0)
        def _():
            issue_halo(h, slot)

        # Wait for this tile's halo (issued above at h==0, else prefetched by
        # the previous grid step).
        pltpu.make_async_copy(x_hbm.at[n, pl.ds(0, 1)],
                              xtile.at[slot, pl.ds(0, 1), pl.ds(1, W)],
                              sems.at[slot, 0]).wait()
        pltpu.make_async_copy(x_hbm.at[n, pl.ds(0, TH)],
                              xtile.at[slot, pl.ds(1, TH), pl.ds(1, W)],
                              sems.at[slot, 1]).wait()
        pltpu.make_async_copy(x_hbm.at[n, pl.ds(0, 1)],
                              xtile.at[slot, pl.ds(TH + 1, 1), pl.ds(1, W)],
                              sems.at[slot, 2]).wait()

        # Prefetch the next tile's halo into the other slot; overlaps with the
        # MXU work below.
        @pl.when(h + 1 < HT)
        def _():
            issue_halo(h + 1, 1 - slot)

        xt = xtile[slot]                                     # (TH+2, W+2, Cp) f32
        # In-register W-direction reflection: col 0 <- col 2 (orig col 1),
        # col W+1 <- col W-1 (orig col W-2).
        col = lax.broadcasted_iota(jnp.int32, xt.shape, 1)
        xt = jnp.where(col == 0, xt[:, 2:3, :], xt)
        xt = jnp.where(col == W + 1, xt[:, W - 1:W, :], xt)

        if pre_norm:
            # Fused BatchNorm (precomputed per-channel scale/shift) + ReLU of
            # the previous stage, applied to the whole halo tile in f32.
            xt = xt * scale_ref[...] + shift_ref[...]
            xt = jnp.maximum(xt, 0.0)
        xt = xt.astype(jnp.bfloat16)          # bf16 MXU inputs, f32 accumulation

        # 3x3 conv as 9 (TH*W, Cp) x (Cp, Cp) MXU matmuls.  kx shift hoisted
        # (3 sublane-window slices); the flatten is layout-preserving for W%8==0.
        acc = None
        for kx in range(3):
            xsh = xt[:, kx:kx + W, :]                        # (TH+2, W, Cp)
            for ky in range(3):
                patch = xsh[ky:ky + TH].reshape(TH * W, Cp)
                d = lax.dot_general(patch, w_ref[3 * ky + kx],
                                    (((1,), (0,)), ((), ())),
                                    preferred_element_type=jnp.float32)
                acc = d if acc is None else acc + d

        y_ref[...] = acc.reshape(TH, W, Cp)
        # Per-tile partial BN statistics (finalized outside the kernel so the
        # batch statistics stay exact under tiling).
        s_ref[...] = jnp.sum(acc, axis=0, keepdims=True)
        ss_ref[...] = jnp.sum(acc * acc, axis=0, keepdims=True)

    return kernel


def _conv_stats_call(x_nhwc, w9, TH, scale=None, shift=None):
    """x_nhwc: (N, H, W, Cp) UNpadded activation (f32).  Returns conv output
    (N, H, W, Cp) f32 plus per-tile partial sum / sum-of-squares."""
    N, H, W, Cp = x_nhwc.shape
    HT = H // TH
    pre_norm = scale is not None

    kernel = _make_conv_stats_kernel(TH, H, W, Cp, pre_norm)

    in_specs = [
        pl.BlockSpec(memory_space=pl.ANY),                      # activation stays in HBM
        pl.BlockSpec((9, Cp, Cp), lambda n, h: (0, 0, 0)),      # weights resident in VMEM
    ]
    inputs = [x_nhwc, w9]
    if pre_norm:
        in_specs += [pl.BlockSpec((1, 1, Cp), lambda n, h: (0, 0, 0)),
                     pl.BlockSpec((1, 1, Cp), lambda n, h: (0, 0, 0))]
        inputs += [scale, shift]

    out_shape = (
        jax.ShapeDtypeStruct((N, H, W, Cp), jnp.float32),       # conv output
        jax.ShapeDtypeStruct((N, HT, 1, Cp), jnp.float32),      # partial sum
        jax.ShapeDtypeStruct((N, HT, 1, Cp), jnp.float32),      # partial sum of squares
    )
    out_specs = (
        pl.BlockSpec((None, TH, W, Cp), lambda n, h: (n, h, 0, 0)),  # lane-dense tiles
        pl.BlockSpec((None, None, 1, Cp), lambda n, h: (n, h, 0, 0)),
        pl.BlockSpec((None, None, 1, Cp), lambda n, h: (n, h, 0, 0)),
    )
    scratch_shapes = [
        pltpu.VMEM((2, TH + 2, W + 2, Cp), x_nhwc.dtype),       # double-buffered halo tile
        pltpu.SemaphoreType.DMA((2, 3)),                        # (slot, halo piece)
    ]
    return pl.pallas_call(
        kernel,
        out_shape=out_shape,
        grid=(N, HT),
        in_specs=in_specs,
        out_specs=out_specs,
        scratch_shapes=scratch_shapes,
        compiler_params=pltpu.CompilerParams(
            # H axis is "arbitrary" so the prime/prefetch DMA chain stays on one
            # core; the batch axis remains "parallel" for v7x megacore.
            dimension_semantics=("parallel", "arbitrary"),
            vmem_limit_bytes=VMEM_LIMIT),
    )(*inputs)


# ---------------------------------------------------------------------------
# Kernel 3: BN2 (as a single FMA) + residual add, fully BlockSpec-pipelined.
# ---------------------------------------------------------------------------
def _norm_residual_kernel(y_ref, scale_ref, shift_ref, res_ref, out_ref):
    out_ref[...] = y_ref[...] * scale_ref[...] + shift_ref[...] + res_ref[...]


def _norm_residual_call(y, scale, shift, residual, TH):
    N, H, W, Cp = y.shape
    HT = H // TH
    tile = pl.BlockSpec((None, TH, W, Cp), lambda n, h: (n, h, 0, 0))
    vec = pl.BlockSpec((1, 1, Cp), lambda n, h: (0, 0, 0))
    return pl.pallas_call(
        _norm_residual_kernel,
        out_shape=jax.ShapeDtypeStruct((N, H, W, Cp), jnp.float32),
        grid=(N, HT),
        in_specs=[tile, vec, vec, tile],
        out_specs=tile,
        compiler_params=pltpu.CompilerParams(
            dimension_semantics=("parallel", "parallel"),
            vmem_limit_bytes=VMEM_LIMIT),
    )(y, scale, shift, residual)


def _bn_scale_shift(s, ss, count, gamma_p, beta_p):
    """Finalize per-channel batch stats (biased variance) -> FMA scale/shift."""
    mean = jnp.sum(s, axis=(0, 1, 2)) / count
    var = jnp.maximum(jnp.sum(ss, axis=(0, 1, 2)) / count - mean * mean, 0.0)
    scale = gamma_p * lax.rsqrt(var + EPS)
    shift = beta_p - mean * scale
    return scale.reshape(1, 1, -1), shift.reshape(1, 1, -1)


# ---------------------------------------------------------------------------
# ResnetBlock forward (PyTorch-native parameter layouts).
# ---------------------------------------------------------------------------
@jax.jit
def resnet_block_forward(x_nchw, w1_oihw, w2_oihw, gamma1, beta1, gamma2, beta2):
    N, C, H, W = x_nchw.shape
    Cp = _round_up(C, LANE)          # lane-dense channel padding
    TH = _pick_tile_h(H)

    # ---- layout plumbing (cheap wrapper-side XLA ops; no reflect pads) ----
    x = jnp.transpose(x_nchw, (0, 2, 3, 1)).astype(jnp.float32)        # NHWC
    x_p = jnp.pad(x, ((0, 0), (0, 0), (0, 0), (0, Cp - C)))            # zero-pad channels

    def prep_w(w_oihw):
        w = jnp.transpose(w_oihw, (2, 3, 1, 0))                        # (3,3,Cin,Cout)
        w = jnp.pad(w, ((0, 0), (0, 0), (0, Cp - C), (0, Cp - C)))
        return w.reshape(9, Cp, Cp).astype(jnp.bfloat16)               # bf16 MXU weights

    w1 = prep_w(w1_oihw)
    w2 = prep_w(w2_oihw)

    def prep_gb(g, b):
        g = jnp.pad(g.astype(jnp.float32), (0, Cp - C), constant_values=1.0)
        b = jnp.pad(b.astype(jnp.float32), (0, Cp - C))
        return g, b

    g1, b1 = prep_gb(gamma1, beta1)
    g2, b2 = prep_gb(gamma2, beta2)

    count = N * H * W

    # ---- stage 1: (in-kernel reflect pad) conv3x3 + partial BN1 stats ----
    y1, s1, ss1 = _conv_stats_call(x_p, w1, TH)
    scale1, shift1 = _bn_scale_shift(s1, ss1, count, g1, b1)

    # ---- stage 2: BN1 + ReLU fused, (in-kernel reflect pad) conv3x3 + BN2 stats ----
    # Normalization/ReLU are elementwise and commute with reflection padding,
    # so the raw conv1 output is read directly and normalized on the halo tile.
    y2, s2, ss2 = _conv_stats_call(y1, w2, TH, scale=scale1, shift=shift1)
    scale2, shift2 = _bn_scale_shift(s2, ss2, count, g2, b2)

    # ---- BN2 + residual add ----
    out_p = _norm_residual_call(y2, scale2, shift2, x_p, TH)

    out = out_p[..., :C]
    return jnp.transpose(out, (0, 3, 1, 2))                            # back to NCHW
    # TODO(synk): BatchNorm running-stat (running_mean/var) buffer updates are a
    # training-time side effect and are not returned by this forward pass.


if __name__ == "__main__":
    N, C, H, W = 2, 4, 16, 16
    key = jax.random.PRNGKey(0)
    k_x, k_w1, k_w2 = jax.random.split(key, 3)

    x = jax.random.normal(k_x, (N, C, H, W), dtype=jnp.float32)
    # Conv weights in PyTorch (out, in, kh, kw) layout, no bias (use_bias=False).
    w1 = jax.random.normal(k_w1, (C, C, 3, 3), dtype=jnp.float32) * 0.1
    w2 = jax.random.normal(k_w2, (C, C, 3, 3), dtype=jnp.float32) * 0.1
    # BatchNorm affine params (PyTorch default init: gamma=1, beta=0).
    gamma1 = jnp.ones((C,), jnp.float32)
    beta1 = jnp.zeros((C,), jnp.float32)
    gamma2 = jnp.ones((C,), jnp.float32)
    beta2 = jnp.zeros((C,), jnp.float32)

    out = resnet_block_forward(x, w1, w2, gamma1, beta1, gamma2, beta2)
    jax.block_until_ready(out)
    assert out.shape == (N, C, H, W) and out.dtype == jnp.float32
    assert bool(jnp.all(jnp.isfinite(out)))
    print("KERNEL_OK")
</pallas_src>

<mosaic_0001>
module attributes {stable_mosaic.version = 11 : i64} {
  func.func @kernel(%arg0: i32, %arg1: i32, %arg2: memref<2x16x16x128xf32, #tpu.memory_space<any>>, %arg3: memref<9x128x128xbf16, #tpu.memory_space<vmem>>, %arg4: memref<1x8x16x128xf32, #tpu.memory_space<vmem>>, %arg5: memref<1x1x1x128xf32, #tpu.memory_space<vmem>>, %arg6: memref<1x1x1x128xf32, #tpu.memory_space<vmem>>, %arg7: memref<2x10x18x128xf32, #tpu.memory_space<vmem>>, %arg8: memref<2x3x!tpu.dma_semaphore, #tpu.memory_space<semaphore_mem>>) attributes {dimension_semantics = [#tpu.dimension_semantics<parallel>, #tpu.dimension_semantics<arbitrary>], iteration_bounds = array<i64: 2, 2>, scalar_prefetch = 0 : i64, scratch_operands = 2 : i64, tpu.core_type = #tpu.core_type<tc>, window_params = [{}, {pipeline_mode = #tpu.pipeline_mode<synchronous>, transform_indices = @transform_1, window_bounds = array<i64: 9, 128, 128>}, {transform_indices = @transform_2, window_bounds = array<i64: 1, 8, 16, 128>}, {transform_indices = @transform_3, window_bounds = array<i64: 1, 1, 1, 128>}, {transform_indices = @transform_4, window_bounds = array<i64: 1, 1, 1, 128>}]} {
    %c2_i32 = arith.constant 2 : i32
    %0 = arith.remsi %arg1, %c2_i32 : i32
    %c0_i32 = arith.constant 0 : i32
    %1 = arith.cmpi eq, %arg1, %c0_i32 : i32
    %2 = arith.extui %1 : i1 to i32
    %c0_i32_0 = arith.constant 0 : i32
    %3 = arith.cmpi ne, %2, %c0_i32_0 : i32
    scf.if %3 {
      %c8_i32 = arith.constant 8 : i32
      %114 = arith.muli %arg1, %c8_i32 : i32
      %115 = tpu.assume_multiple %114, 8 : i32
      %c0_i32_67 = arith.constant 0 : i32
      %116 = arith.cmpi eq, %115, %c0_i32_67 : i32
      %c1_i32_68 = arith.constant 1 : i32
      %117 = arith.subi %115, %c1_i32_68 : i32
      %c1_i32_69 = arith.constant 1 : i32
      %118 = arith.select %116, %c1_i32_69, %117 : i32
      %c8_i32_70 = arith.constant 8 : i32
      %119 = arith.addi %115, %c8_i32_70 : i32
      %c16_i32 = arith.constant 16 : i32
      %120 = arith.cmpi eq, %119, %c16_i32 : i32
      %c8_i32_71 = arith.constant 8 : i32
      %121 = arith.addi %115, %c8_i32_71 : i32
      %c14_i32 = arith.constant 14 : i32
      %122 = arith.select %120, %c14_i32, %121 : i32
      %c0_i32_72 = arith.constant 0 : i32
      %c0_i32_73 = arith.constant 0 : i32
      %c0_i32_74 = arith.constant 0 : i32
      %123 = tpu.memref_slice %arg2[%arg0, %118, %c0_i32_73, %c0_i32_74] : memref<2x16x16x128xf32, #tpu.memory_space<any>> -> memref<1x1x16x128xf32, #tpu.memory_space<any>>
      %124 = tpu.memref_squeeze %123 : memref<1x1x16x128xf32, #tpu.memory_space<any>> -> memref<1x16x128xf32, #tpu.memory_space<any>>
      %c0_i32_75 = arith.constant 0 : i32
      %c1_i32_76 = arith.constant 1 : i32
      %c0_i32_77 = arith.constant 0 : i32
      %125 = tpu.memref_slice %arg7[%0, %c0_i32_75, %c1_i32_76, %c0_i32_77] : memref<2x10x18x128xf32, #tpu.memory_space<vmem>> -> memref<1x1x16x128xf32, #tpu.memory_space<vmem>>
      %126 = tpu.memref_squeeze %125 : memref<1x1x16x128xf32, #tpu.memory_space<vmem>> -> memref<1x16x128xf32, #tpu.memory_space<vmem>>
      %127 = tpu.memref_slice %arg8[%0, %c0_i32_72] : memref<2x3x!tpu.dma_semaphore, #tpu.memory_space<semaphore_mem>> -> memref<1x1x!tpu.dma_semaphore, #tpu.memory_space<semaphore_mem>>
      %128 = tpu.memref_squeeze %127 : memref<1x1x!tpu.dma_semaphore, #tpu.memory_space<semaphore_mem>> -> memref<!tpu.dma_semaphore, #tpu.memory_space<semaphore_mem>>
      tpu.enqueue_dma source(%124 : memref<1x16x128xf32, #tpu.memory_space<any>>) target(%126 : memref<1x16x128xf32, #tpu.memory_space<vmem>>) target_semaphore(%128 : memref<!tpu.dma_semaphore, #tpu.memory_space<semaphore_mem>>)
      %c1_i32_78 = arith.constant 1 : i32
      %c0_i32_79 = arith.constant 0 : i32
      %c0_i32_80 = arith.constant 0 : i32
      %129 = tpu.memref_slice %arg2[%arg0, %115, %c0_i32_79, %c0_i32_80] : memref<2x16x16x128xf32, #tpu.memory_space<any>> -> memref<1x8x16x128xf32, #tpu.memory_space<any>>
      %130 = tpu.memref_squeeze %129 : memref<1x8x16x128xf32, #tpu.memory_space<any>> -> memref<8x16x128xf32, #tpu.memory_space<any>>
      %c1_i32_81 = arith.constant 1 : i32
      %c1_i32_82 = arith.constant 1 : i32
      %c0_i32_83 = arith.constant 0 : i32
      %131 = tpu.memref_slice %arg7[%0, %c1_i32_81, %c1_i32_82, %c0_i32_83] : memref<2x10x18x128xf32, #tpu.memory_space<vmem>> -> memref<1x8x16x128xf32, #tpu.memory_space<vmem>>
      %132 = tpu.memref_squeeze %131 : memref<1x8x16x128xf32, #tpu.memory_space<vmem>> -> memref<8x16x128xf32, #tpu.memory_space<vmem>>
      %133 = tpu.memref_slice %arg8[%0, %c1_i32_78] : memref<2x3x!tpu.dma_semaphore, #tpu.memory_space<semaphore_mem>> -> memref<1x1x!tpu.dma_semaphore, #tpu.memory_space<semaphore_mem>>
      %134 = tpu.memref_squeeze %133 : memref<1x1x!tpu.dma_semaphore, #tpu.memory_space<semaphore_mem>> -> memref<!tpu.dma_semaphore, #tpu.memory_space<semaphore_mem>>
      tpu.enqueue_dma source(%130 : memref<8x16x128xf32, #tpu.memory_space<any>>) target(%132 : memref<8x16x128xf32, #tpu.memory_space<vmem>>) target_semaphore(%134 : memref<!tpu.dma_semaphore, #tpu.memory_space<semaphore_mem>>)
      %c2_i32_84 = arith.constant 2 : i32
      %c0_i32_85 = arith.constant 0 : i32
      %c0_i32_86 = arith.constant 0 : i32
      %135 = tpu.memref_slice %arg2[%arg0, %122, %c0_i32_85, %c0_i32_86] : memref<2x16x16x128xf32, #tpu.memory_space<any>> -> memref<1x1x16x128xf32, #tpu.memory_space<any>>
      %136 = tpu.memref_squeeze %135 : memref<1x1x16x128xf32, #tpu.memory_space<any>> -> memref<1x16x128xf32, #tpu.memory_space<any>>
      %c9_i32_87 = arith.constant 9 : i32
      %c1_i32_88 = arith.constant 1 : i32
      %c0_i32_89 = arith.constant 0 : i32
      %137 = tpu.memref_slice %arg7[%0, %c9_i32_87, %c1_i32_88, %c0_i32_89] : memref<2x10x18x128xf32, #tpu.memory_space<vmem>> -> memref<1x1x16x128xf32, #tpu.memory_space<vmem>>
      %138 = tpu.memref_squeeze %137 : memref<1x1x16x128xf32, #tpu.memory_space<vmem>> -> memref<1x16x128xf32, #tpu.memory_space<vmem>>
      %139 = tpu.memref_slice %arg8[%0, %c2_i32_84] : memref<2x3x!tpu.dma_semaphore, #tpu.memory_space<semaphore_mem>> -> memref<1x1x!tpu.dma_semaphore, #tpu.memory_space<semaphore_mem>>
      %140 = tpu.memref_squeeze %139 : memref<1x1x!tpu.dma_semaphore, #tpu.memory_space<semaphore_mem>> -> memref<!tpu.dma_semaphore, #tpu.memory_space<semaphore_mem>>
      tpu.enqueue_dma source(%136 : memref<1x16x128xf32, #tpu.memory_space<any>>) target(%138 : memref<1x16x128xf32, #tpu.memory_space<vmem>>) target_semaphore(%140 : memref<!tpu.dma_semaphore, #tpu.memory_space<semaphore_mem>>)
    } else {
    }
    %c0_i32_1 = arith.constant 0 : i32
    %c0_i32_2 = arith.constant 0 : i32
    %c0_i32_3 = arith.constant 0 : i32
    %c0_i32_4 = arith.constant 0 : i32
    %4 = tpu.memref_slice %arg2[%arg0, %c0_i32_2, %c0_i32_3, %c0_i32_4] : memref<2x16x16x128xf32, #tpu.memory_space<any>> -> memref<1x1x16x128xf32, #tpu.memory_space<any>>
    %5 = tpu.memref_squeeze %4 : memref<1x1x16x128xf32, #tpu.memory_space<any>> -> memref<1x16x128xf32, #tpu.memory_space<any>>
    %c0_i32_5 = arith.constant 0 : i32
    %c1_i32 = arith.constant 1 : i32
    %c0_i32_6 = arith.constant 0 : i32
    %6 = tpu.memref_slice %arg7[%0, %c0_i32_5, %c1_i32, %c0_i32_6] : memref<2x10x18x128xf32, #tpu.memory_space<vmem>> -> memref<1x1x16x128xf32, #tpu.memory_space<vmem>>
    %7 = tpu.memref_squeeze %6 : memref<1x1x16x128xf32, #tpu.memory_space<vmem>> -> memref<1x16x128xf32, #tpu.memory_space<vmem>>
    %8 = tpu.memref_slice %arg8[%0, %c0_i32_1] : memref<2x3x!tpu.dma_semaphore, #tpu.memory_space<semaphore_mem>> -> memref<1x1x!tpu.dma_semaphore, #tpu.memory_space<semaphore_mem>>
    %9 = tpu.memref_squeeze %8 : memref<1x1x!tpu.dma_semaphore, #tpu.memory_space<semaphore_mem>> -> memref<!tpu.dma_semaphore, #tpu.memory_space<semaphore_mem>>
    tpu.wait_dma2 semaphore(%9 : memref<!tpu.dma_semaphore, #tpu.memory_space<semaphore_mem>>) src(%5 : memref<1x16x128xf32, #tpu.memory_space<any>>) dst(%7 : memref<1x16x128xf32, #tpu.memory_space<vmem>>)
    %c1_i32_7 = arith.constant 1 : i32
    %c0_i32_8 = arith.constant 0 : i32
    %c0_i32_9 = arith.constant 0 : i32
    %c0_i32_10 = arith.constant 0 : i32
    %10 = tpu.memref_slice %arg2[%arg0, %c0_i32_8, %c0_i32_9, %c0_i32_10] : memref<2x16x16x128xf32, #tpu.memory_space<any>> -> memref<1x8x16x128xf32, #tpu.memory_space<any>>
    %11 = tpu.memref_squeeze %10 : memref<1x8x16x128xf32, #tpu.memory_space<any>> -> memref<8x16x128xf32, #tpu.memory_space<any>>
    %c1_i32_11 = arith.constant 1 : i32
    %c1_i32_12 = arith.constant 1 : i32
    %c0_i32_13 = arith.constant 0 : i32
    %12 = tpu.memref_slice %arg7[%0, %c1_i32_11, %c1_i32_12, %c0_i32_13] : memref<2x10x18x128xf32, #tpu.memory_space<vmem>> -> memref<1x8x16x128xf32, #tpu.memory_space<vmem>>
    %13 = tpu.memref_squeeze %12 : memref<1x8x16x128xf32, #tpu.memory_space<vmem>> -> memref<8x16x128xf32, #tpu.memory_space<vmem>>
    %14 = tpu.memref_slice %arg8[%0, %c1_i32_7] : memref<2x3x!tpu.dma_semaphore, #tpu.memory_space<semaphore_mem>> -> memref<1x1x!tpu.dma_semaphore, #tpu.memory_space<semaphore_mem>>
    %15 = tpu.memref_squeeze %14 : memref<1x1x!tpu.dma_semaphore, #tpu.memory_space<semaphore_mem>> -> memref<!tpu.dma_semaphore, #tpu.memory_space<semaphore_mem>>
    tpu.wait_dma2 semaphore(%15 : memref<!tpu.dma_semaphore, #tpu.memory_space<semaphore_mem>>) src(%11 : memref<8x16x128xf32, #tpu.memory_space<any>>) dst(%13 : memref<8x16x128xf32, #tpu.memory_space<vmem>>)
    %c2_i32_14 = arith.constant 2 : i32
    %c0_i32_15 = arith.constant 0 : i32
    %c0_i32_16 = arith.constant 0 : i32
    %c0_i32_17 = arith.constant 0 : i32
    %16 = tpu.memref_slice %arg2[%arg0, %c0_i32_15, %c0_i32_16, %c0_i32_17] : memref<2x16x16x128xf32, #tpu.memory_space<any>> -> memref<1x1x16x128xf32, #tpu.memory_space<any>>
    %17 = tpu.memref_squeeze %16 : memref<1x1x16x128xf32, #tpu.memory_space<any>> -> memref<1x16x128xf32, #tpu.memory_space<any>>
    %c9_i32 = arith.constant 9 : i32
    %c1_i32_18 = arith.constant 1 : i32
    %c0_i32_19 = arith.constant 0 : i32
    %18 = tpu.memref_slice %arg7[%0, %c9_i32, %c1_i32_18, %c0_i32_19] : memref<2x10x18x128xf32, #tpu.memory_space<vmem>> -> memref<1x1x16x128xf32, #tpu.memory_space<vmem>>
    %19 = tpu.memref_squeeze %18 : memref<1x1x16x128xf32, #tpu.memory_space<vmem>> -> memref<1x16x128xf32, #tpu.memory_space<vmem>>
    %20 = tpu.memref_slice %arg8[%0, %c2_i32_14] : memref<2x3x!tpu.dma_semaphore, #tpu.memory_space<semaphore_mem>> -> memref<1x1x!tpu.dma_semaphore, #tpu.memory_space<semaphore_mem>>
    %21 = tpu.memref_squeeze %20 : memref<1x1x!tpu.dma_semaphore, #tpu.memory_space<semaphore_mem>> -> memref<!tpu.dma_semaphore, #tpu.memory_space<semaphore_mem>>
    tpu.wait_dma2 semaphore(%21 : memref<!tpu.dma_semaphore, #tpu.memory_space<semaphore_mem>>) src(%17 : memref<1x16x128xf32, #tpu.memory_space<any>>) dst(%19 : memref<1x16x128xf32, #tpu.memory_space<vmem>>)
    %c1_i32_20 = arith.constant 1 : i32
    %22 = arith.addi %arg1, %c1_i32_20 : i32
    %c2_i32_21 = arith.constant 2 : i32
    %23 = arith.cmpi slt, %22, %c2_i32_21 : i32
    %24 = arith.extui %23 : i1 to i32
    %c0_i32_22 = arith.constant 0 : i32
    %25 = arith.cmpi ne, %24, %c0_i32_22 : i32
    scf.if %25 {
      %c1_i32_67 = arith.constant 1 : i32
      %114 = arith.addi %arg1, %c1_i32_67 : i32
      %c1_i32_68 = arith.constant 1 : i32
      %115 = arith.subi %c1_i32_68, %0 : i32
      %c8_i32 = arith.constant 8 : i32
      %116 = arith.muli %114, %c8_i32 : i32
      %117 = tpu.assume_multiple %116, 8 : i32
      %c0_i32_69 = arith.constant 0 : i32
      %118 = arith.cmpi eq, %117, %c0_i32_69 : i32
      %c1_i32_70 = arith.constant 1 : i32
      %119 = arith.subi %117, %c1_i32_70 : i32
      %c1_i32_71 = arith.constant 1 : i32
      %120 = arith.select %118, %c1_i32_71, %119 : i32
      %c8_i32_72 = arith.constant 8 : i32
      %121 = arith.addi %117, %c8_i32_72 : i32
      %c16_i32 = arith.constant 16 : i32
      %122 = arith.cmpi eq, %121, %c16_i32 : i32
      %c8_i32_73 = arith.constant 8 : i32
      %123 = arith.addi %117, %c8_i32_73 : i32
      %c14_i32 = arith.constant 14 : i32
      %124 = arith.select %122, %c14_i32, %123 : i32
      %c0_i32_74 = arith.constant 0 : i32
      %c0_i32_75 = arith.constant 0 : i32
      %c0_i32_76 = arith.constant 0 : i32
      %125 = tpu.memref_slice %arg2[%arg0, %120, %c0_i32_75, %c0_i32_76] : memref<2x16x16x128xf32, #tpu.memory_space<any>> -> memref<1x1x16x128xf32, #tpu.memory_space<any>>
      %126 = tpu.memref_squeeze %125 : memref<1x1x16x128xf32, #tpu.memory_space<any>> -> memref<1x16x128xf32, #tpu.memory_space<any>>
      %c0_i32_77 = arith.constant 0 : i32
      %c1_i32_78 = arith.constant 1 : i32
      %c0_i32_79 = arith.constant 0 : i32
      %127 = tpu.memref_slice %arg7[%115, %c0_i32_77, %c1_i32_78, %c0_i32_79] : memref<2x10x18x128xf32, #tpu.memory_space<vmem>> -> memref<1x1x16x128xf32, #tpu.memory_space<vmem>>
      %128 = tpu.memref_squeeze %127 : memref<1x1x16x128xf32, #tpu.memory_space<vmem>> -> memref<1x16x128xf32, #tpu.memory_space<vmem>>
      %129 = tpu.memref_slice %arg8[%115, %c0_i32_74] : memref<2x3x!tpu.dma_semaphore, #tpu.memory_space<semaphore_mem>> -> memref<1x1x!tpu.dma_semaphore, #tpu.memory_space<semaphore_mem>>
      %130 = tpu.memref_squeeze %129 : memref<1x1x!tpu.dma_semaphore, #tpu.memory_space<semaphore_mem>> -> memref<!tpu.dma_semaphore, #tpu.memory_space<semaphore_mem>>
      tpu.enqueue_dma source(%126 : memref<1x16x128xf32, #tpu.memory_space<any>>) target(%128 : memref<1x16x128xf32, #tpu.memory_space<vmem>>) target_semaphore(%130 : memref<!tpu.dma_semaphore, #tpu.memory_space<semaphore_mem>>)
      %c1_i32_80 = arith.constant 1 : i32
      %c0_i32_81 = arith.constant 0 : i32
      %c0_i32_82 = arith.constant 0 : i32
      %131 = tpu.memref_slice %arg2[%arg0, %117, %c0_i32_81, %c0_i32_82] : memref<2x16x16x128xf32, #tpu.memory_space<any>> -> memref<1x8x16x128xf32, #tpu.memory_space<any>>
      %132 = tpu.memref_squeeze %131 : memref<1x8x16x128xf32, #tpu.memory_space<any>> -> memref<8x16x128xf32, #tpu.memory_space<any>>
      %c1_i32_83 = arith.constant 1 : i32
      %c1_i32_84 = arith.constant 1 : i32
      %c0_i32_85 = arith.constant 0 : i32
      %133 = tpu.memref_slice %arg7[%115, %c1_i32_83, %c1_i32_84, %c0_i32_85] : memref<2x10x18x128xf32, #tpu.memory_space<vmem>> -> memref<1x8x16x128xf32, #tpu.memory_space<vmem>>
      %134 = tpu.memref_squeeze %133 : memref<1x8x16x128xf32, #tpu.memory_space<vmem>> -> memref<8x16x128xf32, #tpu.memory_space<vmem>>
      %135 = tpu.memref_slice %arg8[%115, %c1_i32_80] : memref<2x3x!tpu.dma_semaphore, #tpu.memory_space<semaphore_mem>> -> memref<1x1x!tpu.dma_semaphore, #tpu.memory_space<semaphore_mem>>
      %136 = tpu.memref_squeeze %135 : memref<1x1x!tpu.dma_semaphore, #tpu.memory_space<semaphore_mem>> -> memref<!tpu.dma_semaphore, #tpu.memory_space<semaphore_mem>>
      tpu.enqueue_dma source(%132 : memref<8x16x128xf32, #tpu.memory_space<any>>) target(%134 : memref<8x16x128xf32, #tpu.memory_space<vmem>>) target_semaphore(%136 : memref<!tpu.dma_semaphore, #tpu.memory_space<semaphore_mem>>)
      %c2_i32_86 = arith.constant 2 : i32
      %c0_i32_87 = arith.constant 0 : i32
      %c0_i32_88 = arith.constant 0 : i32
      %137 = tpu.memref_slice %arg2[%arg0, %124, %c0_i32_87, %c0_i32_88] : memref<2x16x16x128xf32, #tpu.memory_space<any>> -> memref<1x1x16x128xf32, #tpu.memory_space<any>>
      %138 = tpu.memref_squeeze %137 : memref<1x1x16x128xf32, #tpu.memory_space<any>> -> memref<1x16x128xf32, #tpu.memory_space<any>>
      %c9_i32_89 = arith.constant 9 : i32
      %c1_i32_90 = arith.constant 1 : i32
      %c0_i32_91 = arith.constant 0 : i32
      %139 = tpu.memref_slice %arg7[%115, %c9_i32_89, %c1_i32_90, %c0_i32_91] : memref<2x10x18x128xf32, #tpu.memory_space<vmem>> -> memref<1x1x16x128xf32, #tpu.memory_space<vmem>>
      %140 = tpu.memref_squeeze %139 : memref<1x1x16x128xf32, #tpu.memory_space<vmem>> -> memref<1x16x128xf32, #tpu.memory_space<vmem>>
      %141 = tpu.memref_slice %arg8[%115, %c2_i32_86] : memref<2x3x!tpu.dma_semaphore, #tpu.memory_space<semaphore_mem>> -> memref<1x1x!tpu.dma_semaphore, #tpu.memory_space<semaphore_mem>>
      %142 = tpu.memref_squeeze %141 : memref<1x1x!tpu.dma_semaphore, #tpu.memory_space<semaphore_mem>> -> memref<!tpu.dma_semaphore, #tpu.memory_space<semaphore_mem>>
      tpu.enqueue_dma source(%138 : memref<1x16x128xf32, #tpu.memory_space<any>>) target(%140 : memref<1x16x128xf32, #tpu.memory_space<vmem>>) target_semaphore(%142 : memref<!tpu.dma_semaphore, #tpu.memory_space<semaphore_mem>>)
    } else {
    }
    %26 = arith.index_cast %0 : i32 to index
    %c0 = arith.constant 0 : index
    %c0_23 = arith.constant 0 : index
    %c0_24 = arith.constant 0 : index
    %27 = vector.load %arg7[%26, %c0, %c0_23, %c0_24] : memref<2x10x18x128xf32, #tpu.memory_space<vmem>>, vector<1x10x18x128xf32>
    %28 = vector.shape_cast %27 : vector<1x10x18x128xf32> to vector<10x18x128xf32>
    %29 = tpu.iota {dimensions = array<i32: 1>} : vector<10x18x128xi32>
    %c0_i32_25 = arith.constant 0 : i32
    %30 = vector.broadcast %c0_i32_25 : i32 to vector<10x18x128xi32>
    %31 = arith.cmpi eq, %29, %30 : vector<10x18x128xi32>
    %32 = vector.extract_strided_slice %28 {offsets = [0, 2, 0], sizes = [10, 1, 128], strides = [1, 1, 1]} : vector<10x18x128xf32> to vector<10x1x128xf32>
    %33 = vector.shape_cast %32 : vector<10x1x128xf32> to vector<10x1x128xf32>
    %34 = vector.broadcast %33 : vector<10x1x128xf32> to vector<10x18x128xf32>
    %35 = arith.select %31, %34, %28 : vector<10x18x128xi1>, vector<10x18x128xf32>
    %c17_i32 = arith.constant 17 : i32
    %36 = vector.broadcast %c17_i32 : i32 to vector<10x18x128xi32>
    %37 = arith.cmpi eq, %29, %36 : vector<10x18x128xi32>
    %38 = vector.extract_strided_slice %35 {offsets = [0, 15, 0], sizes = [10, 1, 128], strides = [1, 1, 1]} : vector<10x18x128xf32> to vector<10x1x128xf32>
    %39 = vector.shape_cast %38 : vector<10x1x128xf32> to vector<10x1x128xf32>
    %40 = vector.broadcast %39 : vector<10x1x128xf32> to vector<10x18x128xf32>
    %41 = arith.select %37, %40, %35 : vector<10x18x128xi1>, vector<10x18x128xf32>
    %42 = arith.truncf %41 : vector<10x18x128xf32> to vector<10x18x128xbf16>
    %43 = vector.extract_strided_slice %42 {offsets = [0, 0, 0], sizes = [10, 16, 128], strides = [1, 1, 1]} : vector<10x18x128xbf16> to vector<10x16x128xbf16>
    %44 = vector.extract_strided_slice %43 {offsets = [0, 0, 0], sizes = [8, 16, 128], strides = [1, 1, 1]} : vector<10x16x128xbf16> to vector<8x16x128xbf16>
    %45 = vector.shape_cast %44 : vector<8x16x128xbf16> to vector<128x128xbf16>
    %c0_26 = arith.constant 0 : index
    %c0_27 = arith.constant 0 : index
    %c0_28 = arith.constant 0 : index
    %46 = vector.load %arg3[%c0_26, %c0_27, %c0_28] : memref<9x128x128xbf16, #tpu.memory_space<vmem>>, vector<1x128x128xbf16>
    %47 = vector.shape_cast %46 : vector<1x128x128xbf16> to vector<128x128xbf16>
    %cst = arith.constant dense<0.000000e+00> : vector<128x128xf32>
    %48 = tpu.matmul %45, %47, %cst {dimension_numbers = #tpu.dot_dimension_numbers<[1], [0], [0], [1], [0, 0, 1, 1], [], []>} : vector<128x128xbf16>, vector<128x128xbf16>, vector<128x128xf32> -> vector<128x128xf32>
    %49 = vector.extract_strided_slice %43 {offsets = [1, 0, 0], sizes = [8, 16, 128], strides = [1, 1, 1]} : vector<10x16x128xbf16> to vector<8x16x128xbf16>
    %50 = vector.shape_cast %49 : vector<8x16x128xbf16> to vector<128x128xbf16>
    %c3 = arith.constant 3 : index
    %c0_29 = arith.constant 0 : index
    %c0_30 = arith.constant 0 : index
    %51 = vector.load %arg3[%c3, %c0_29, %c0_30] : memref<9x128x128xbf16, #tpu.memory_space<vmem>>, vector<1x128x128xbf16>
    %52 = vector.shape_cast %51 : vector<1x128x128xbf16> to vector<128x128xbf16>
    %cst_31 = arith.constant dense<0.000000e+00> : vector<128x128xf32>
    %53 = tpu.matmul %50, %52, %cst_31 {dimension_numbers = #tpu.dot_dimension_numbers<[1], [0], [0], [1], [0, 0, 1, 1], [], []>} : vector<128x128xbf16>, vector<128x128xbf16>, vector<128x128xf32> -> vector<128x128xf32>
    %54 = arith.addf %48, %53 : vector<128x128xf32>
    %55 = vector.extract_strided_slice %43 {offsets = [2, 0, 0], sizes = [8, 16, 128], strides = [1, 1, 1]} : vector<10x16x128xbf16> to vector<8x16x128xbf16>
    %56 = vector.shape_cast %55 : vector<8x16x128xbf16> to vector<128x128xbf16>
    %c6 = arith.constant 6 : index
    %c0_32 = arith.constant 0 : index
    %c0_33 = arith.constant 0 : index
    %57 = vector.load %arg3[%c6, %c0_32, %c0_33] : memref<9x128x128xbf16, #tpu.memory_space<vmem>>, vector<1x128x128xbf16>
    %58 = vector.shape_cast %57 : vector<1x128x128xbf16> to vector<128x128xbf16>
    %cst_34 = arith.constant dense<0.000000e+00> : vector<128x128xf32>
    %59 = tpu.matmul %56, %58, %cst_34 {dimension_numbers = #tpu.dot_dimension_numbers<[1], [0], [0], [1], [0, 0, 1, 1], [], []>} : vector<128x128xbf16>, vector<128x128xbf16>, vector<128x128xf32> -> vector<128x128xf32>
    %60 = arith.addf %54, %59 : vector<128x128xf32>
    %61 = vector.extract_strided_slice %42 {offsets = [0, 1, 0], sizes = [10, 16, 128], strides = [1, 1, 1]} : vector<10x18x128xbf16> to vector<10x16x128xbf16>
    %62 = vector.extract_strided_slice %61 {offsets = [0, 0, 0], sizes = [8, 16, 128], strides = [1, 1, 1]} : vector<10x16x128xbf16> to vector<8x16x128xbf16>
    %63 = vector.shape_cast %62 : vector<8x16x128xbf16> to vector<128x128xbf16>
    %c1 = arith.constant 1 : index
    %c0_35 = arith.constant 0 : index
    %c0_36 = arith.constant 0 : index
    %64 = vector.load %arg3[%c1, %c0_35, %c0_36] : memref<9x128x128xbf16, #tpu.memory_space<vmem>>, vector<1x128x128xbf16>
    %65 = vector.shape_cast %64 : vector<1x128x128xbf16> to vector<128x128xbf16>
    %cst_37 = arith.constant dense<0.000000e+00> : vector<128x128xf32>
    %66 = tpu.matmul %63, %65, %cst_37 {dimension_numbers = #tpu.dot_dimension_numbers<[1], [0], [0], [1], [0, 0, 1, 1], [], []>} : vector<128x128xbf16>, vector<128x128xbf16>, vector<128x128xf32> -> vector<128x128xf32>
    %67 = arith.addf %60, %66 : vector<128x128xf32>
    %68 = vector.extract_strided_slice %61 {offsets = [1, 0, 0], sizes = [8, 16, 128], strides = [1, 1, 1]} : vector<10x16x128xbf16> to vector<8x16x128xbf16>
    %69 = vector.shape_cast %68 : vector<8x16x128xbf16> to vector<128x128xbf16>
    %c4 = arith.constant 4 : index
    %c0_38 = arith.constant 0 : index
    %c0_39 = arith.constant 0 : index
    %70 = vector.load %arg3[%c4, %c0_38, %c0_39] : memref<9x128x128xbf16, #tpu.memory_space<vmem>>, vector<1x128x128xbf16>
    %71 = vector.shape_cast %70 : vector<1x128x128xbf16> to vector<128x128xbf16>
    %cst_40 = arith.constant dense<0.000000e+00> : vector<128x128xf32>
    %72 = tpu.matmul %69, %71, %cst_40 {dimension_numbers = #tpu.dot_dimension_numbers<[1], [0], [0], [1], [0, 0, 1, 1], [], []>} : vector<128x128xbf16>, vector<128x128xbf16>, vector<128x128xf32> -> vector<128x128xf32>
    %73 = arith.addf %67, %72 : vector<128x128xf32>
    %74 = vector.extract_strided_slice %61 {offsets = [2, 0, 0], sizes = [8, 16, 128], strides = [1, 1, 1]} : vector<10x16x128xbf16> to vector<8x16x128xbf16>
    %75 = vector.shape_cast %74 : vector<8x16x128xbf16> to vector<128x128xbf16>
    %c7 = arith.constant 7 : index
    %c0_41 = arith.constant 0 : index
    %c0_42 = arith.constant 0 : index
    %76 = vector.load %arg3[%c7, %c0_41, %c0_42] : memref<9x128x128xbf16, #tpu.memory_space<vmem>>, vector<1x128x128xbf16>
    %77 = vector.shape_cast %76 : vector<1x128x128xbf16> to vector<128x128xbf16>
    %cst_43 = arith.constant dense<0.000000e+00> : vector<128x128xf32>
    %78 = tpu.matmul %75, %77, %cst_43 {dimension_numbers = #tpu.dot_dimension_numbers<[1], [0], [0], [1], [0, 0, 1, 1], [], []>} : vector<128x128xbf16>, vector<128x128xbf16>, vector<128x128xf32> -> vector<128x128xf32>
    %79 = arith.addf %73, %78 : vector<128x128xf32>
    %80 = vector.extract_strided_slice %42 {offsets = [0, 2, 0], sizes = [10, 16, 128], strides = [1, 1, 1]} : vector<10x18x128xbf16> to vector<10x16x128xbf16>
    %81 = vector.extract_strided_slice %80 {offsets = [0, 0, 0], sizes = [8, 16, 128], strides = [1, 1, 1]} : vector<10x16x128xbf16> to vector<8x16x128xbf16>
    %82 = vector.shape_cast %81 : vector<8x16x128xbf16> to vector<128x128xbf16>
    %c2 = arith.constant 2 : index
    %c0_44 = arith.constant 0 : index
    %c0_45 = arith.constant 0 : index
    %83 = vector.load %arg3[%c2, %c0_44, %c0_45] : memref<9x128x128xbf16, #tpu.memory_space<vmem>>, vector<1x128x128xbf16>
    %84 = vector.shape_cast %83 : vector<1x128x128xbf16> to vector<128x128xbf16>
    %cst_46 = arith.constant dense<0.000000e+00> : vector<128x128xf32>
    %85 = tpu.matmul %82, %84, %cst_46 {dimension_numbers = #tpu.dot_dimension_numbers<[1], [0], [0], [1], [0, 0, 1, 1], [], []>} : vector<128x128xbf16>, vector<128x128xbf16>, vector<128x128xf32> -> vector<128x128xf32>
    %86 = arith.addf %79, %85 : vector<128x128xf32>
    %87 = vector.extract_strided_slice %80 {offsets = [1, 0, 0], sizes = [8, 16, 128], strides = [1, 1, 1]} : vector<10x16x128xbf16> to vector<8x16x128xbf16>
    %88 = vector.shape_cast %87 : vector<8x16x128xbf16> to vector<128x128xbf16>
    %c5 = arith.constant 5 : index
    %c0_47 = arith.constant 0 : index
    %c0_48 = arith.constant 0 : index
    %89 = vector.load %arg3[%c5, %c0_47, %c0_48] : memref<9x128x128xbf16, #tpu.memory_space<vmem>>, vector<1x128x128xbf16>
    %90 = vector.shape_cast %89 : vector<1x128x128xbf16> to vector<128x128xbf16>
    %cst_49 = arith.constant dense<0.000000e+00> : vector<128x128xf32>
    %91 = tpu.matmul %88, %90, %cst_49 {dimension_numbers = #tpu.dot_dimension_numbers<[1], [0], [0], [1], [0, 0, 1, 1], [], []>} : vector<128x128xbf16>, vector<128x128xbf16>, vector<128x128xf32> -> vector<128x128xf32>
    %92 = arith.addf %86, %91 : vector<128x128xf32>
    %93 = vector.extract_strided_slice %80 {offsets = [2, 0, 0], sizes = [8, 16, 128], strides = [1, 1, 1]} : vector<10x16x128xbf16> to vector<8x16x128xbf16>
    %94 = vector.shape_cast %93 : vector<8x16x128xbf16> to vector<128x128xbf16>
    %c8 = arith.constant 8 : index
    %c0_50 = arith.constant 0 : index
    %c0_51 = arith.constant 0 : index
    %95 = vector.load %arg3[%c8, %c0_50, %c0_51] : memref<9x128x128xbf16, #tpu.memory_space<vmem>>, vector<1x128x128xbf16>
    %96 = vector.shape_cast %95 : vector<1x128x128xbf16> to vector<128x128xbf16>
    %cst_52 = arith.constant dense<0.000000e+00> : vector<128x128xf32>
    %97 = tpu.matmul %94, %96, %cst_52 {dimension_numbers = #tpu.dot_dimension_numbers<[1], [0], [0], [1], [0, 0, 1, 1], [], []>} : vector<128x128xbf16>, vector<128x128xbf16>, vector<128x128xf32> -> vector<128x128xf32>
    %98 = arith.addf %92, %97 : vector<128x128xf32>
    %99 = vector.shape_cast %98 : vector<128x128xf32> to vector<8x16x128xf32>
    %c0_53 = arith.constant 0 : index
    %c0_54 = arith.constant 0 : index
    %c0_55 = arith.constant 0 : index
    %c0_56 = arith.constant 0 : index
    %100 = vector.load %arg4[%c0_53, %c0_54, %c0_55, %c0_56] : memref<1x8x16x128xf32, #tpu.memory_space<vmem>>, vector<1x8x16x128xf32>
    %101 = vector.shape_cast %100 : vector<1x8x16x128xf32> to vector<8x16x128xf32>
    %102 = vector.shape_cast %99 : vector<8x16x128xf32> to vector<1x8x16x128xf32>
    tpu.vector_store %arg4[%c0_53, %c0_54, %c0_55, %c0_56], %102 {strides = array<i32>} : memref<1x8x16x128xf32, #tpu.memory_space<vmem>>, vector<1x8x16x128xf32>,
    %cst_57 = arith.constant dense<0.000000e+00> : vector<128xf32>
    %103 = vector.multi_reduction <add>, %98, %cst_57 [0] : vector<128x128xf32> to vector<128xf32>
    %104 = vector.shape_cast %103 : vector<128xf32> to vector<1x128xf32>
    %c0_58 = arith.constant 0 : index
    %c0_59 = arith.constant 0 : index
    %c0_60 = arith.constant 0 : index
    %c0_61 = arith.constant 0 : index
    %105 = vector.load %arg5[%c0_58, %c0_59, %c0_60, %c0_61] : memref<1x1x1x128xf32, #tpu.memory_space<vmem>>, vector<1x1x1x128xf32>
    %106 = vector.shape_cast %105 : vector<1x1x1x128xf32> to vector<1x128xf32>
    %107 = vector.shape_cast %104 : vector<1x128xf32> to vector<1x1x1x128xf32>
    tpu.vector_store %arg5[%c0_58, %c0_59, %c0_60, %c0_61], %107 {strides = array<i32>} : memref<1x1x1x128xf32, #tpu.memory_space<vmem>>, vector<1x1x1x128xf32>,
    %108 = arith.mulf %98, %98 : vector<128x128xf32>
    %cst_62 = arith.constant dense<0.000000e+00> : vector<128xf32>
    %109 = vector.multi_reduction <add>, %108, %cst_62 [0] : vector<128x128xf32> to vector<128xf32>
    %110 = vector.shape_cast %109 : vector<128xf32> to vector<1x128xf32>
    %c0_63 = arith.constant 0 : index
    %c0_64 = arith.constant 0 : index
    %c0_65 = arith.constant 0 : index
    %c0_66 = arith.constant 0 : index
    %111 = vector.load %arg6[%c0_63, %c0_64, %c0_65, %c0_66] : memref<1x1x1x128xf32, #tpu.memory_space<vmem>>, vector<1x1x1x128xf32>
    %112 = vector.shape_cast %111 : vector<1x1x1x128xf32> to vector<1x128xf32>
    %113 = vector.shape_cast %110 : vector<1x128xf32> to vector<1x1x1x128xf32>
    tpu.vector_store %arg6[%c0_63, %c0_64, %c0_65, %c0_66], %113 {strides = array<i32>} : memref<1x1x1x128xf32, #tpu.memory_space<vmem>>, vector<1x1x1x128xf32>,
    return
  }
  func.func @transform_1(%arg0: i32, %arg1: i32) -> (i32, i32, i32) {
    %c0_i32 = arith.constant 0 : i32
    %c0_i32_0 = arith.constant 0 : i32
    %c0_i32_1 = arith.constant 0 : i32
    %c0_i32_2 = arith.constant 0 : i32
    return %c0_i32, %c0_i32_0, %c0_i32_1 : i32, i32, i32
  }
  func.func @transform_2(%arg0: i32, %arg1: i32) -> (i32, i32, i32, i32) {
    %c0_i32 = arith.constant 0 : i32
    %c0_i32_0 = arith.constant 0 : i32
    %c0_i32_1 = arith.constant 0 : i32
    return %arg0, %arg1, %c0_i32, %c0_i32_0 : i32, i32, i32, i32
  }
  func.func @transform_3(%arg0: i32, %arg1: i32) -> (i32, i32, i32, i32) {
    %c0_i32 = arith.constant 0 : i32
    %c0_i32_0 = arith.constant 0 : i32
    %c0_i32_1 = arith.constant 0 : i32
    return %arg0, %arg1, %c0_i32, %c0_i32_0 : i32, i32, i32, i32
  }
  func.func @transform_4(%arg0: i32, %arg1: i32) -> (i32, i32, i32, i32) {
    %c0_i32 = arith.constant 0 : i32
    %c0_i32_0 = arith.constant 0 : i32
    %c0_i32_1 = arith.constant 0 : i32
    return %arg0, %arg1, %c0_i32, %c0_i32_0 : i32, i32, i32, i32
  }
}

module attributes {stable_mosaic.version = 11 : i64} {
  func.func @kernel(%arg0: i32, %arg1: i32, %arg2: memref<2x16x16x128xf32, #tpu.memory_space<any>>, %arg3: memref<9x128x128xbf16, #tpu.memory_space<vmem>>, %arg4: memref<1x1x128xf32, #tpu.memory_space<vmem>>, %arg5: memref<1x1x128xf32, #tpu.memory_space<vmem>>, %arg6: memref<1x8x16x128xf32, #tpu.memory_space<vmem>>, %arg7: memref<1x1x1x128xf32, #tpu.memory_space<vmem>>, %arg8: memref<1x1x1x128xf32, #tpu.memory_space<vmem>>, %arg9: memref<2x10x18x128xf32, #tpu.memory_space<vmem>>, %arg10: memref<2x3x!tpu.dma_semaphore, #tpu.memory_space<semaphore_mem>>) attributes {dimension_semantics = [#tpu.dimension_semantics<parallel>, #tpu.dimension_semantics<arbitrary>], iteration_bounds = array<i64: 2, 2>, scalar_prefetch = 0 : i64, scratch_operands = 2 : i64, tpu.core_type = #tpu.core_type<tc>, window_params = [{}, {pipeline_mode = #tpu.pipeline_mode<synchronous>, transform_indices = @transform_1, window_bounds = array<i64: 9, 128, 128>}, {pipeline_mode = #tpu.pipeline_mode<synchronous>, transform_indices = @transform_2, window_bounds = array<i64: 1, 1, 128>}, {pipeline_mode = #tpu.pipeline_mode<synchronous>, transform_indices = @transform_3, window_bounds = array<i64: 1, 1, 128>}, {transform_indices = @transform_4, window_bounds = array<i64: 1, 8, 16, 128>}, {transform_indices = @transform_5, window_bounds = array<i64: 1, 1, 1, 128>}, {transform_indices = @transform_6, window_bounds = array<i64: 1, 1, 1, 128>}]} {
    %c2_i32 = arith.constant 2 : i32
    %0 = arith.remsi %arg1, %c2_i32 : i32
    %c0_i32 = arith.constant 0 : i32
    %1 = arith.cmpi eq, %arg1, %c0_i32 : i32
    %2 = arith.extui %1 : i1 to i32
    %c0_i32_0 = arith.constant 0 : i32
    %3 = arith.cmpi ne, %2, %c0_i32_0 : i32
    scf.if %3 {
      %c8_i32 = arith.constant 8 : i32
      %122 = arith.muli %arg1, %c8_i32 : i32
      %123 = tpu.assume_multiple %122, 8 : i32
      %c0_i32_74 = arith.constant 0 : i32
      %124 = arith.cmpi eq, %123, %c0_i32_74 : i32
      %c1_i32_75 = arith.constant 1 : i32
      %125 = arith.subi %123, %c1_i32_75 : i32
      %c1_i32_76 = arith.constant 1 : i32
      %126 = arith.select %124, %c1_i32_76, %125 : i32
      %c8_i32_77 = arith.constant 8 : i32
      %127 = arith.addi %123, %c8_i32_77 : i32
      %c16_i32 = arith.constant 16 : i32
      %128 = arith.cmpi eq, %127, %c16_i32 : i32
      %c8_i32_78 = arith.constant 8 : i32
      %129 = arith.addi %123, %c8_i32_78 : i32
      %c14_i32 = arith.constant 14 : i32
      %130 = arith.select %128, %c14_i32, %129 : i32
      %c0_i32_79 = arith.constant 0 : i32
      %c0_i32_80 = arith.constant 0 : i32
      %c0_i32_81 = arith.constant 0 : i32
      %131 = tpu.memref_slice %arg2[%arg0, %126, %c0_i32_80, %c0_i32_81] : memref<2x16x16x128xf32, #tpu.memory_space<any>> -> memref<1x1x16x128xf32, #tpu.memory_space<any>>
      %132 = tpu.memref_squeeze %131 : memref<1x1x16x128xf32, #tpu.memory_space<any>> -> memref<1x16x128xf32, #tpu.memory_space<any>>
      %c0_i32_82 = arith.constant 0 : i32
      %c1_i32_83 = arith.constant 1 : i32
      %c0_i32_84 = arith.constant 0 : i32
      %133 = tpu.memref_slice %arg9[%0, %c0_i32_82, %c1_i32_83, %c0_i32_84] : memref<2x10x18x128xf32, #tpu.memory_space<vmem>> -> memref<1x1x16x128xf32, #tpu.memory_space<vmem>>
      %134 = tpu.memref_squeeze %133 : memref<1x1x16x128xf32, #tpu.memory_space<vmem>> -> memref<1x16x128xf32, #tpu.memory_space<vmem>>
      %135 = tpu.memref_slice %arg10[%0, %c0_i32_79] : memref<2x3x!tpu.dma_semaphore, #tpu.memory_space<semaphore_mem>> -> memref<1x1x!tpu.dma_semaphore, #tpu.memory_space<semaphore_mem>>
      %136 = tpu.memref_squeeze %135 : memref<1x1x!tpu.dma_semaphore, #tpu.memory_space<semaphore_mem>> -> memref<!tpu.dma_semaphore, #tpu.memory_space<semaphore_mem>>
      tpu.enqueue_dma source(%132 : memref<1x16x128xf32, #tpu.memory_space<any>>) target(%134 : memref<1x16x128xf32, #tpu.memory_space<vmem>>) target_semaphore(%136 : memref<!tpu.dma_semaphore, #tpu.memory_space<semaphore_mem>>)
      %c1_i32_85 = arith.constant 1 : i32
      %c0_i32_86 = arith.constant 0 : i32
      %c0_i32_87 = arith.constant 0 : i32
      %137 = tpu.memref_slice %arg2[%arg0, %123, %c0_i32_86, %c0_i32_87] : memref<2x16x16x128xf32, #tpu.memory_space<any>> -> memref<1x8x16x128xf32, #tpu.memory_space<any>>
      %138 = tpu.memref_squeeze %137 : memref<1x8x16x128xf32, #tpu.memory_space<any>> -> memref<8x16x128xf32, #tpu.memory_space<any>>
      %c1_i32_88 = arith.constant 1 : i32
      %c1_i32_89 = arith.constant 1 : i32
      %c0_i32_90 = arith.constant 0 : i32
      %139 = tpu.memref_slice %arg9[%0, %c1_i32_88, %c1_i32_89, %c0_i32_90] : memref<2x10x18x128xf32, #tpu.memory_space<vmem>> -> memref<1x8x16x128xf32, #tpu.memory_space<vmem>>
      %140 = tpu.memref_squeeze %139 : memref<1x8x16x128xf32, #tpu.memory_space<vmem>> -> memref<8x16x128xf32, #tpu.memory_space<vmem>>
      %141 = tpu.memref_slice %arg10[%0, %c1_i32_85] : memref<2x3x!tpu.dma_semaphore, #tpu.memory_space<semaphore_mem>> -> memref<1x1x!tpu.dma_semaphore, #tpu.memory_space<semaphore_mem>>
      %142 = tpu.memref_squeeze %141 : memref<1x1x!tpu.dma_semaphore, #tpu.memory_space<semaphore_mem>> -> memref<!tpu.dma_semaphore, #tpu.memory_space<semaphore_mem>>
      tpu.enqueue_dma source(%138 : memref<8x16x128xf32, #tpu.memory_space<any>>) target(%140 : memref<8x16x128xf32, #tpu.memory_space<vmem>>) target_semaphore(%142 : memref<!tpu.dma_semaphore, #tpu.memory_space<semaphore_mem>>)
      %c2_i32_91 = arith.constant 2 : i32
      %c0_i32_92 = arith.constant 0 : i32
      %c0_i32_93 = arith.constant 0 : i32
      %143 = tpu.memref_slice %arg2[%arg0, %130, %c0_i32_92, %c0_i32_93] : memref<2x16x16x128xf32, #tpu.memory_space<any>> -> memref<1x1x16x128xf32, #tpu.memory_space<any>>
      %144 = tpu.memref_squeeze %143 : memref<1x1x16x128xf32, #tpu.memory_space<any>> -> memref<1x16x128xf32, #tpu.memory_space<any>>
      %c9_i32_94 = arith.constant 9 : i32
      %c1_i32_95 = arith.constant 1 : i32
      %c0_i32_96 = arith.constant 0 : i32
      %145 = tpu.memref_slice %arg9[%0, %c9_i32_94, %c1_i32_95, %c0_i32_96] : memref<2x10x18x128xf32, #tpu.memory_space<vmem>> -> memref<1x1x16x128xf32, #tpu.memory_space<vmem>>
      %146 = tpu.memref_squeeze %145 : memref<1x1x16x128xf32, #tpu.memory_space<vmem>> -> memref<1x16x128xf32, #tpu.memory_space<vmem>>
      %147 = tpu.memref_slice %arg10[%0, %c2_i32_91] : memref<2x3x!tpu.dma_semaphore, #tpu.memory_space<semaphore_mem>> -> memref<1x1x!tpu.dma_semaphore, #tpu.memory_space<semaphore_mem>>
      %148 = tpu.memref_squeeze %147 : memref<1x1x!tpu.dma_semaphore, #tpu.memory_space<semaphore_mem>> -> memref<!tpu.dma_semaphore, #tpu.memory_space<semaphore_mem>>
      tpu.enqueue_dma source(%144 : memref<1x16x128xf32, #tpu.memory_space<any>>) target(%146 : memref<1x16x128xf32, #tpu.memory_space<vmem>>) target_semaphore(%148 : memref<!tpu.dma_semaphore, #tpu.memory_space<semaphore_mem>>)
    } else {
    }
    %c0_i32_1 = arith.constant 0 : i32
    %c0_i32_2 = arith.constant 0 : i32
    %c0_i32_3 = arith.constant 0 : i32
    %c0_i32_4 = arith.constant 0 : i32
    %4 = tpu.memref_slice %arg2[%arg0, %c0_i32_2, %c0_i32_3, %c0_i32_4] : memref<2x16x16x128xf32, #tpu.memory_space<any>> -> memref<1x1x16x128xf32, #tpu.memory_space<any>>
    %5 = tpu.memref_squeeze %4 : memref<1x1x16x128xf32, #tpu.memory_space<any>> -> memref<1x16x128xf32, #tpu.memory_space<any>>
    %c0_i32_5 = arith.constant 0 : i32
    %c1_i32 = arith.constant 1 : i32
    %c0_i32_6 = arith.constant 0 : i32
    %6 = tpu.memref_slice %arg9[%0, %c0_i32_5, %c1_i32, %c0_i32_6] : memref<2x10x18x128xf32, #tpu.memory_space<vmem>> -> memref<1x1x16x128xf32, #tpu.memory_space<vmem>>
    %7 = tpu.memref_squeeze %6 : memref<1x1x16x128xf32, #tpu.memory_space<vmem>> -> memref<1x16x128xf32, #tpu.memory_space<vmem>>
    %8 = tpu.memref_slice %arg10[%0, %c0_i32_1] : memref<2x3x!tpu.dma_semaphore, #tpu.memory_space<semaphore_mem>> -> memref<1x1x!tpu.dma_semaphore, #tpu.memory_space<semaphore_mem>>
    %9 = tpu.memref_squeeze %8 : memref<1x1x!tpu.dma_semaphore, #tpu.memory_space<semaphore_mem>> -> memref<!tpu.dma_semaphore, #tpu.memory_space<semaphore_mem>>
    tpu.wait_dma2 semaphore(%9 : memref<!tpu.dma_semaphore, #tpu.memory_space<semaphore_mem>>) src(%5 : memref<1x16x128xf32, #tpu.memory_space<any>>) dst(%7 : memref<1x16x128xf32, #tpu.memory_space<vmem>>)
    %c1_i32_7 = arith.constant 1 : i32
    %c0_i32_8 = arith.constant 0 : i32
    %c0_i32_9 = arith.constant 0 : i32
    %c0_i32_10 = arith.constant 0 : i32
    %10 = tpu.memref_slice %arg2[%arg0, %c0_i32_8, %c0_i32_9, %c0_i32_10] : memref<2x16x16x128xf32, #tpu.memory_space<any>> -> memref<1x8x16x128xf32, #tpu.memory_space<any>>
    %11 = tpu.memref_squeeze %10 : memref<1x8x16x128xf32, #tpu.memory_space<any>> -> memref<8x16x128xf32, #tpu.memory_space<any>>
    %c1_i32_11 = arith.constant 1 : i32
    %c1_i32_12 = arith.constant 1 : i32
    %c0_i32_13 = arith.constant 0 : i32
    %12 = tpu.memref_slice %arg9[%0, %c1_i32_11, %c1_i32_12, %c0_i32_13] : memref<2x10x18x128xf32, #tpu.memory_space<vmem>> -> memref<1x8x16x128xf32, #tpu.memory_space<vmem>>
    %13 = tpu.memref_squeeze %12 : memref<1x8x16x128xf32, #tpu.memory_space<vmem>> -> memref<8x16x128xf32, #tpu.memory_space<vmem>>
    %14 = tpu.memref_slice %arg10[%0, %c1_i32_7] : memref<2x3x!tpu.dma_semaphore, #tpu.memory_space<semaphore_mem>> -> memref<1x1x!tpu.dma_semaphore, #tpu.memory_space<semaphore_mem>>
    %15 = tpu.memref_squeeze %14 : memref<1x1x!tpu.dma_semaphore, #tpu.memory_space<semaphore_mem>> -> memref<!tpu.dma_semaphore, #tpu.memory_space<semaphore_mem>>
    tpu.wait_dma2 semaphore(%15 : memref<!tpu.dma_semaphore, #tpu.memory_space<semaphore_mem>>) src(%11 : memref<8x16x128xf32, #tpu.memory_space<any>>) dst(%13 : memref<8x16x128xf32, #tpu.memory_space<vmem>>)
    %c2_i32_14 = arith.constant 2 : i32
    %c0_i32_15 = arith.constant 0 : i32
    %c0_i32_16 = arith.constant 0 : i32
    %c0_i32_17 = arith.constant 0 : i32
    %16 = tpu.memref_slice %arg2[%arg0, %c0_i32_15, %c0_i32_16, %c0_i32_17] : memref<2x16x16x128xf32, #tpu.memory_space<any>> -> memref<1x1x16x128xf32, #tpu.memory_space<any>>
    %17 = tpu.memref_squeeze %16 : memref<1x1x16x128xf32, #tpu.memory_space<any>> -> memref<1x16x128xf32, #tpu.memory_space<any>>
    %c9_i32 = arith.constant 9 : i32
    %c1_i32_18 = arith.constant 1 : i32
    %c0_i32_19 = arith.constant 0 : i32
    %18 = tpu.memref_slice %arg9[%0, %c9_i32, %c1_i32_18, %c0_i32_19] : memref<2x10x18x128xf32, #tpu.memory_space<vmem>> -> memref<1x1x16x128xf32, #tpu.memory_space<vmem>>
    %19 = tpu.memref_squeeze %18 : memref<1x1x16x128xf32, #tpu.memory_space<vmem>> -> memref<1x16x128xf32, #tpu.memory_space<vmem>>
    %20 = tpu.memref_slice %arg10[%0, %c2_i32_14] : memref<2x3x!tpu.dma_semaphore, #tpu.memory_space<semaphore_mem>> -> memref<1x1x!tpu.dma_semaphore, #tpu.memory_space<semaphore_mem>>
    %21 = tpu.memref_squeeze %20 : memref<1x1x!tpu.dma_semaphore, #tpu.memory_space<semaphore_mem>> -> memref<!tpu.dma_semaphore, #tpu.memory_space<semaphore_mem>>
    tpu.wait_dma2 semaphore(%21 : memref<!tpu.dma_semaphore, #tpu.memory_space<semaphore_mem>>) src(%17 : memref<1x16x128xf32, #tpu.memory_space<any>>) dst(%19 : memref<1x16x128xf32, #tpu.memory_space<vmem>>)
    %c1_i32_20 = arith.constant 1 : i32
    %22 = arith.addi %arg1, %c1_i32_20 : i32
    %c2_i32_21 = arith.constant 2 : i32
    %23 = arith.cmpi slt, %22, %c2_i32_21 : i32
    %24 = arith.extui %23 : i1 to i32
    %c0_i32_22 = arith.constant 0 : i32
    %25 = arith.cmpi ne, %24, %c0_i32_22 : i32
    scf.if %25 {
      %c1_i32_74 = arith.constant 1 : i32
      %122 = arith.addi %arg1, %c1_i32_74 : i32
      %c1_i32_75 = arith.constant 1 : i32
      %123 = arith.subi %c1_i32_75, %0 : i32
      %c8_i32 = arith.constant 8 : i32
      %124 = arith.muli %122, %c8_i32 : i32
      %125 = tpu.assume_multiple %124, 8 : i32
      %c0_i32_76 = arith.constant 0 : i32
      %126 = arith.cmpi eq, %125, %c0_i32_76 : i32
      %c1_i32_77 = arith.constant 1 : i32
      %127 = arith.subi %125, %c1_i32_77 : i32
      %c1_i32_78 = arith.constant 1 : i32
      %128 = arith.select %126, %c1_i32_78, %127 : i32
      %c8_i32_79 = arith.constant 8 : i32
      %129 = arith.addi %125, %c8_i32_79 : i32
      %c16_i32 = arith.constant 16 : i32
      %130 = arith.cmpi eq, %129, %c16_i32 : i32
      %c8_i32_80 = arith.constant 8 : i32
      %131 = arith.addi %125, %c8_i32_80 : i32
      %c14_i32 = arith.constant 14 : i32
      %132 = arith.select %130, %c14_i32, %131 : i32
      %c0_i32_81 = arith.constant 0 : i32
      %c0_i32_82 = arith.constant 0 : i32
      %c0_i32_83 = arith.constant 0 : i32
      %133 = tpu.memref_slice %arg2[%arg0, %128, %c0_i32_82, %c0_i32_83] : memref<2x16x16x128xf32, #tpu.memory_space<any>> -> memref<1x1x16x128xf32, #tpu.memory_space<any>>
      %134 = tpu.memref_squeeze %133 : memref<1x1x16x128xf32, #tpu.memory_space<any>> -> memref<1x16x128xf32, #tpu.memory_space<any>>
      %c0_i32_84 = arith.constant 0 : i32
      %c1_i32_85 = arith.constant 1 : i32
      %c0_i32_86 = arith.constant 0 : i32
      %135 = tpu.memref_slice %arg9[%123, %c0_i32_84, %c1_i32_85, %c0_i32_86] : memref<2x10x18x128xf32, #tpu.memory_space<vmem>> -> memref<1x1x16x128xf32, #tpu.memory_space<vmem>>
      %136 = tpu.memref_squeeze %135 : memref<1x1x16x128xf32, #tpu.memory_space<vmem>> -> memref<1x16x128xf32, #tpu.memory_space<vmem>>
      %137 = tpu.memref_slice %arg10[%123, %c0_i32_81] : memref<2x3x!tpu.dma_semaphore, #tpu.memory_space<semaphore_mem>> -> memref<1x1x!tpu.dma_semaphore, #tpu.memory_space<semaphore_mem>>
      %138 = tpu.memref_squeeze %137 : memref<1x1x!tpu.dma_semaphore, #tpu.memory_space<semaphore_mem>> -> memref<!tpu.dma_semaphore, #tpu.memory_space<semaphore_mem>>
      tpu.enqueue_dma source(%134 : memref<1x16x128xf32, #tpu.memory_space<any>>) target(%136 : memref<1x16x128xf32, #tpu.memory_space<vmem>>) target_semaphore(%138 : memref<!tpu.dma_semaphore, #tpu.memory_space<semaphore_mem>>)
      %c1_i32_87 = arith.constant 1 : i32
      %c0_i32_88 = arith.constant 0 : i32
      %c0_i32_89 = arith.constant 0 : i32
      %139 = tpu.memref_slice %arg2[%arg0, %125, %c0_i32_88, %c0_i32_89] : memref<2x16x16x128xf32, #tpu.memory_space<any>> -> memref<1x8x16x128xf32, #tpu.memory_space<any>>
      %140 = tpu.memref_squeeze %139 : memref<1x8x16x128xf32, #tpu.memory_space<any>> -> memref<8x16x128xf32, #tpu.memory_space<any>>
      %c1_i32_90 = arith.constant 1 : i32
      %c1_i32_91 = arith.constant 1 : i32
      %c0_i32_92 = arith.constant 0 : i32
      %141 = tpu.memref_slice %arg9[%123, %c1_i32_90, %c1_i32_91, %c0_i32_92] : memref<2x10x18x128xf32, #tpu.memory_space<vmem>> -> memref<1x8x16x128xf32, #tpu.memory_space<vmem>>
      %142 = tpu.memref_squeeze %141 : memref<1x8x16x128xf32, #tpu.memory_space<vmem>> -> memref<8x16x128xf32, #tpu.memory_space<vmem>>
      %143 = tpu.memref_slice %arg10[%123, %c1_i32_87] : memref<2x3x!tpu.dma_semaphore, #tpu.memory_space<semaphore_mem>> -> memref<1x1x!tpu.dma_semaphore, #tpu.memory_space<semaphore_mem>>
      %144 = tpu.memref_squeeze %143 : memref<1x1x!tpu.dma_semaphore, #tpu.memory_space<semaphore_mem>> -> memref<!tpu.dma_semaphore, #tpu.memory_space<semaphore_mem>>
      tpu.enqueue_dma source(%140 : memref<8x16x128xf32, #tpu.memory_space<any>>) target(%142 : memref<8x16x128xf32, #tpu.memory_space<vmem>>) target_semaphore(%144 : memref<!tpu.dma_semaphore, #tpu.memory_space<semaphore_mem>>)
      %c2_i32_93 = arith.constant 2 : i32
      %c0_i32_94 = arith.constant 0 : i32
      %c0_i32_95 = arith.constant 0 : i32
      %145 = tpu.memref_slice %arg2[%arg0, %132, %c0_i32_94, %c0_i32_95] : memref<2x16x16x128xf32, #tpu.memory_space<any>> -> memref<1x1x16x128xf32, #tpu.memory_space<any>>
      %146 = tpu.memref_squeeze %145 : memref<1x1x16x128xf32, #tpu.memory_space<any>> -> memref<1x16x128xf32, #tpu.memory_space<any>>
      %c9_i32_96 = arith.constant 9 : i32
      %c1_i32_97 = arith.constant 1 : i32
      %c0_i32_98 = arith.constant 0 : i32
      %147 = tpu.memref_slice %arg9[%123, %c9_i32_96, %c1_i32_97, %c0_i32_98] : memref<2x10x18x128xf32, #tpu.memory_space<vmem>> -> memref<1x1x16x128xf32, #tpu.memory_space<vmem>>
      %148 = tpu.memref_squeeze %147 : memref<1x1x16x128xf32, #tpu.memory_space<vmem>> -> memref<1x16x128xf32, #tpu.memory_space<vmem>>
      %149 = tpu.memref_slice %arg10[%123, %c2_i32_93] : memref<2x3x!tpu.dma_semaphore, #tpu.memory_space<semaphore_mem>> -> memref<1x1x!tpu.dma_semaphore, #tpu.memory_space<semaphore_mem>>
      %150 = tpu.memref_squeeze %149 : memref<1x1x!tpu.dma_semaphore, #tpu.memory_space<semaphore_mem>> -> memref<!tpu.dma_semaphore, #tpu.memory_space<semaphore_mem>>
      tpu.enqueue_dma source(%146 : memref<1x16x128xf32, #tpu.memory_space<any>>) target(%148 : memref<1x16x128xf32, #tpu.memory_space<vmem>>) target_semaphore(%150 : memref<!tpu.dma_semaphore, #tpu.memory_space<semaphore_mem>>)
    } else {
    }
    %26 = arith.index_cast %0 : i32 to index
    %c0 = arith.constant 0 : index
    %c0_23 = arith.constant 0 : index
    %c0_24 = arith.constant 0 : index
    %27 = vector.load %arg9[%26, %c0, %c0_23, %c0_24] : memref<2x10x18x128xf32, #tpu.memory_space<vmem>>, vector<1x10x18x128xf32>
    %28 = vector.shape_cast %27 : vector<1x10x18x128xf32> to vector<10x18x128xf32>
    %29 = tpu.iota {dimensions = array<i32: 1>} : vector<10x18x128xi32>
    %c0_i32_25 = arith.constant 0 : i32
    %30 = vector.broadcast %c0_i32_25 : i32 to vector<10x18x128xi32>
    %31 = arith.cmpi eq, %29, %30 : vector<10x18x128xi32>
    %32 = vector.extract_strided_slice %28 {offsets = [0, 2, 0], sizes = [10, 1, 128], strides = [1, 1, 1]} : vector<10x18x128xf32> to vector<10x1x128xf32>
    %33 = vector.shape_cast %32 : vector<10x1x128xf32> to vector<10x1x128xf32>
    %34 = vector.broadcast %33 : vector<10x1x128xf32> to vector<10x18x128xf32>
    %35 = arith.select %31, %34, %28 : vector<10x18x128xi1>, vector<10x18x128xf32>
    %c17_i32 = arith.constant 17 : i32
    %36 = vector.broadcast %c17_i32 : i32 to vector<10x18x128xi32>
    %37 = arith.cmpi eq, %29, %36 : vector<10x18x128xi32>
    %38 = vector.extract_strided_slice %35 {offsets = [0, 15, 0], sizes = [10, 1, 128], strides = [1, 1, 1]} : vector<10x18x128xf32> to vector<10x1x128xf32>
    %39 = vector.shape_cast %38 : vector<10x1x128xf32> to vector<10x1x128xf32>
    %40 = vector.broadcast %39 : vector<10x1x128xf32> to vector<10x18x128xf32>
    %41 = arith.select %37, %40, %35 : vector<10x18x128xi1>, vector<10x18x128xf32>
    %c0_26 = arith.constant 0 : index
    %c0_27 = arith.constant 0 : index
    %c0_28 = arith.constant 0 : index
    %42 = vector.load %arg4[%c0_26, %c0_27, %c0_28] : memref<1x1x128xf32, #tpu.memory_space<vmem>>, vector<1x1x128xf32>
    %43 = vector.broadcast %42 : vector<1x1x128xf32> to vector<10x18x128xf32>
    %44 = arith.mulf %41, %43 : vector<10x18x128xf32>
    %c0_29 = arith.constant 0 : index
    %c0_30 = arith.constant 0 : index
    %c0_31 = arith.constant 0 : index
    %45 = vector.load %arg5[%c0_29, %c0_30, %c0_31] : memref<1x1x128xf32, #tpu.memory_space<vmem>>, vector<1x1x128xf32>
    %46 = vector.broadcast %45 : vector<1x1x128xf32> to vector<10x18x128xf32>
    %47 = arith.addf %44, %46 : vector<10x18x128xf32>
    %cst = arith.constant 0.000000e+00 : f32
    %48 = vector.broadcast %cst : f32 to vector<10x18x128xf32>
    %49 = arith.maximumf %47, %48 : vector<10x18x128xf32>
    %50 = arith.truncf %49 : vector<10x18x128xf32> to vector<10x18x128xbf16>
    %51 = vector.extract_strided_slice %50 {offsets = [0, 0, 0], sizes = [10, 16, 128], strides = [1, 1, 1]} : vector<10x18x128xbf16> to vector<10x16x128xbf16>
    %52 = vector.extract_strided_slice %51 {offsets = [0, 0, 0], sizes = [8, 16, 128], strides = [1, 1, 1]} : vector<10x16x128xbf16> to vector<8x16x128xbf16>
    %53 = vector.shape_cast %52 : vector<8x16x128xbf16> to vector<128x128xbf16>
    %c0_32 = arith.constant 0 : index
    %c0_33 = arith.constant 0 : index
    %c0_34 = arith.constant 0 : index
    %54 = vector.load %arg3[%c0_32, %c0_33, %c0_34] : memref<9x128x128xbf16, #tpu.memory_space<vmem>>, vector<1x128x128xbf16>
    %55 = vector.shape_cast %54 : vector<1x128x128xbf16> to vector<128x128xbf16>
    %cst_35 = arith.constant dense<0.000000e+00> : vector<128x128xf32>
    %56 = tpu.matmul %53, %55, %cst_35 {dimension_numbers = #tpu.dot_dimension_numbers<[1], [0], [0], [1], [0, 0, 1, 1], [], []>} : vector<128x128xbf16>, vector<128x128xbf16>, vector<128x128xf32> -> vector<128x128xf32>
    %57 = vector.extract_strided_slice %51 {offsets = [1, 0, 0], sizes = [8, 16, 128], strides = [1, 1, 1]} : vector<10x16x128xbf16> to vector<8x16x128xbf16>
    %58 = vector.shape_cast %57 : vector<8x16x128xbf16> to vector<128x128xbf16>
    %c3 = arith.constant 3 : index
    %c0_36 = arith.constant 0 : index
    %c0_37 = arith.constant 0 : index
    %59 = vector.load %arg3[%c3, %c0_36, %c0_37] : memref<9x128x128xbf16, #tpu.memory_space<vmem>>, vector<1x128x128xbf16>
    %60 = vector.shape_cast %59 : vector<1x128x128xbf16> to vector<128x128xbf16>
    %cst_38 = arith.constant dense<0.000000e+00> : vector<128x128xf32>
    %61 = tpu.matmul %58, %60, %cst_38 {dimension_numbers = #tpu.dot_dimension_numbers<[1], [0], [0], [1], [0, 0, 1, 1], [], []>} : vector<128x128xbf16>, vector<128x128xbf16>, vector<128x128xf32> -> vector<128x128xf32>
    %62 = arith.addf %56, %61 : vector<128x128xf32>
    %63 = vector.extract_strided_slice %51 {offsets = [2, 0, 0], sizes = [8, 16, 128], strides = [1, 1, 1]} : vector<10x16x128xbf16> to vector<8x16x128xbf16>
    %64 = vector.shape_cast %63 : vector<8x16x128xbf16> to vector<128x128xbf16>
    %c6 = arith.constant 6 : index
    %c0_39 = arith.constant 0 : index
    %c0_40 = arith.constant 0 : index
    %65 = vector.load %arg3[%c6, %c0_39, %c0_40] : memref<9x128x128xbf16, #tpu.memory_space<vmem>>, vector<1x128x128xbf16>
    %66 = vector.shape_cast %65 : vector<1x128x128xbf16> to vector<128x128xbf16>
    %cst_41 = arith.constant dense<0.000000e+00> : vector<128x128xf32>
    %67 = tpu.matmul %64, %66, %cst_41 {dimension_numbers = #tpu.dot_dimension_numbers<[1], [0], [0], [1], [0, 0, 1, 1], [], []>} : vector<128x128xbf16>, vector<128x128xbf16>, vector<128x128xf32> -> vector<128x128xf32>
    %68 = arith.addf %62, %67 : vector<128x128xf32>
    %69 = vector.extract_strided_slice %50 {offsets = [0, 1, 0], sizes = [10, 16, 128], strides = [1, 1, 1]} : vector<10x18x128xbf16> to vector<10x16x128xbf16>
    %70 = vector.extract_strided_slice %69 {offsets = [0, 0, 0], sizes = [8, 16, 128], strides = [1, 1, 1]} : vector<10x16x128xbf16> to vector<8x16x128xbf16>
    %71 = vector.shape_cast %70 : vector<8x16x128xbf16> to vector<128x128xbf16>
    %c1 = arith.constant 1 : index
    %c0_42 = arith.constant 0 : index
    %c0_43 = arith.constant 0 : index
    %72 = vector.load %arg3[%c1, %c0_42, %c0_43] : memref<9x128x128xbf16, #tpu.memory_space<vmem>>, vector<1x128x128xbf16>
    %73 = vector.shape_cast %72 : vector<1x128x128xbf16> to vector<128x128xbf16>
    %cst_44 = arith.constant dense<0.000000e+00> : vector<128x128xf32>
    %74 = tpu.matmul %71, %73, %cst_44 {dimension_numbers = #tpu.dot_dimension_numbers<[1], [0], [0], [1], [0, 0, 1, 1], [], []>} : vector<128x128xbf16>, vector<128x128xbf16>, vector<128x128xf32> -> vector<128x128xf32>
    %75 = arith.addf %68, %74 : vector<128x128xf32>
    %76 = vector.extract_strided_slice %69 {offsets = [1, 0, 0], sizes = [8, 16, 128], strides = [1, 1, 1]} : vector<10x16x128xbf16> to vector<8x16x128xbf16>
    %77 = vector.shape_cast %76 : vector<8x16x128xbf16> to vector<128x128xbf16>
    %c4 = arith.constant 4 : index
    %c0_45 = arith.constant 0 : index
    %c0_46 = arith.constant 0 : index
    %78 = vector.load %arg3[%c4, %c0_45, %c0_46] : memref<9x128x128xbf16, #tpu.memory_space<vmem>>, vector<1x128x128xbf16>
    %79 = vector.shape_cast %78 : vector<1x128x128xbf16> to vector<128x128xbf16>
    %cst_47 = arith.constant dense<0.000000e+00> : vector<128x128xf32>
    %80 = tpu.matmul %77, %79, %cst_47 {dimension_numbers = #tpu.dot_dimension_numbers<[1], [0], [0], [1], [0, 0, 1, 1], [], []>} : vector<128x128xbf16>, vector<128x128xbf16>, vector<128x128xf32> -> vector<128x128xf32>
    %81 = arith.addf %75, %80 : vector<128x128xf32>
    %82 = vector.extract_strided_slice %69 {offsets = [2, 0, 0], sizes = [8, 16, 128], strides = [1, 1, 1]} : vector<10x16x128xbf16> to vector<8x16x128xbf16>
    %83 = vector.shape_cast %82 : vector<8x16x128xbf16> to vector<128x128xbf16>
    %c7 = arith.constant 7 : index
    %c0_48 = arith.constant 0 : index
    %c0_49 = arith.constant 0 : index
    %84 = vector.load %arg3[%c7, %c0_48, %c0_49] : memref<9x128x128xbf16, #tpu.memory_space<vmem>>, vector<1x128x128xbf16>
    %85 = vector.shape_cast %84 : vector<1x128x128xbf16> to vector<128x128xbf16>
    %cst_50 = arith.constant dense<0.000000e+00> : vector<128x128xf32>
    %86 = tpu.matmul %83, %85, %cst_50 {dimension_numbers = #tpu.dot_dimension_numbers<[1], [0], [0], [1], [0, 0, 1, 1], [], []>} : vector<128x128xbf16>, vector<128x128xbf16>, vector<128x128xf32> -> vector<128x128xf32>
    %87 = arith.addf %81, %86 : vector<128x128xf32>
    %88 = vector.extract_strided_slice %50 {offsets = [0, 2, 0], sizes = [10, 16, 128], strides = [1, 1, 1]} : vector<10x18x128xbf16> to vector<10x16x128xbf16>
    %89 = vector.extract_strided_slice %88 {offsets = [0, 0, 0], sizes = [8, 16, 128], strides = [1, 1, 1]} : vector<10x16x128xbf16> to vector<8x16x128xbf16>
    %90 = vector.shape_cast %89 : vector<8x16x128xbf16> to vector<128x128xbf16>
    %c2 = arith.constant 2 : index
    %c0_51 = arith.constant 0 : index
    %c0_52 = arith.constant 0 : index
    %91 = vector.load %arg3[%c2, %c0_51, %c0_52] : memref<9x128x128xbf16, #tpu.memory_space<vmem>>, vector<1x128x128xbf16>
    %92 = vector.shape_cast %91 : vector<1x128x128xbf16> to vector<128x128xbf16>
    %cst_53 = arith.constant dense<0.000000e+00> : vector<128x128xf32>
    %93 = tpu.matmul %90, %92, %cst_53 {dimension_numbers = #tpu.dot_dimension_numbers<[1], [0], [0], [1], [0, 0, 1, 1], [], []>} : vector<128x128xbf16>, vector<128x128xbf16>, vector<128x128xf32> -> vector<128x128xf32>
    %94 = arith.addf %87, %93 : vector<128x128xf32>
    %95 = vector.extract_strided_slice %88 {offsets = [1, 0, 0], sizes = [8, 16, 128], strides = [1, 1, 1]} : vector<10x16x128xbf16> to vector<8x16x128xbf16>
    %96 = vector.shape_cast %95 : vector<8x16x128xbf16> to vector<128x128xbf16>
    %c5 = arith.constant 5 : index
    %c0_54 = arith.constant 0 : index
    %c0_55 = arith.constant 0 : index
    %97 = vector.load %arg3[%c5, %c0_54, %c0_55] : memref<9x128x128xbf16, #tpu.memory_space<vmem>>, vector<1x128x128xbf16>
    %98 = vector.shape_cast %97 : vector<1x128x128xbf16> to vector<128x128xbf16>
    %cst_56 = arith.constant dense<0.000000e+00> : vector<128x128xf32>
    %99 = tpu.matmul %96, %98, %cst_56 {dimension_numbers = #tpu.dot_dimension_numbers<[1], [0], [0], [1], [0, 0, 1, 1], [], []>} : vector<128x128xbf16>, vector<128x128xbf16>, vector<128x128xf32> -> vector<128x128xf32>
    %100 = arith.addf %94, %99 : vector<128x128xf32>
    %101 = vector.extract_strided_slice %88 {offsets = [2, 0, 0], sizes = [8, 16, 128], strides = [1, 1, 1]} : vector<10x16x128xbf16> to vector<8x16x128xbf16>
    %102 = vector.shape_cast %101 : vector<8x16x128xbf16> to vector<128x128xbf16>
    %c8 = arith.constant 8 : index
    %c0_57 = arith.constant 0 : index
    %c0_58 = arith.constant 0 : index
    %103 = vector.load %arg3[%c8, %c0_57, %c0_58] : memref<9x128x128xbf16, #tpu.memory_space<vmem>>, vector<1x128x128xbf16>
    %104 = vector.shape_cast %103 : vector<1x128x128xbf16> to vector<128x128xbf16>
    %cst_59 = arith.constant dense<0.000000e+00> : vector<128x128xf32>
    %105 = tpu.matmul %102, %104, %cst_59 {dimension_numbers = #tpu.dot_dimension_numbers<[1], [0], [0], [1], [0, 0, 1, 1], [], []>} : vector<128x128xbf16>, vector<128x128xbf16>, vector<128x128xf32> -> vector<128x128xf32>
    %106 = arith.addf %100, %105 : vector<128x128xf32>
    %107 = vector.shape_cast %106 : vector<128x128xf32> to vector<8x16x128xf32>
    %c0_60 = arith.constant 0 : index
    %c0_61 = arith.constant 0 : index
    %c0_62 = arith.constant 0 : index
    %c0_63 = arith.constant 0 : index
    %108 = vector.load %arg6[%c0_60, %c0_61, %c0_62, %c0_63] : memref<1x8x16x128xf32, #tpu.memory_space<vmem>>, vector<1x8x16x128xf32>
    %109 = vector.shape_cast %108 : vector<1x8x16x128xf32> to vector<8x16x128xf32>
    %110 = vector.shape_cast %107 : vector<8x16x128xf32> to vector<1x8x16x128xf32>
    tpu.vector_store %arg6[%c0_60, %c0_61, %c0_62, %c0_63], %110 {strides = array<i32>} : memref<1x8x16x128xf32, #tpu.memory_space<vmem>>, vector<1x8x16x128xf32>,
    %cst_64 = arith.constant dense<0.000000e+00> : vector<128xf32>
    %111 = vector.multi_reduction <add>, %106, %cst_64 [0] : vector<128x128xf32> to vector<128xf32>
    %112 = vector.shape_cast %111 : vector<128xf32> to vector<1x128xf32>
    %c0_65 = arith.constant 0 : index
    %c0_66 = arith.constant 0 : index
    %c0_67 = arith.constant 0 : index
    %c0_68 = arith.constant 0 : index
    %113 = vector.load %arg7[%c0_65, %c0_66, %c0_67, %c0_68] : memref<1x1x1x128xf32, #tpu.memory_space<vmem>>, vector<1x1x1x128xf32>
    %114 = vector.shape_cast %113 : vector<1x1x1x128xf32> to vector<1x128xf32>
    %115 = vector.shape_cast %112 : vector<1x128xf32> to vector<1x1x1x128xf32>
    tpu.vector_store %arg7[%c0_65, %c0_66, %c0_67, %c0_68], %115 {strides = array<i32>} : memref<1x1x1x128xf32, #tpu.memory_space<vmem>>, vector<1x1x1x128xf32>,
    %116 = arith.mulf %106, %106 : vector<128x128xf32>
    %cst_69 = arith.constant dense<0.000000e+00> : vector<128xf32>
    %117 = vector.multi_reduction <add>, %116, %cst_69 [0] : vector<128x128xf32> to vector<128xf32>
    %118 = vector.shape_cast %117 : vector<128xf32> to vector<1x128xf32>
    %c0_70 = arith.constant 0 : index
    %c0_71 = arith.constant 0 : index
    %c0_72 = arith.constant 0 : index
    %c0_73 = arith.constant 0 : index
    %119 = vector.load %arg8[%c0_70, %c0_71, %c0_72, %c0_73] : memref<1x1x1x128xf32, #tpu.memory_space<vmem>>, vector<1x1x1x128xf32>
    %120 = vector.shape_cast %119 : vector<1x1x1x128xf32> to vector<1x128xf32>
    %121 = vector.shape_cast %118 : vector<1x128xf32> to vector<1x1x1x128xf32>
    tpu.vector_store %arg8[%c0_70, %c0_71, %c0_72, %c0_73], %121 {strides = array<i32>} : memref<1x1x1x128xf32, #tpu.memory_space<vmem>>, vector<1x1x1x128xf32>,
    return
  }
  func.func @transform_1(%arg0: i32, %arg1: i32) -> (i32, i32, i32) {
    %c0_i32 = arith.constant 0 : i32
    %c0_i32_0 = arith.constant 0 : i32
    %c0_i32_1 = arith.constant 0 : i32
    %c0_i32_2 = arith.constant 0 : i32
    return %c0_i32, %c0_i32_0, %c0_i32_1 : i32, i32, i32
  }
  func.func @transform_2(%arg0: i32, %arg1: i32) -> (i32, i32, i32) {
    %c0_i32 = arith.constant 0 : i32
    %c0_i32_0 = arith.constant 0 : i32
    %c0_i32_1 = arith.constant 0 : i32
    %c0_i32_2 = arith.constant 0 : i32
    return %c0_i32, %c0_i32_0, %c0_i32_1 : i32, i32, i32
  }
  func.func @transform_3(%arg0: i32, %arg1: i32) -> (i32, i32, i32) {
    %c0_i32 = arith.constant 0 : i32
    %c0_i32_0 = arith.constant 0 : i32
    %c0_i32_1 = arith.constant 0 : i32
    %c0_i32_2 = arith.constant 0 : i32
    return %c0_i32, %c0_i32_0, %c0_i32_1 : i32, i32, i32
  }
  func.func @transform_4(%arg0: i32, %arg1: i32) -> (i32, i32, i32, i32) {
    %c0_i32 = arith.constant 0 : i32
    %c0_i32_0 = arith.constant 0 : i32
    %c0_i32_1 = arith.constant 0 : i32
    return %arg0, %arg1, %c0_i32, %c0_i32_0 : i32, i32, i32, i32
  }
  func.func @transform_5(%arg0: i32, %arg1: i32) -> (i32, i32, i32, i32) {
    %c0_i32 = arith.constant 0 : i32
    %c0_i32_0 = arith.constant 0 : i32
    %c0_i32_1 = arith.constant 0 : i32
    return %arg0, %arg1, %c0_i32, %c0_i32_0 : i32, i32, i32, i32
  }
  func.func @transform_6(%arg0: i32, %arg1: i32) -> (i32, i32, i32, i32) {
    %c0_i32 = arith.constant 0 : i32
    %c0_i32_0 = arith.constant 0 : i32
    %c0_i32_1 = arith.constant 0 : i32
    return %arg0, %arg1, %c0_i32, %c0_i32_0 : i32, i32, i32, i32
  }
}

module attributes {stable_mosaic.version = 11 : i64} {
  func.func @_norm_residual_kernel(%arg0: i32, %arg1: i32, %arg2: memref<1x8x16x128xf32, #tpu.memory_space<vmem>>, %arg3: memref<1x1x128xf32, #tpu.memory_space<vmem>>, %arg4: memref<1x1x128xf32, #tpu.memory_space<vmem>>, %arg5: memref<1x8x16x128xf32, #tpu.memory_space<vmem>>, %arg6: memref<1x8x16x128xf32, #tpu.memory_space<vmem>>) attributes {dimension_semantics = [#tpu.dimension_semantics<parallel>, #tpu.dimension_semantics<parallel>], iteration_bounds = array<i64: 2, 2>, scalar_prefetch = 0 : i64, scratch_operands = 0 : i64, tpu.core_type = #tpu.core_type<tc>, window_params = [{transform_indices = @transform_0, window_bounds = array<i64: 1, 8, 16, 128>}, {pipeline_mode = #tpu.pipeline_mode<synchronous>, transform_indices = @transform_1, window_bounds = array<i64: 1, 1, 128>}, {pipeline_mode = #tpu.pipeline_mode<synchronous>, transform_indices = @transform_2, window_bounds = array<i64: 1, 1, 128>}, {transform_indices = @transform_3, window_bounds = array<i64: 1, 8, 16, 128>}, {transform_indices = @transform_4, window_bounds = array<i64: 1, 8, 16, 128>}]} {
    %c0 = arith.constant 0 : index
    %c0_0 = arith.constant 0 : index
    %c0_1 = arith.constant 0 : index
    %c0_2 = arith.constant 0 : index
    %0 = vector.load %arg2[%c0, %c0_0, %c0_1, %c0_2] : memref<1x8x16x128xf32, #tpu.memory_space<vmem>>, vector<1x8x16x128xf32>
    %1 = vector.shape_cast %0 : vector<1x8x16x128xf32> to vector<8x16x128xf32>
    %c0_3 = arith.constant 0 : index
    %c0_4 = arith.constant 0 : index
    %c0_5 = arith.constant 0 : index
    %2 = vector.load %arg3[%c0_3, %c0_4, %c0_5] : memref<1x1x128xf32, #tpu.memory_space<vmem>>, vector<1x1x128xf32>
    %3 = vector.broadcast %2 : vector<1x1x128xf32> to vector<8x16x128xf32>
    %4 = arith.mulf %1, %3 : vector<8x16x128xf32>
    %c0_6 = arith.constant 0 : index
    %c0_7 = arith.constant 0 : index
    %c0_8 = arith.constant 0 : index
    %5 = vector.load %arg4[%c0_6, %c0_7, %c0_8] : memref<1x1x128xf32, #tpu.memory_space<vmem>>, vector<1x1x128xf32>
    %6 = vector.broadcast %5 : vector<1x1x128xf32> to vector<8x16x128xf32>
    %7 = arith.addf %4, %6 : vector<8x16x128xf32>
    %c0_9 = arith.constant 0 : index
    %c0_10 = arith.constant 0 : index
    %c0_11 = arith.constant 0 : index
    %c0_12 = arith.constant 0 : index
    %8 = vector.load %arg5[%c0_9, %c0_10, %c0_11, %c0_12] : memref<1x8x16x128xf32, #tpu.memory_space<vmem>>, vector<1x8x16x128xf32>
    %9 = vector.shape_cast %8 : vector<1x8x16x128xf32> to vector<8x16x128xf32>
    %10 = arith.addf %7, %9 : vector<8x16x128xf32>
    %c0_13 = arith.constant 0 : index
    %c0_14 = arith.constant 0 : index
    %c0_15 = arith.constant 0 : index
    %c0_16 = arith.constant 0 : index
    %11 = vector.load %arg6[%c0_13, %c0_14, %c0_15, %c0_16] : memref<1x8x16x128xf32, #tpu.memory_space<vmem>>, vector<1x8x16x128xf32>
    %12 = vector.shape_cast %11 : vector<1x8x16x128xf32> to vector<8x16x128xf32>
    %13 = vector.shape_cast %10 : vector<8x16x128xf32> to vector<1x8x16x128xf32>
    tpu.vector_store %arg6[%c0_13, %c0_14, %c0_15, %c0_16], %13 {strides = array<i32>} : memref<1x8x16x128xf32, #tpu.memory_space<vmem>>, vector<1x8x16x128xf32>,
    return
  }
  func.func @transform_0(%arg0: i32, %arg1: i32) -> (i32, i32, i32, i32) {
    %c0_i32 = arith.constant 0 : i32
    %c0_i32_0 = arith.constant 0 : i32
    %c0_i32_1 = arith.constant 0 : i32
    return %arg0, %arg1, %c0_i32, %c0_i32_0 : i32, i32, i32, i32
  }
  func.func @transform_1(%arg0: i32, %arg1: i32) -> (i32, i32, i32) {
    %c0_i32 = arith.constant 0 : i32
    %c0_i32_0 = arith.constant 0 : i32
    %c0_i32_1 = arith.constant 0 : i32
    %c0_i32_2 = arith.constant 0 : i32
    return %c0_i32, %c0_i32_0, %c0_i32_1 : i32, i32, i32
  }
  func.func @transform_2(%arg0: i32, %arg1: i32) -> (i32, i32, i32) {
    %c0_i32 = arith.constant 0 : i32
    %c0_i32_0 = arith.constant 0 : i32
    %c0_i32_1 = arith.constant 0 : i32
    %c0_i32_2 = arith.constant 0 : i32
    return %c0_i32, %c0_i32_0, %c0_i32_1 : i32, i32, i32
  }
  func.func @transform_3(%arg0: i32, %arg1: i32) -> (i32, i32, i32, i32) {
    %c0_i32 = arith.constant 0 : i32
    %c0_i32_0 = arith.constant 0 : i32
    %c0_i32_1 = arith.constant 0 : i32
    return %arg0, %arg1, %c0_i32, %c0_i32_0 : i32, i32, i32, i32
  }
  func.func @transform_4(%arg0: i32, %arg1: i32) -> (i32, i32, i32, i32) {
    %c0_i32 = arith.constant 0 : i32
    %c0_i32_0 = arith.constant 0 : i32
    %c0_i32_1 = arith.constant 0 : i32
    return %arg0, %arg1, %c0_i32, %c0_i32_0 : i32, i32, i32, i32
  }
}

</mosaic_0001>

<bundles_post_ra>
// kernel: resnet_block_forward.5
= control target key start
LH: loop header
LB: loop body
LE: loop exit
PB: predicated region body
PF: predicated region fallthrough
CT: control target
= control target key end

     0   :  { %s637_s15 = smov 0   ;;  %s639_s16 = smov 0   ;;  %s787_s0 = inlined_call_operand.vmem [shape: f32[2,16,16,128], index: 0, kind: input, shape index: {}]   ;;  %s788_s1 = inlined_call_operand.vmem [shape: f32[1,1,128], index: 1, kind: input, shape index: {}]   ;;  %s789_s2 = inlined_call_operand.vmem [shape: f32[1,1,128], index: 2, kind: input, shape index: {}]   ;;  %s790_s3 = inlined_call_operand.vmem [shape: f32[2,16,16,128], index: 3, kind: input, shape index: {}]   ;;  %s791_s4 = inlined_call_operand.vmem [shape: f32[2,16,16,128], index: 4, kind: output, shape index: {}]  }
   0x1   :  { %s641_s17 = smov 0   ;;  %s643_s18 = smov 0  }
   0x2   :  { %s645_s19 = smov 0  }
   0x3 LB: > { %s23_s20 = sadd.s32 1, %s602_s17  ;;  %s26_s21 = sadd.s32 1, %s606_s18  ;;  %s610_s19 = sphi %s645_s19, %s14_s19   ;;  %s606_s18 = sphi %s643_s18, %s795_s18   ;;  %s602_s17 = sphi %s641_s17, %s794_s17   ;;  %s598_s16 = sphi %s639_s16, %s793_s16   ;;  %s594_s15 = sphi %s637_s15, %s792_s15  }
   0x4   : > { %p24_p0 = scmp.ge.s32.totalorder %s23_s20, 2  ;;  %p515_p1 = scmp.ge.s32.totalorder %s610_s19, 1 }
   0x5   : > { %p202_p2 = scmp.lt.s32.totalorder %s610_s19, 5 }
   0x6   : > { %s797_s20 = smov (%p24_p0, %s23_s20), 0  ;;  %s799_s21 = smov (!%p24_p0, %s26_s21), %s606_s18 }
   0x7   : > { %p203_p3 = pnand %p515_p1, %p202_p2  ;;  %p28_p4 = scmp.ge.s32.totalorder %s799_s21, 2 }
   0x8   : > { %s516_s22 = sshll.u32 (!%p203_p3), %s594_s15, 3  ;;  %p249_p5 = scmp.lt.s32.totalorder (!%p203_p3), %s598_s16, 1  ;;  %v670_v0 = vld [vmem:[%s788_s1] ss:$0 sm:$0xff] (!%p203_p3) }
   0x9   : > { %s801_s21 = smov (%p28_p4, %s799_s21), 0  ;;  %206 = sbr.rel (%p203_p3) target bundleno = 41 (0x29), region = 36 }
   0xa   : > { %p251_p6 = scmp.lt.s32.totalorder (!%p203_p3), %s516_s22, 15  ;;  %v686_v2 = vld [vmem:[%s789_s2] ss:$0 sm:$0xff] (!%p203_p3) }
  0x10   : > { %s803_s16 = smov (!%p249_p5, %s598_s16), 1  ;;  %s805_s22 = smov (!%p251_p6, %s516_s22), 15 }
  0x11   : > { %s518_s23 = sshll.u32 %s803_s16, 5  ;;  %s517_s24 = sshll.u32 %s805_s22, 1 }
  0x12   : > { %s255_s25 = sadd.s32 %s518_s23, %s517_s24 }
  0x13   : > { %s519_s26 = sshll.u32 %s255_s25, 3 }
  0x14   : > { %s675_s5 = scalar_lea.vmem %s787_s0, %s519_s26  ;;  %s680_s8 = scalar_lea.vmem %s790_s3, %s519_s26 }
  0x15   : > { %v281_v1 = vld [vmem:[%s675_s5] sm:$0xff]  ;;  %v282_v3 = vld [vmem:[%s675_s5 + $0x8] sm:$0xff]  ;;  %v283_v7 = vld [vmem:[%s675_s5 + $0x10] sm:$0xff]  ;;  %s707_s13 = scalar_lea.vmem %s791_s4, %s519_s26 }
  0x16   : > { %v304_v4 = vmul.f32 %v670_v0, %v281_v1  ;;  %v343_v5 = vld [vmem:[%s680_s8] sm:$0xff]  ;;  %v305_v6 = vmul.f32 %v670_v0, %v282_v3  ;;  %v344_v8 = vld [vmem:[%s680_s8 + $0x8] sm:$0xff]  ;;  %v306_v9 = vmul.f32 %v670_v0, %v283_v7  ;;  %v284_v10 = vld [vmem:[%s675_s5 + $0x18] sm:$0xff] }
  0x17   : > { %v285_v11 = vld [vmem:[%s675_s5 + $0x20] sm:$0xff]  ;;  %v345_v14 = vld [vmem:[%s680_s8 + $0x10] sm:$0xff]  ;;  %v307_v15 = vmul.f32 %v670_v0, %v284_v10  ;;  %v346_v16 = vld [vmem:[%s680_s8 + $0x18] sm:$0xff] }
  0x18   : > { %v327_v12 = vadd.f32 %v686_v2, %v304_v4  ;;  %v328_v13 = vadd.f32 %v686_v2, %v305_v6  ;;  %v308_v17 = vmul.f32 %v670_v0, %v285_v11  ;;  %v286_v18 = vld [vmem:[%s675_s5 + $0x28] sm:$0xff]  ;;  %v329_v19 = vadd.f32 %v686_v2, %v306_v9  ;;  %v347_v20 = vld [vmem:[%s680_s8 + $0x20] sm:$0xff]  ;;  %v287_v22 = vld [vmem:[%s675_s5 + $0x30] sm:$0xff] }
  0x19   : > { %v309_v21 = vmul.f32 %v670_v0, %v286_v18  ;;  %v288_v23 = vld [vmem:[%s675_s5 + $0x38] sm:$0xff]  ;;  %v330_v26 = vadd.f32 %v686_v2, %v307_v15  ;;  %v348_v28 = vld [vmem:[%s680_s8 + $0x28] sm:$0xff]  ;;  %v289_v29 = vld [vmem:[%s675_s5 + $0x40] sm:$0xff]  ;;  %v310_v32 = vmul.f32 %v670_v0, %v287_v22 }
  0x1a   : > { %v359_v24 = vadd.f32 %v343_v5, %v327_v12  ;;  %v360_v25 = vadd.f32 %v344_v8, %v328_v13  ;;  %v331_v27 = vadd.f32 %v686_v2, %v308_v17  ;;  %v361_v30 = vadd.f32 %v345_v14, %v329_v19  ;;  %v349_v33 = vld [vmem:[%s680_s8 + $0x30] sm:$0xff]  ;;  %v290_v35 = vld [vmem:[%s675_s5 + $0x48] sm:$0xff]  ;;  %v350_v39 = vld [vmem:[%s680_s8 + $0x38] sm:$0xff] }
  0x1b   : > { %v332_v31 = vadd.f32 %v686_v2, %v309_v21  ;;  %v311_v34 = vmul.f32 %v670_v0, %v288_v23  ;;  %v291_v36 = vld [vmem:[%s675_s5 + $0x50] sm:$0xff]  ;;  %v362_v37 = vadd.f32 %v346_v16, %v330_v26  ;;  %v312_v40 = vmul.f32 %v670_v0, %v289_v29  ;;  %v351_v41 = vld [vmem:[%s680_s8 + $0x40] sm:$0xff]  ;;  %v292_v43 = vld [vmem:[%s675_s5 + $0x58] sm:$0xff] }
  0x1c   : > { %375 = vst [vmem:[%s707_s13] sm:$0xff] %v359_v24  ;;  %376 = vst [vmem:[%s707_s13 + $0x8] sm:$0xff] %v360_v25  ;;  %v363_v38 = vadd.f32 %v347_v20, %v331_v27  ;;  %v313_v42 = vmul.f32 %v670_v0, %v290_v35  ;;  %v333_v45 = vadd.f32 %v686_v2, %v310_v32  ;;  %v352_v47 = vld [vmem:[%s680_s8 + $0x48] sm:$0xff]  ;;  %v293_v49 = vld [vmem:[%s675_s5 + $0x60] sm:$0xff] }
  0x1d   : > { %377 = vst [vmem:[%s707_s13 + $0x10] sm:$0xff] %v361_v30  ;;  %v364_v44 = vadd.f32 %v348_v28, %v332_v31  ;;  %v334_v46 = vadd.f32 %v686_v2, %v311_v34  ;;  %v314_v48 = vmul.f32 %v670_v0, %v291_v36  ;;  %v294_v50 = vld [vmem:[%s675_s5 + $0x68] sm:$0xff]  ;;  %378 = vst [vmem:[%s707_s13 + $0x18] sm:$0xff] %v362_v37  ;;  %v353_v53 = vld [vmem:[%s680_s8 + $0x50] sm:$0xff] }
  0x1e   : > { %379 = vst [vmem:[%s707_s13 + $0x20] sm:$0xff] %v363_v38  ;;  %v335_v51 = vadd.f32 %v686_v2, %v312_v40  ;;  %v336_v52 = vadd.f32 %v686_v2, %v313_v42  ;;  %v315_v54 = vmul.f32 %v670_v0, %v292_v43  ;;  %v316_v55 = vmul.f32 %v670_v0, %v293_v49  ;;  %v295_v56 = vld [vmem:[%s675_s5 + $0x70] sm:$0xff]  ;;  %v354_v60 = vld [vmem:[%s680_s8 + $0x58] sm:$0xff]  ;;  %v355_v61 = vld [vmem:[%s680_s8 + $0x60] sm:$0xff] }
  0x1f   : > { %380 = vst [vmem:[%s707_s13 + $0x28] sm:$0xff] %v364_v44  ;;  %v365_v57 = vadd.f32 %v349_v33, %v333_v45  ;;  %v366_v58 = vadd.f32 %v350_v39, %v334_v46  ;;  %v337_v59 = vadd.f32 %v686_v2, %v314_v48  ;;  %v317_v62 = vmul.f32 %v670_v0, %v294_v50  ;;  %v296_v63 = vld [vmem:[%s675_s5 + $0x78] sm:$0xff]  ;;  %v356_v6 = vld [vmem:[%s680_s8 + $0x68] sm:$0xff]  ;;  %v357_v13 = vld [vmem:[%s680_s8 + $0x70] sm:$0xff] }
  0x20   : > { %v367_v1 = vadd.f32 %v351_v41, %v335_v51  ;;  %v368_v3 = vadd.f32 %v352_v47, %v336_v52  ;;  %v338_v4 = vadd.f32 %v686_v2, %v315_v54  ;;  %v339_v5 = vadd.f32 %v686_v2, %v316_v55  ;;  %v358_v14 = vld [vmem:[%s680_s8 + $0x78] sm:$0xff] }
  0x21   : > { %381 = vst [vmem:[%s707_s13 + $0x30] sm:$0xff] %v365_v57  ;;  %382 = vst [vmem:[%s707_s13 + $0x38] sm:$0xff] %v366_v58  ;;  %v369_v7 = vadd.f32 %v353_v53, %v337_v59  ;;  %v340_v8 = vadd.f32 %v686_v2, %v317_v62  ;;  %v318_v9 = vmul.f32 %v670_v0, %v295_v56 }
  0x22   : > { %v319_v10 = vmul.f32 %v670_v0, %v296_v63  ;;  %383 = vst [vmem:[%s707_s13 + $0x40] sm:$0xff] %v367_v1  ;;  %384 = vst [vmem:[%s707_s13 + $0x48] sm:$0xff] %v368_v3  ;;  %v370_v11 = vadd.f32 %v354_v60, %v338_v4  ;;  %v371_v12 = vadd.f32 %v355_v61, %v339_v5 }
  0x23   : > { %385 = vst [vmem:[%s707_s13 + $0x50] sm:$0xff] %v369_v7  ;;  %v372_v15 = vadd.f32 %v356_v6, %v340_v8  ;;  %v341_v16 = vadd.f32 %v686_v2, %v318_v9 }
  0x24   : > { %v342_v17 = vadd.f32 %v686_v2, %v319_v10  ;;  %386 = vst [vmem:[%s707_s13 + $0x58] sm:$0xff] %v370_v11  ;;  %387 = vst [vmem:[%s707_s13 + $0x60] sm:$0xff] %v371_v12 }
  0x25   : > { %388 = vst [vmem:[%s707_s13 + $0x68] sm:$0xff] %v372_v15  ;;  %v373_v18 = vadd.f32 %v357_v13, %v341_v16 }
  0x26   : > { %v374_v19 = vadd.f32 %v358_v14, %v342_v17 }
  0x27   : > { %389 = vst [vmem:[%s707_s13 + $0x70] sm:$0xff] %v373_v18 }
  0x28   : > { %390 = vst [vmem:[%s707_s13 + $0x78] sm:$0xff] %v374_v19 }
  0x29 PF: > { %s14_s19 = sadd.s32 1, %s610_s19   ;;  %s792_s15 = smov %s602_s17 }
  0x2a   : > { %p11_p7 = scmp.ge.s32.totalorder %s14_s19, 6   ;;  %s793_s16 = smov %s606_s18 }
  0x2b   : > { %s794_s17 = smov %s797_s20  ;;  %s795_s18 = smov %s801_s21 }
  0x2c   :  { %13 = sbr.rel (!%p11_p7) target bundleno = 3 (0x3), region = 69 }

// kernel: resnet_block_forward.4
= control target key start
LH: loop header
LB: loop body
LE: loop exit
PB: predicated region body
PF: predicated region fallthrough
CT: control target
= control target key end

     0   :  { %s4262_s21 = smov 0   ;;  %s4264_s22 = smov 0   ;;  %s5186_s0 = inlined_call_operand.vmem [shape: f32[2,16,16,128], index: 0, kind: input, shape index: {}]   ;;  %s5187_s1 = inlined_call_operand.vmem [shape: bf16[9,128,128], index: 1, kind: input, shape index: {}]   ;;  %s5188_s2 = inlined_call_operand.vmem [shape: f32[1,1,128], index: 2, kind: input, shape index: {}]   ;;  %s5189_s3 = inlined_call_operand.vmem [shape: f32[1,1,128], index: 3, kind: input, shape index: {}]   ;;  %s5190_s4 = inlined_call_operand.vmem [shape: f32[2,16,16,128], index: 4, kind: output, shape index: {0}]   ;;  %s5191_s5 = inlined_call_operand.vmem [shape: f32[2,2,1,128], index: 5, kind: output, shape index: {1}]   ;;  %s5192_s6 = inlined_call_operand.vmem [shape: f32[2,2,1,128], index: 6, kind: output, shape index: {2}]  }
   0x1   :  { %s4266_s23 = smov 0   ;;  %s4268_s24 = smov 0  }
   0x2   :  { %s4270_s25 = smov 0  }
   0x3 LB: > { %s26_s26 = sadd.s32 1, %s4217_s23  ;;  %s29_s27 = sadd.s32 1, %s4221_s24  ;;  %s4225_s25 = sphi %s4270_s25, %s17_s25   ;;  %s4221_s24 = sphi %s4268_s24, %s5200_s24   ;;  %s4217_s23 = sphi %s4266_s23, %s5199_s23   ;;  %s4213_s22 = sphi %s4264_s22, %s5198_s22   ;;  %s4209_s21 = sphi %s4262_s21, %s5197_s21  }
   0x4   : > { %p27_p0 = scmp.ge.s32.totalorder %s26_s26, 2  ;;  %p3173_p1 = scmp.ge.s32.totalorder %s4225_s25, 1 }
   0x5   : > { %p201_p2 = scmp.lt.s32.totalorder %s4225_s25, 5 }
   0x6   : > { %s5202_s26 = smov (%p27_p0, %s26_s26), 0  ;;  %s5204_s27 = smov (!%p27_p0, %s29_s27), %s4221_s24 }
   0x7   : > { %5193 = sst [smem:[#allocation13_spill]] %s5202_s26  ;;  %p202_p3 = pnand %p3173_p1, %p201_p2 }
   0x8   : > { %p31_p4 = scmp.ge.s32.totalorder %s5204_s27, 2  ;;  %s4297_s28 = sshll.u32 (!%p202_p3), %s4209_s21, 3 }
   0x9   : > { %205 = sbr.rel (%p202_p3) target bundleno = 526 (0x20e), region = 32  ;;  %p244_p5 = scmp.lt.s32.totalorder (!%p202_p3), %s4213_s22, 1 }
   0xa   : > { %s5206_s27 = smov (%p31_p4, %s5204_s27), 0  ;;  %p246_p6 = scmp.lt.s32.totalorder (!%p202_p3), %s4297_s28, 15 }
   0xb   : > { %5194 = sst [smem:[#allocation14_spill]] %s5206_s27  ;;  %p256_p7 = scmp.lt.s32.totalorder (!%p202_p3), %s4209_s21, 1 }
   0xc   : > { %p269_p8 = scmp.lt.s32.totalorder (!%p202_p3), %s4209_s21, 0  ;;  %s270_s11 = ssub.s32 (!%p202_p3), 0, %s4209_s21 }
   0xd   : > { %s3180_s13 = smin.u32 (!%p202_p3), %s4209_s21, %s270_s11  ;;  %p3181_p9 = scmp.ne.s32.totalorder (!%p202_p3), %s4209_s21, 0 }
   0xe   : > { %s272_s17 = sand.u32 (!%p202_p3), 1, %s3180_s13  }
   0xf   : > { %s273_s19 = ssub.s32 (!%p202_p3), 0, %s272_s17 }
  0x10   : > { %s245_s29 = scalar_select %p244_p5, %s4213_s22, 1 }
  0x11   : > { %s247_s30 = scalar_select %p246_p6, %s4297_s28, 15 }
  0x12   : > { %s3176_s7 = sshll.u32 %s245_s29, 5  ;;  %s3178_s8 = sshll.u32 %s245_s29, 1 }
  0x13   : > { %s3175_s9 = sshll.u32 %s247_s30, 1  ;;  %s5208_s19 = smov (!%p269_p8, %s273_s19), %s272_s17 }
  0x14   : > { %s250_s10 = sadd.s32 %s3176_s7, %s3175_s9  ;;  %278 = sbr.rel (%p3181_p9) target bundleno = 51 (0x33), region = 36 }
  0x15   : > { %s3177_s12 = sshll.u32 %s250_s10, 3  ;;  %p280_p10 = scmp.eq.s32.totalorder (!%p3181_p9), %s4297_s28, 0 }
  0x16   : > { %s4310_s16 = scalar_lea.vmem %s5190_s4, %s3177_s12  ;;  %s283_s26 = sadd.s32 (!%p3181_p9), 8, %s4297_s28 }
  0x17   : > { %s257_s18 = scalar_select %p256_p7, %s4209_s21, 1 }
  0x18   : > { %s4330_s27 = sshll.u32 (!%p3181_p9), %s4213_s22, 8  ;;  %p284_p11 = scmp.eq.s32.totalorder (!%p3181_p9), %s283_s26, 16 }
  0x19   : > { %s4313_s20 = sadd.s32 %s3178_s8, %s257_s18  ;;  %s3183_s8 = sadd.s32 (!%p3181_p9), 4294967295, %s4297_s28 }
  0x1a   : > { %s260_s29 = scalar_lea.vmem %s5191_s5, %s4313_s20  ;;  %s267_s9 = scalar_lea.vmem %s5192_s6, %s4313_s20 }
  0x1b   : > { %s5210_s8 = smov (%p280_p10, %s3183_s8), 1  ;;  %s2991_s10 = smul.u32 240, %s5208_s19 }
  0x1c   : > { %s3184_s11 = sshll.u32 %s5210_s8, 4  ;;  %s293_s12 = smul.u32 3, %s5208_s19 }
  0x1d   : > { %s5212_s26 = smov (%p284_p11, %s283_s26), 14  ;;  %s288_s13 = sadd.s32 %s4330_s27, %s3184_s11 }
  0x1e   : > { %s289_s17 = scalar_lea.vmem %s5186_s0, %s288_s13  ;;  %s4340_s18 = scalar_lea.vmem [#allocation2], %s2991_s10 }
  0x1f   : > { %v327_v0 = vld [vmem:[%s289_s17] sm:$0xff]  ;;  %v329_v1 = vld [vmem:[%s289_s17 + $0x8] sm:$0xff]  ;;  %s4344_s30 = scalar_lea.sflag [#allocation3], %s293_s12 }
  0x20   : > { %3186 = vst [vmem:[%s4340_s18 + $0x1] sm:$0xff] %v327_v0  ;;  %3187 = vst [vmem:[%s4340_s18 + $0x9] sm:$0xff] %v329_v1 }
  0x21   : > { %338 = vsyncadd %s4344_s30, 256  ;;  %s3490_s7 = sshll.u32 %s4209_s21, 7  ;;  %s3005_s8 = scalar_lea.sflag %s4344_s30, 1 [#allocation3] }
  0x22   : > { %s340_s10 = sadd.s32 %s3490_s7, %s4330_s27 }
  0x23   : > { %s4353_s14 = scalar_lea.vmem %s5186_s0, %s340_s10 }
  0x24   : > { %v392_v2 = vld [vmem:[%s4353_s14] sm:$0xff]  ;;  %v394_v3 = vld [vmem:[%s4353_s14 + $0x8] sm:$0xff]  ;;  %v396_v4 = vld [vmem:[%s4353_s14 + $0x10] sm:$0xff] }
  0x25   : > { %3190 = vst [vmem:[%s4340_s18 + $0x19] sm:$0xff] %v392_v2  ;;  %3191 = vst [vmem:[%s4340_s18 + $0x21] sm:$0xff] %v394_v3  ;;  %v398_v5 = vld [vmem:[%s4353_s14 + $0x18] sm:$0xff]  ;;  %v400_v6 = vld [vmem:[%s4353_s14 + $0x20] sm:$0xff] }
  0x26   : > { %3192 = vst [vmem:[%s4340_s18 + $0x31] sm:$0xff] %v396_v4  ;;  %v402_v7 = vld [vmem:[%s4353_s14 + $0x28] sm:$0xff]  ;;  %3193 = vst [vmem:[%s4340_s18 + $0x39] sm:$0xff] %v398_v5  ;;  %v404_v8 = vld [vmem:[%s4353_s14 + $0x30] sm:$0xff] }
  0x27   : > { %3194 = vst [vmem:[%s4340_s18 + $0x49] sm:$0xff] %v400_v6  ;;  %3195 = vst [vmem:[%s4340_s18 + $0x51] sm:$0xff] %v402_v7  ;;  %v406_v9 = vld [vmem:[%s4353_s14 + $0x38] sm:$0xff]  ;;  %v408_v10 = vld [vmem:[%s4353_s14 + $0x40] sm:$0xff] }
  0x28   : > { %3196 = vst [vmem:[%s4340_s18 + $0x61] sm:$0xff] %v404_v8  ;;  %3197 = vst [vmem:[%s4340_s18 + $0x69] sm:$0xff] %v406_v9  ;;  %v410_v11 = vld [vmem:[%s4353_s14 + $0x48] sm:$0xff]  ;;  %v412_v12 = vld [vmem:[%s4353_s14 + $0x50] sm:$0xff] }
  0x29   : > { %3198 = vst [vmem:[%s4340_s18 + $0x79] sm:$0xff] %v408_v10  ;;  %v414_v13 = vld [vmem:[%s4353_s14 + $0x58] sm:$0xff]  ;;  %3199 = vst [vmem:[%s4340_s18 + $0x81] sm:$0xff] %v410_v11  ;;  %v416_v14 = vld [vmem:[%s4353_s14 + $0x60] sm:$0xff] }
  0x2a   : > { %3200 = vst [vmem:[%s4340_s18 + $0x91] sm:$0xff] %v412_v12  ;;  %3201 = vst [vmem:[%s4340_s18 + $0x99] sm:$0xff] %v414_v13  ;;  %v418_v15 = vld [vmem:[%s4353_s14 + $0x68] sm:$0xff]  ;;  %v420_v16 = vld [vmem:[%s4353_s14 + $0x70] sm:$0xff] }
  0x2b   : > { %3202 = vst [vmem:[%s4340_s18 + $0xa9] sm:$0xff] %v416_v14  ;;  %3203 = vst [vmem:[%s4340_s18 + $0xb1] sm:$0xff] %v418_v15  ;;  %v422_v17 = vld [vmem:[%s4353_s14 + $0x78] sm:$0xff] }
  0x2c   : > { %3204 = vst [vmem:[%s4340_s18 + $0xc1] sm:$0xff] %v420_v16  ;;  %3205 = vst [vmem:[%s4340_s18 + $0xc9] sm:$0xff] %v422_v17 }
  0x2d   : > { %431 = vsyncadd %s3005_s8, 2048  ;;  %s3214_s12 = sshll.u32 %s5212_s26, 4  ;;  %s3015_s15 = scalar_lea.sflag %s4344_s30, 2 [#allocation3] }
  0x2e   : > { %s433_s17 = sadd.s32 %s3214_s12, %s4330_s27 }
  0x2f   : > { %s434_s11 = scalar_lea.vmem %s5186_s0, %s433_s17 }
  0x30   : > { %v471_v18 = vld [vmem:[%s434_s11] sm:$0xff]  ;;  %v473_v19 = vld [vmem:[%s434_s11 + $0x8] sm:$0xff] }
  0x31   : > { %3215 = vst [vmem:[%s4340_s18 + $0xd9] sm:$0xff] %v471_v18  ;;  %3216 = vst [vmem:[%s4340_s18 + $0xe1] sm:$0xff] %v473_v19 }
  0x32   : > { %482 = vsyncadd %s3015_s15, 256 }
  0x33 PF: > { %s483_s8 = smul.u32 3, %s5208_s19 }
  0x35   : > { %s484_s13 = scalar_lea.sflag [#allocation3], %s483_s8 }
  0x36   : > { %4201 = dma.done.wait %s484_s13, 256 }
  0x37   : > { %4202 = vsyncadd %s484_s13, 4294967040  ;;  %s3020_s14 = scalar_lea.sflag %s484_s13, 1 [#allocation3] }
  0x38   : > { %4203 = dma.done.wait %s3020_s14, 2048 }
  0x39   : > { %4204 = vsyncadd %s3020_s14, 4294965248  ;;  %s3023_s26 = scalar_lea.sflag %s484_s13, 2 [#allocation3] }
  0x3a   : > { %4205 = dma.done.wait %s3023_s26, 256 }
  0x3b   : > { %4206 = vsyncadd %s3023_s26, 4294967040  ;;  %s499_s27 = sadd.s32 1, %s4209_s21 }
  0x3c   : > { %p3218_p12 = scmp.ge.s32.totalorder %s499_s27, 2 }
  0x3d   : > { %s504_s18 = ssub.s32 (!%p3218_p12), 1, %s5208_s19  ;;  %s3492_s30 = sadd.s32 (!%p3218_p12), 8, %s4297_s28 }
  0x3e   : > { %503 = sbr.rel (%p3218_p12) target bundleno = 93 (0x5d), region = 142  ;;  %p506_p13 = scmp.eq.s32.totalorder (!%p3218_p12), %s3492_s30, 0 }
  0x3f   : > { %s3220_s12 = sadd.s32 (!%p3218_p12), 4294967295, %s3492_s30  ;;  %s509_s15 = sadd.s32 (!%p3218_p12), 8, %s3492_s30 }
  0x40   : > { %s4402_s17 = sshll.u32 (!%p3218_p12), %s4213_s22, 8  ;;  %p510_p0 = scmp.eq.s32.totalorder (!%p3218_p12), %s509_s15, 16 }
  0x41   : > { %s3028_s7 = smul.u32 (!%p3218_p12), 240, %s504_s18 }
  0x42   : > { %s519_s11 = smul.u32 (!%p3218_p12), 3, %s504_s18 }
  0x43   : > { %s4410_s28 = scalar_lea.vmem (!%p3218_p12), [#allocation2], %s3028_s7 }
  0x44   : > { %s4414_s22 = scalar_lea.sflag (!%p3218_p12), [#allocation3], %s519_s11 }
  0x45   : > { %s5214_s12 = smov (%p506_p13, %s3220_s12), 1  ;;  %s5216_s15 = smov (%p510_p0, %s509_s15), 14 }
  0x46   : > { %s3221_s10 = sshll.u32 %s5214_s12, 4 }
  0x47   : > { %s514_s8 = sadd.s32 %s4402_s17, %s3221_s10 }
  0x48   : > { %s515_s26 = scalar_lea.vmem %s5186_s0, %s514_s8 }
  0x49   : > { %v553_v20 = vld [vmem:[%s515_s26] sm:$0xff]  ;;  %v555_v21 = vld [vmem:[%s515_s26 + $0x8] sm:$0xff] }
  0x4a   : > { %3223 = vst [vmem:[%s4410_s28 + $0x1] sm:$0xff] %v553_v20  ;;  %3224 = vst [vmem:[%s4410_s28 + $0x9] sm:$0xff] %v555_v21 }
  0x4b   : > { %564 = vsyncadd %s4414_s22, 256  ;;  %s3226_s27 = sshll.u32 %s4209_s21, 7  ;;  %s3043_s18 = scalar_lea.sflag %s4414_s22, 1 [#allocation3] }
  0x4c   : > { %s3035_s30 = sadd.s32 %s3226_s27, %s4402_s17 }
  0x4d   : > { %s4423_s10 = scalar_lea.vmem %s5186_s0, %s3035_s30 }
  0x4e   : > { %v3228_v22 = vld [vmem:[%s4423_s10 + $0x80] sm:$0xff]  ;;  %v3230_v23 = vld [vmem:[%s4423_s10 + $0x88] sm:$0xff]  ;;  %v3232_v24 = vld [vmem:[%s4423_s10 + $0x90] sm:$0xff] }
  0x4f   : > { %3229 = vst [vmem:[%s4410_s28 + $0x19] sm:$0xff] %v3228_v22  ;;  %3231 = vst [vmem:[%s4410_s28 + $0x21] sm:$0xff] %v3230_v23  ;;  %v3234_v25 = vld [vmem:[%s4423_s10 + $0x98] sm:$0xff]  ;;  %v3236_v26 = vld [vmem:[%s4423_s10 + $0xa0] sm:$0xff] }
  0x50   : > { %3233 = vst [vmem:[%s4410_s28 + $0x31] sm:$0xff] %v3232_v24  ;;  %v3238_v27 = vld [vmem:[%s4423_s10 + $0xa8] sm:$0xff]  ;;  %3235 = vst [vmem:[%s4410_s28 + $0x39] sm:$0xff] %v3234_v25  ;;  %v3240_v28 = vld [vmem:[%s4423_s10 + $0xb0] sm:$0xff] }
  0x51   : > { %3237 = vst [vmem:[%s4410_s28 + $0x49] sm:$0xff] %v3236_v26  ;;  %3239 = vst [vmem:[%s4410_s28 + $0x51] sm:$0xff] %v3238_v27  ;;  %v3242_v29 = vld [vmem:[%s4423_s10 + $0xb8] sm:$0xff]  ;;  %v3244_v30 = vld [vmem:[%s4423_s10 + $0xc0] sm:$0xff] }
  0x52   : > { %3241 = vst [vmem:[%s4410_s28 + $0x61] sm:$0xff] %v3240_v28  ;;  %3243 = vst [vmem:[%s4410_s28 + $0x69] sm:$0xff] %v3242_v29  ;;  %v3246_v31 = vld [vmem:[%s4423_s10 + $0xc8] sm:$0xff]  ;;  %v3248_v32 = vld [vmem:[%s4423_s10 + $0xd0] sm:$0xff] }
  0x53   : > { %3245 = vst [vmem:[%s4410_s28 + $0x79] sm:$0xff] %v3244_v30  ;;  %v3250_v33 = vld [vmem:[%s4423_s10 + $0xd8] sm:$0xff]  ;;  %3247 = vst [vmem:[%s4410_s28 + $0x81] sm:$0xff] %v3246_v31  ;;  %v3252_v34 = vld [vmem:[%s4423_s10 + $0xe0] sm:$0xff] }
  0x54   : > { %3249 = vst [vmem:[%s4410_s28 + $0x91] sm:$0xff] %v3248_v32  ;;  %3251 = vst [vmem:[%s4410_s28 + $0x99] sm:$0xff] %v3250_v33  ;;  %v3254_v35 = vld [vmem:[%s4423_s10 + $0xe8] sm:$0xff]  ;;  %v3256_v36 = vld [vmem:[%s4423_s10 + $0xf0] sm:$0xff] }
  0x55   : > { %3253 = vst [vmem:[%s4410_s28 + $0xa9] sm:$0xff] %v3252_v34  ;;  %3255 = vst [vmem:[%s4410_s28 + $0xb1] sm:$0xff] %v3254_v35  ;;  %v3258_v37 = vld [vmem:[%s4423_s10 + $0xf8] sm:$0xff] }
  0x56   : > { %3257 = vst [vmem:[%s4410_s28 + $0xc1] sm:$0xff] %v3256_v36  ;;  %3259 = vst [vmem:[%s4410_s28 + $0xc9] sm:$0xff] %v3258_v37 }
  0x57   : > { %657 = vsyncadd %s3043_s18, 2048  ;;  %s3276_s21 = sshll.u32 %s5216_s15, 4  ;;  %s3053_s11 = scalar_lea.sflag %s4414_s22, 2 [#allocation3] }
  0x58   : > { %s659_s8 = sadd.s32 %s3276_s21, %s4402_s17 }
  0x59   : > { %s660_s26 = scalar_lea.vmem %s5186_s0, %s659_s8 }
  0x5a   : > { %v697_v38 = vld [vmem:[%s660_s26] sm:$0xff]  ;;  %v699_v39 = vld [vmem:[%s660_s26 + $0x8] sm:$0xff] }
  0x5b   : > { %3277 = vst [vmem:[%s4410_s28 + $0xd9] sm:$0xff] %v697_v38  ;;  %3278 = vst [vmem:[%s4410_s28 + $0xe1] sm:$0xff] %v699_v39 }
  0x5c   : > { %708 = vsyncadd %s3053_s11, 256 }
  0x5d PF: > { %v4109_v40 = vld [vmem:[%s5187_s1 + $0xc0] sm:$0xff]   ;;  %v4111_v42 = vld [vmem:[%s5187_s1 + $0xc8] sm:$0xff]   ;;  %v741_v44 = vlaneseq  ;;  %v4113_v45 = vld [vmem:[%s5187_s1 + $0xd0] sm:$0xff]   ;;  %s709_s8 = smul.u32 240, %s5208_s19  ;;  %vm1516_vm2 = vsmask.f32 7424 }
  0x5e   : > { %v4110_v41 = vld [vmem:[%s5187_s1 + $0x100] sm:$0xff]   ;;  %3637 = vmatprep.subr.bf16.mxu1 %v4109_v40  ;;  %v4112_v43 = vld [vmem:[%s5187_s1 + $0x108] sm:$0xff]   ;;  %v4114_v46 = vld [vmem:[%s5187_s1 + $0x110] sm:$0xff]   ;;  %vm2197_vm3 = vcmask 1046528  }
  0x5f   : > { %3765 = vmatprep.subr.bf16.mxu0 %v4110_v41  ;;  %3638 = vmatpush3.bf16.msra.mxu1 %v4109_v40  ;;  %v4486_v47 = vshrl.u32 %v741_v44, 7  ;;  %v4115_v48 = vld [vmem:[%s5187_s1 + $0xd8] sm:$0xff]   ;;  %v4117_v51 = vld [vmem:[%s5187_s1 + $0xe0] sm:$0xff]   ;;  %v4119_v55 = vld [vmem:[%s5187_s1 + $0xe8] sm:$0xff]   ;;  %s4515_s7 = scalar_lea.vmem [#allocation2], %s709_s8 }
  0x60   : > { %3766 = vmatpush3.bf16.msra.mxu0 %v4110_v41  ;;  %3639 = vmatprep.subr.bf16.mxu1 %v4111_v42  ;;  %v4116_v49 = vld [vmem:[%s5187_s1 + $0x118] sm:$0xff]   ;;  %v4118_v53 = vld [vmem:[%s5187_s1 + $0x120] sm:$0xff]   ;;  %v4120_v56 = vld [vmem:[%s5187_s1 + $0x128] sm:$0xff]  }
  0x61   : > { %3767 = vmatprep.subr.bf16.mxu0 %v4112_v43  ;;  %v4495_v50 = vsub.s32 2, %v4486_v47  ;;  %v4501_v52 = vadd.s32 16, %v4486_v47  ;;  %v4507_v54 = vsub.s32 7, %v4486_v47  ;;  %vm745_vm0 = vcmp.eq.s32.totalorder %v4486_v47, 0  ;;  %v4523_v59 = vld [vmem:[%s5188_s2] ss:$0 sm:$0xff] }
  0x62   : > { %v714_v57 = vld [vmem:[%s4515_s7 + $0x18] sm:$0xff]  ;;  %v715_v58 = vld [vmem:[%s4515_s7 + $0x20] sm:$0xff]  ;;  %v716_v63 = vld [vmem:[%s4515_s7 + $0x28] sm:$0x3] }
  0x63   : > { %3640 = vmatpush3.bf16.msra.mxu1 %v4111_v42  ;;  %vm820_vm1 = vcmp.eq.s32.totalorder %v4501_v52, 17  ;;  %v755_v60 = vrot.slane %v714_v57, %v4495_v50  ;;  %v902_v61 = vmul.f32 %v4523_v59, %v715_v58  ;;  %v4531_v62 = vld [vmem:[%s5189_s3] ss:$0 sm:$0xff]  ;;  %v828_v0 = vrot.slane %v715_v58, %v4507_v54  ;;  %v718_v2 = vld [vmem:[%s4515_s7 + $0x38] sm:$0xff]  ;;  %v4121_v4 = vld [vmem:[%s5187_s1 + $0xf0] sm:$0xff]  }
  0x64   : > { %3768 = vmatpush3.bf16.msra.mxu0 %v4112_v43  ;;  %3641 = vmatprep.subr.bf16.mxu1 %v4113_v45  ;;  %v717_v1 = vld [vmem:[%s4515_s7 + $0x30] sm:$0xff]  ;;  %v905_v8 = vmul.f32 %v4523_v59, %v718_v2  ;;  %v719_v12 = vld [vmem:[%s4515_s7 + $0x40] sm:$0x3]  ;;  %v832_v16 = vrot.slane %v718_v2, %v4507_v54  ;;  %v720_v20 = vld [vmem:[%s4515_s7 + $0x48] sm:$0xff] }
  0x65   : > { %3769 = vmatprep.subr.bf16.mxu0 %v4114_v46  ;;  %v759_v3 = vrot.slane %v717_v1, %v4495_v50  ;;  %v791_v5 = vsel %vm745_vm0, %v755_v60, %v714_v57  ;;  %v939_v6 = vadd.f32 %v4531_v62, %v902_v61  ;;  %v866_v7 = vsel %vm820_vm1, %v828_v0, %v716_v63  ;;  %v4122_v13 = vld [vmem:[%s5187_s1 + $0x130] sm:$0xff]   ;;  %v4123_v21 = vld [vmem:[%s5187_s1 + $0xf8] sm:$0xff]   ;;  %v4126_v57 = vld [vmem:[%s5187_s1 + $0x1c0] sm:$0xff]  }
  0x66   : > { %v901_v9 = vmul.f32 %v4523_v59, %v791_v5  ;;  %v903_v10 = vmul.f32 %v4523_v59, %v866_v7  ;;  %v942_v15 = vadd.f32 %v4531_v62, %v905_v8  ;;  %v869_v24 = vsel %vm820_vm1, %v832_v16, %v719_v12  ;;  %v721_v25 = vld [vmem:[%s4515_s7 + $0x50] sm:$0xff]  ;;  %v723_v27 = vld [vmem:[%s4515_s7 + $0x60] sm:$0xff]  ;;  %v722_v32 = vld [vmem:[%s4515_s7 + $0x58] sm:$0x3] }
  0x67   : > { %3642 = vmatpush3.bf16.msra.mxu1 %v4113_v45  ;;  %v794_v11 = vsel %vm745_vm0, %v759_v3, %v717_v1  ;;  %v969_v18 = vmax.f32 %v939_v6, 0.0  ;;  %v763_v26 = vrot.slane %v720_v20, %v4495_v50  ;;  %v906_v30 = vmul.f32 %v4523_v59, %v869_v24  ;;  %v4124_v33 = vld [vmem:[%s5187_s1 + $0x138] sm:$0xff]  }
  0x68   : > { %3770 = vmatpush3.bf16.msra.mxu0 %v4114_v46  ;;  %3643 = vmatprep.subr.bf16.mxu1 %v4115_v48  ;;  %v904_v14 = vmul.f32 %v4523_v59, %v794_v11  ;;  %v938_v17 = vadd.f32 %v4531_v62, %v901_v9  ;;  %v940_v19 = vadd.f32 %v4531_v62, %v903_v10  ;;  %v972_v23 = vmax.f32 %v942_v15, 0.0  ;;  %v724_v60 = vld [vmem:[%s4515_s7 + $0x68] sm:$0xff]  ;;  %v725_v10 = vld [vmem:[%s4515_s7 + $0x70] sm:$0x3]  ;;  %v726_v15 = vld [vmem:[%s4515_s7 + $0x78] sm:$0xff] }
  0x69   : > { %3771 = vmatprep.subr.bf16.mxu0 %v4116_v49  ;;  %v908_v31 = vmul.f32 %v4523_v59, %v721_v25  ;;  %v797_v35 = vsel %vm745_vm0, %v763_v26, %v720_v20  ;;  %v836_v36 = vrot.slane %v721_v25, %v4507_v54  ;;  %v767_v37 = vrot.slane %v723_v27, %v4495_v50  ;;  %v727_v20 = vld [vmem:[%s4515_s7 + $0x80] sm:$0xff]  ;;  %v4128_v25 = vld [vmem:[%s5187_s1 + $0x1c8] sm:$0xff]  }
  0x6a   : > { %v941_v22 = vadd.f32 %v4531_v62, %v904_v14  ;;  %v968_v28 = vmax.f32 %v938_v17, 0.0  ;;  %v970_v29 = vmax.f32 %v940_v19, 0.0  ;;  %v943_v40 = vadd.f32 %v4531_v62, %v906_v30 }
  0x6b   : > { %3644 = vmatpush3.bf16.msra.mxu1 %v4115_v48  ;;  %v907_v41 = vmul.f32 %v4523_v59, %v797_v35  ;;  %v945_v43 = vadd.f32 %v4531_v62, %v908_v31  ;;  %v872_v44 = vsel %vm820_vm1, %v836_v36, %v722_v32  ;;  %v911_v9 = vmul.f32 %v4523_v59, %v724_v60  ;;  %v728_v35 = vld [vmem:[%s4515_s7 + $0x88] sm:$0x3] }
  0x6c   : > { %3772 = vmatpush3.bf16.msra.mxu0 %v4116_v49  ;;  %3645 = vmatprep.subr.bf16.mxu1 %v4117_v51  ;;  %v971_v34 = vmax.f32 %v941_v22, 0.0  ;;  %v4580_v38 = vpack.c.bf16 %v969_v18, %v968_v28  ;;  %v4582_v39 = vpack.c.bf16 %v970_v29, %v970_v29  ;;  %v4125_v49 = vld [vmem:[%s5187_s1] sm:$0xff]   ;;  %v909_v1 = vmul.f32 %v4523_v59, %v872_v44  ;;  %v4129_v28 = vld [vmem:[%s5187_s1 + $0x10] sm:$0xff]  }
  0x6d   : > { %3773 = vmatprep.subr.bf16.mxu0 %v4118_v53  ;;  %v944_v58 = vadd.f32 %v4531_v62, %v907_v41  ;;  %v975_v0 = vmax.f32 %v945_v43, 0.0  ;;  %v948_v18 = vadd.f32 %v4531_v62, %v911_v9  ;;  %v840_v19 = vrot.slane %v724_v60, %v4507_v54  ;;  %v729_v43 = vld [vmem:[%s4515_s7 + $0x90] sm:$0xff]  ;;  %v4131_v60 = vld [vmem:[%s5187_s1 + $0x18] sm:$0xff]  }
  0x6e   : > { %v4586_v42 = vpack.c.bf16 %v972_v23, %v971_v34  ;;  %v1530_v45 = vshrl.u32 %v4580_v38, 16  ;;  %v1532_v46 = vshll.u32 %v4580_v38, 16  ;;  %v1537_v48 = vshll.u32 %v4582_v39, 16  ;;  %3653 = vmatprep.mubr.bf16.mxu1 %v4580_v38 }
  0x6f   : > { %3646 = vmatpush3.bf16.msra.mxu1 %v4117_v51  ;;  %v800_v51 = vsel %vm745_vm0, %v767_v37, %v723_v27  ;;  %v974_v5 = vmax.f32 %v944_v58, 0.0  ;;  %v946_v8 = vadd.f32 %v4531_v62, %v909_v1  ;;  %v978_v27 = vmax.f32 %v948_v18, 0.0 }
  0x70   : > { %3774 = vmatpush3.bf16.msra.mxu0 %v4118_v53  ;;  %3647 = vmatprep.subr.bf16.mxu1 %v4119_v55  ;;  %v973_v53 = vmax.f32 %v943_v40, 0.0  ;;  %v1534_v61 = vrot.slane %v1532_v46, 1  ;;  %v1539_v63 = vrot.slane %v1537_v48, 1  ;;  %v910_v6 = vmul.f32 %v4523_v59, %v800_v51  ;;  %v4130_v48 = vld [vmem:[%s5187_s1 + $0x1d0] sm:$0xff]  }
  0x71   : > { %3775 = vmatprep.subr.bf16.mxu0 %v4120_v56  ;;  %v976_v17 = vmax.f32 %v946_v8, 0.0  ;;  %v875_v29 = vsel %vm820_vm1, %v840_v19, %v725_v10  ;;  %v771_v30 = vrot.slane %v726_v15, %v4495_v50  ;;  %v914_v34 = vmul.f32 %v4523_v59, %v727_v20 }
  0x72   : > { %v4608_v2 = vpack.c.bf16 %v973_v53, %v973_v53  ;;  %v1535_v7 = vor.u32 %v1534_v61, %v1530_v45  ;;  %v947_v14 = vadd.f32 %v4531_v62, %v910_v6  ;;  %v844_v41 = vrot.slane %v727_v20, %v4507_v54  ;;  %v732_v6 = vld [vmem:[%s4515_s7 + $0xa8] sm:$0xff] }
  0x73   : > { %3648 = vmatpush3.bf16.msra.mxu1 %v4119_v55  ;;  %v1542_v55 = vshrl.u32 %v4586_v42, 16  ;;  %v4636_v26 = vpack.c.bf16 %v976_v17, %v976_v17  ;;  %v803_v40 = vsel %vm745_vm0, %v771_v30, %v726_v15  ;;  %v2202_v44 = vrot.slane %v4582_v39, 1  ;;  %v4132_v15 = vld [vmem:[%s5187_s1 + $0x1d8] sm:$0xff]  }
  0x74   : > { %3776 = vmatpush3.bf16.msra.mxu0 %v4120_v56  ;;  %3649 = vmatprep.subr.bf16.mxu1 %v4121_v4  ;;  %v1544_v56 = vshll.u32 %v4586_v42, 16  ;;  %v1549_v12 = vshll.u32 %v4608_v2, 16  ;;  %v4623_v16 = vsel %vm1516_vm2, %v1535_v7, %v1539_v63  ;;  %v977_v24 = vmax.f32 %v947_v14, 0.0 }
  0x75   : > { %3777 = vmatprep.subr.bf16.mxu0 %v4122_v13  ;;  %3781 = vmatprep.mubr.bf16.mxu0 %v4623_v16  ;;  %v1561_v36 = vshll.u32 %v4636_v26, 16  ;;  %v878_v63 = vsel %vm820_vm1, %v844_v41, %v728_v35  ;;  %v2201_v19 = vrot.slane %v4580_v38, 1  ;;  %v4134_v35 = vld [vmem:[%s5187_s1 + $0x1e0] sm:$0xff]  }
  0x76   : > { %v1546_v3 = vrot.slane %v1544_v56, 1  ;;  %v4652_v37 = vpack.c.bf16 %v978_v27, %v977_v24  ;;  %v951_v56 = vadd.f32 %v4531_v62, %v914_v34 }
  0x77   : > { %3650 = vmatpush3.bf16.msra.mxu1 %v4121_v4  ;;  %v4127_v4 = vld [vmem:[%s5187_s1 + $0x8] sm:$0xff]   ;;  %v1563_v51 = vrot.slane %v1561_v36, 1  ;;  %v4859_v52 = vsel %vm2197_vm3, %v2201_v19, %v2202_v44  ;;  %v4145_v44 = vld [vmem:[%s5187_s1 + $0x190] sm:$0xff]  }
  0x78   : > { %3778 = vmatpush3.bf16.msra.mxu0 %v4122_v13  ;;  %3651 = vmatprep.subr.bf16.mxu1 %v4123_v21  ;;  %v1547_v11 = vor.u32 %v1546_v3, %v1542_v55  ;;  %v4618_v13 = vpack.c.bf16 %v975_v0, %v974_v5  ;;  %v1566_v53 = vshrl.u32 %v4652_v37, 16  ;;  %v1568_v55 = vshll.u32 %v4652_v37, 16 }
  0x79   : > { %3779 = vmatprep.subr.bf16.mxu0 %v4124_v33  ;;  %v775_v0 = vrot.slane %v729_v43, %v4495_v50  ;;  %v915_v5 = vmul.f32 %v4523_v59, %v878_v63  ;;  %v736_v63 = vld [vmem:[%s4515_s7 + $0xc8] sm:$0xff] }
  0x7a   : > { %v1554_v22 = vshrl.u32 %v4618_v13, 16  ;;  %v1556_v23 = vshll.u32 %v4618_v13, 16  ;;  %v1570_v3 = vrot.slane %v1568_v55, 1 }
  0x7b   : > { %3652 = vmatpush3.bf16.msra.mxu1 %v4123_v21  ;;  %v1551_v21 = vrot.slane %v1549_v12, 1  ;;  %v806_v9 = vsel %vm745_vm0, %v775_v0, %v729_v43  ;;  %v4689_v12 = vld [vmem:[%s4515_s7 + $0xb0] sm:$0xff]  ;;  %v952_v17 = vadd.f32 %v4531_v62, %v915_v5 }
  0x7c   : > { %3780 = vmatpush3.bf16.msra.mxu0 %v4124_v33  ;;  %3669 = vmatprep.subr.bf16.mxu1 %v4125_v49  ;;  %v1558_v32 = vrot.slane %v1556_v23, 1  ;;  %v912_v33 = vmul.f32 %v4523_v59, %v875_v29  ;;  %v1571_v14 = vor.u32 %v1570_v3, %v1566_v53  ;;  %v916_v18 = vmul.f32 %v4523_v59, %v806_v9  ;;  %v4133_v23 = vld [vmem:[%s5187_s1 + $0x20] sm:$0xff]   ;;  %v4135_v53 = vld [vmem:[%s5187_s1 + $0x28] sm:$0xff]  }
  0x7d   : > { %3797 = vmatprep.subr.bf16.mxu0 %v4126_v57  ;;  %v4645_v31 = vsel %vm1516_vm2, %v1547_v11, %v1551_v21  ;;  %v731_v11 = vld [vmem:[%s4515_s7 + $0xa0] sm:$0x3]  ;;  %v920_v29 = vmul.f32 %v4523_v59, %v4689_v12 }
  0x7e   : > { %3654 = vmatmul.mubr.bf16.vlgmr.msra.gmra.mrb[0].mxu1 %v4586_v42  ;;  %v1559_v45 = vor.u32 %v1558_v32, %v1554_v22  ;;  %v949_v46 = vadd.f32 %v4531_v62, %v912_v33  ;;  %v953_v27 = vadd.f32 %v4531_v62, %v916_v18  ;;  %v737_v18 = vld [vmem:[%s4515_s7 + $0xd0] sm:$0x3] }
  0x7f   : > { %3670 = vmatpush3.bf16.msra.mxu1 %v4125_v49  ;;  %3657 = vmatprep.mubr.bf16.mxu1 %v4618_v13  ;;  %v913_v49 = vmul.f32 %v4523_v59, %v803_v40 }
  0x80   : > { %3671 = vmatprep.subr.bf16.mxu1 %v4127_v4  ;;  %3782 = vmatmul.mubr.bf16.vlgmr.msra.gmra.mrb[0].mxu0 %v4645_v31  ;;  %v979_v58 = vmax.f32 %v949_v46, 0.0  ;;  %v4676_v1 = vsel %vm1516_vm2, %v1559_v45, %v1563_v51  ;;  %v983_v40 = vmax.f32 %v953_v27, 0.0  ;;  %v734_v45 = vld [vmem:[%s4515_s7 + $0xb8] sm:$0x3]  ;;  %v735_v46 = vld [vmem:[%s4515_s7 + $0xc0] sm:$0xff] }
  0x81   : > { %3798 = vmatpush3.bf16.msra.mxu0 %v4126_v57  ;;  %v730_v57 = vld [vmem:[%s4515_s7 + $0x98] sm:$0xff]  ;;  %v950_v61 = vadd.f32 %v4531_v62, %v913_v49  ;;  %3785 = vmatprep.mubr.bf16.mxu0 %v4676_v1  ;;  %v783_v5 = vrot.slane %v735_v46, %v4495_v50  ;;  %v711_v27 = vld [vmem:[%s4515_s7] sm:$0xff] }
  0x82   : > { %3799 = vmatprep.subr.bf16.mxu0 %v4128_v25  ;;  %v4682_v7 = vpack.c.bf16 %v979_v58, %v979_v58  ;;  %v917_v10 = vmul.f32 %v4523_v59, %v730_v57  ;;  %v848_v24 = vrot.slane %v730_v57, %v4507_v54  ;;  %v4136_v58 = vld [vmem:[%s5187_s1 + $0x1e8] sm:$0xff]  }
  0x83   : > { %3672 = vmatpush3.bf16.msra.mxu1 %v4127_v4  ;;  %v981_v4 = vmax.f32 %v951_v56, 0.0  ;;  %v980_v8 = vmax.f32 %v950_v61, 0.0  ;;  %v852_v61 = vrot.slane %v4689_v12, %v4507_v54 }
  0x84   : > { %3673 = vmatprep.subr.bf16.mxu1 %v4129_v28  ;;  %v1573_v20 = vshll.u32 %v4682_v7, 16  ;;  %v954_v22 = vadd.f32 %v4531_v62, %v917_v10  ;;  %v881_v41 = vsel %vm820_vm1, %v848_v24, %v731_v11  ;;  %v4137_v11 = vld [vmem:[%s5187_s1 + $0x30] sm:$0xff]  }
  0x85   : > { %3800 = vmatpush3.bf16.msra.mxu0 %v4128_v25  ;;  %v4698_v21 = vpack.c.bf16 %v981_v4, %v980_v8  ;;  %v982_v25 = vmax.f32 %v952_v17, 0.0  ;;  %v918_v51 = vmul.f32 %v4523_v59, %v881_v41  ;;  %v812_v17 = vsel %vm745_vm0, %v783_v5, %v735_v46  ;;  %v4780_v46 = vld [vmem:[%s4515_s7 + $0x8] sm:$0xff] }
  0x86   : > { %3658 = vmatmul.mubr.bf16.gmra.mrb[4].mxu1 %v4652_v37  ;;  %3801 = vmatprep.subr.bf16.mxu0 %v4130_v48  ;;  %v1575_v30 = vrot.slane %v1573_v20, 1  ;;  %v984_v34 = vmax.f32 %v954_v22, 0.0 }
  0x87   : > { %3674 = vmatpush3.bf16.msra.mxu1 %v4129_v28  ;;  %v779_v28 = vrot.slane %v732_v6, %v4495_v50  ;;  %3661 = vmatprep.mubr.bf16.mxu1 %v4698_v21  ;;  %v1578_v32 = vshrl.u32 %v4698_v21, 16  ;;  %v1580_v33 = vshll.u32 %v4698_v21, 16  ;;  %v4715_v36 = vpack.c.bf16 %v982_v25, %v982_v25 }
  0x88   : > { %3675 = vmatprep.subr.bf16.mxu1 %v4131_v60  ;;  %v4733_v57 = vpack.c.bf16 %v984_v34, %v983_v40  ;;  %v955_v3 = vadd.f32 %v4531_v62, %v918_v51  ;;  %v922_v25 = vmul.f32 %v4523_v59, %v812_v17  ;;  %v856_v34 = vrot.slane %v736_v63, %v4507_v54  ;;  %v4138_v40 = vld [vmem:[%s5187_s1 + $0x1f0] sm:$0xff]   ;;  %v740_v17 = vld [vmem:[%s4515_s7 + $0xe8] sm:$0x3] }
  0x89   : > { %3802 = vmatpush3.bf16.msra.mxu0 %v4130_v48  ;;  %v809_v43 = vsel %vm745_vm0, %v779_v28, %v732_v6  ;;  %v4724_v48 = vsel %vm1516_vm2, %v1571_v14, %v1575_v30  ;;  %v1582_v49 = vrot.slane %v1580_v33, 1  ;;  %v1585_v56 = vshll.u32 %v4715_v36, 16 }
  0x8a   : > { %3803 = vmatprep.subr.bf16.mxu0 %v4132_v15  ;;  %v919_v55 = vmul.f32 %v4523_v59, %v809_v43  ;;  %3786 = vmatmul.mubr.bf16.gmra.mrb[4].mxu0 %v4724_v48  ;;  %v1590_v8 = vshrl.u32 %v4733_v57, 16  ;;  %v1592_v9 = vshll.u32 %v4733_v57, 16  ;;  %v985_v12 = vmax.f32 %v955_v3, 0.0 }
  0x8b   : > { %3676 = vmatpush3.bf16.msra.mxu1 %v4131_v60  ;;  %v957_v60 = vadd.f32 %v4531_v62, %v920_v29  ;;  %v1583_v0 = vor.u32 %v1582_v49, %v1578_v32  ;;  %v1587_v6 = vrot.slane %v1585_v56, 1  ;;  %v923_v29 = vmul.f32 %v4523_v59, %v736_v63  ;;  %v4140_v56 = vld [vmem:[%s5187_s1 + $0x1f8] sm:$0xff]  }
  0x8c   : > { %3677 = vmatprep.subr.bf16.mxu1 %v4133_v23  ;;  %v956_v4 = vadd.f32 %v4531_v62, %v919_v55  ;;  %v1594_v22 = vrot.slane %v1592_v9, 1  ;;  %v959_v33 = vadd.f32 %v4531_v62, %v922_v25  ;;  %v887_v55 = vsel %vm820_vm1, %v856_v34, %v737_v18  ;;  %v4141_v25 = vld [vmem:[%s5187_s1 + $0x180] sm:$0xff]  }
  0x8d   : > { %3804 = vmatpush3.bf16.msra.mxu0 %v4132_v15  ;;  %v987_v10 = vmax.f32 %v957_v60, 0.0  ;;  %v884_v15 = vsel %vm820_vm1, %v852_v61, %v734_v45  ;;  %v4757_v20 = vsel %vm1516_vm2, %v1583_v0, %v1587_v6  ;;  %v960_v45 = vadd.f32 %v4531_v62, %v923_v29  ;;  %v713_v29 = vld [vmem:[%s4515_s7 + $0x10] sm:$0x3] }
  0x8e   : > { %3662 = vmatmul.mubr.bf16.gmra.mrb[8].mxu1 %v4733_v57  ;;  %3805 = vmatprep.subr.bf16.mxu0 %v4134_v35  ;;  %v986_v14 = vmax.f32 %v956_v4, 0.0  ;;  %v921_v24 = vmul.f32 %v4523_v59, %v884_v15  ;;  %v1595_v30 = vor.u32 %v1594_v22, %v1590_v8  ;;  %v989_v51 = vmax.f32 %v959_v33, 0.0  ;;  %v738_v4 = vld [vmem:[%s4515_s7 + $0xd8] sm:$0xff]  ;;  %v4824_v33 = vld [vmem:[%s5187_s1 + $0x80] sm:$0xff]  }
  0x8f   : > { %3678 = vmatpush3.bf16.msra.mxu1 %v4133_v23  ;;  %3789 = vmatprep.mubr.bf16.mxu0 %v4757_v20  ;;  %v4763_v23 = vpack.c.bf16 %v985_v12, %v985_v12  ;;  %v751_v60 = vrot.slane %v711_v27, %v4495_v50  ;;  %v990_v0 = vmax.f32 %v960_v45, 0.0  ;;  %v924_v3 = vmul.f32 %v4523_v59, %v887_v55 }
  0x90   : > { %3679 = vmatprep.subr.bf16.mxu1 %v4135_v53  ;;  %v4765_v28 = vpack.c.bf16 %v987_v10, %v986_v14  ;;  %v958_v32 = vadd.f32 %v4531_v62, %v921_v24  ;;  %v824_v8 = vrot.slane %v4780_v46, %v4507_v54  ;;  %v899_v9 = vmul.f32 %v4523_v59, %v4780_v46 }
  0x91   : > { %3806 = vmatpush3.bf16.msra.mxu0 %v4134_v35  ;;  %v1597_v41 = vshll.u32 %v4763_v23, 16  ;;  %v788_v6 = vsel %vm745_vm0, %v751_v60, %v711_v27  ;;  %v4805_v14 = vpack.c.bf16 %v990_v0, %v989_v51  ;;  %v961_v15 = vadd.f32 %v4531_v62, %v924_v3 }
  0x92   : > { %3807 = vmatprep.subr.bf16.mxu0 %v4136_v58  ;;  %3665 = vmatprep.mubr.bf16.mxu1 %v4765_v28  ;;  %v1602_v35 = vshrl.u32 %v4765_v28, 16  ;;  %v1604_v43 = vshll.u32 %v4765_v28, 16  ;;  %v988_v49 = vmax.f32 %v958_v32, 0.0  ;;  %v898_v22 = vmul.f32 %v4523_v59, %v788_v6 }
  0x93   : > { %3680 = vmatpush3.bf16.msra.mxu1 %v4135_v53  ;;  %v4139_v53 = vld [vmem:[%s5187_s1 + $0x38] sm:$0xff]   ;;  %v1599_v61 = vrot.slane %v1597_v41, 1  ;;  %v936_v24 = vadd.f32 %v4531_v62, %v899_v9  ;;  %v787_v27 = vrot.slane %v738_v4, %v4495_v50  ;;  %v1802_v32 = vshll.u32 %v4805_v14, 16 }
  0x94   : > { %3681 = vmatprep.subr.bf16.mxu1 %v4137_v11  ;;  %v1606_v63 = vrot.slane %v1604_v43, 1  ;;  %v4793_v5 = vpack.c.bf16 %v988_v49, %v988_v49  ;;  %v935_v50 = vadd.f32 %v4531_v62, %v898_v22 }
  0x95   : > { %3808 = vmatpush3.bf16.msra.mxu0 %v4136_v58  ;;  %v739_v58 = vld [vmem:[%s4515_s7 + $0xe0] sm:$0xff]  ;;  %v4803_v10 = vsel %vm1516_vm2, %v1595_v30, %v1599_v61  ;;  %v1800_v30 = vshrl.u32 %v4805_v14, 16  ;;  %v815_v43 = vsel %vm745_vm0, %v787_v27, %v738_v4  ;;  %v1804_v46 = vrot.slane %v1802_v32, 1  ;;  %v4144_v32 = vld [vmem:[%s5187_s1 + $0x88] sm:$0xff]  }
  0x96   : > { %3809 = vmatprep.subr.bf16.mxu0 %v4138_v40  ;;  %v1607_v12 = vor.u32 %v1606_v63, %v1602_v35  ;;  %3790 = vmatmul.mubr.bf16.gmra.mrb[8].mxu0 %v4803_v10  ;;  %v1609_v18 = vshll.u32 %v4793_v5, 16  ;;  %v860_v34 = vrot.slane %v739_v58, %v4507_v54  ;;  %v966_v35 = vmax.f32 %v936_v24, 0.0 }
  0x97   : > { %3682 = vmatpush3.bf16.msra.mxu1 %v4137_v11  ;;  %v991_v11 = vmax.f32 %v961_v15, 0.0  ;;  %v925_v49 = vmul.f32 %v4523_v59, %v815_v43  ;;  %v965_v54 = vmax.f32 %v935_v50, 0.0  ;;  %v926_v55 = vmul.f32 %v4523_v59, %v739_v58 }
  0x98   : > { %3683 = vmatprep.subr.bf16.mxu1 %v4139_v53  ;;  %3666 = vmatmul.mubr.bf16.gmra.mrb[12].mxu1 %v4805_v14  ;;  %v1611_v41 = vrot.slane %v1609_v18, 1  ;;  %v1805_v47 = vor.u32 %v1804_v46, %v1800_v30  ;;  %v863_v63 = vsel %vm820_vm1, %v824_v8, %v713_v29  ;;  %v2214_v24 = vrot.slane %v4715_v36, 1 }
  0x99   : > { %3810 = vmatpush3.bf16.msra.mxu0 %v4138_v40  ;;  %v4830_v45 = vpack.c.bf16 %v991_v11, %v991_v11  ;;  %v890_v40 = vsel %vm820_vm1, %v860_v34, %v740_v17  ;;  %v4845_v0 = vpack.c.bf16 %v966_v35, %v965_v54  ;;  %v963_v3 = vadd.f32 %v4531_v62, %v926_v55  ;;  %v4147_v34 = vld [vmem:[%s5187_s1 + $0x198] sm:$0xff]  }
  0x9a   : > { %3811 = vmatprep.subr.bf16.mxu0 %v4140_v56  ;;  %v4836_v51 = vsel %vm1516_vm2, %v1607_v12, %v1611_v41  ;;  %v927_v60 = vmul.f32 %v4523_v59, %v890_v40  ;;  %v900_v6 = vmul.f32 %v4523_v59, %v863_v63  ;;  %v2216_v11 = vrot.slane %v4733_v57, 1  ;;  %v4151_v63 = vld [vmem:[%s5187_s1 + $0x1a8] sm:$0xff]  }
  0x9b   : > { %3684 = vmatpush3.bf16.msra.mxu1 %v4139_v53  ;;  %3793 = vmatprep.mubr.bf16.mxu0 %v4836_v51  ;;  %v1807_v61 = vshll.u32 %v4830_v45, 16  ;;  %v962_v53 = vadd.f32 %v4531_v62, %v925_v49  ;;  %v993_v8 = vmax.f32 %v963_v3, 0.0  ;;  %v2217_v30 = vrot.slane %v4763_v23, 1  ;;  %v4146_v23 = vld [vmem:[%s5187_s1 + $0x90] sm:$0xff]  }
  0x9c   : > { %3701 = vmatprep.subr.bf16.mxu1 %v4141_v25  ;;  %v964_v4 = vadd.f32 %v4531_v62, %v927_v60  ;;  %3685 = vmatprep.mubr.bf16.mxu1 %v4845_v0  ;;  %v937_v15 = vadd.f32 %v4531_v62, %v900_v6  ;;  %v2213_v62 = vrot.slane %v4698_v21, 1  ;;  %v2219_v41 = vrot.slane %v4765_v28, 1 }
  0x9d   : > { %3812 = vmatpush3.bf16.msra.mxu0 %v4140_v56  ;;  %v1809_v9 = vrot.slane %v1807_v61, 1  ;;  %v4143_v56 = vld [vmem:[%s5187_s1 + $0x188] sm:$0xff]   ;;  %v992_v58 = vmax.f32 %v962_v53, 0.0  ;;  %v2220_v50 = vrot.slane %v4793_v5, 1  ;;  %v4899_v43 = vsel %vm2197_vm3, %v2216_v11, %v2217_v30  ;;  %v4149_v5 = vld [vmem:[%s5187_s1 + $0x1a0] sm:$0xff]   ;;  %v4163_v30 = vld [vmem:[%s5187_s1 + $0x58] sm:$0xff]  }
  0x9e   : > { %3829 = vmatprep.subr.bf16.mxu0 %v4824_v33  ;;  %v994_v12 = vmax.f32 %v964_v4, 0.0  ;;  %v967_v22 = vmax.f32 %v937_v15, 0.0  ;;  %v4883_v29 = vsel %vm2197_vm3, %v2213_v62, %v2214_v24  ;;  %v1518_v49 = vshrl.u32 %v4845_v0, 16  ;;  %v4155_v15 = vld [vmem:[%s5187_s1 + $0x1b8] sm:$0xff]  }
  0x9f   : > { %v4864_v59 = vsel %vm1516_vm2, %v1805_v47, %v1809_v9  ;;  %v4868_v39 = vpack.c.bf16 %v993_v8, %v992_v58  ;;  %v4907_v40 = vsel %vm2197_vm3, %v2219_v41, %v2220_v50  ;;  %v1520_v54 = vshll.u32 %v4845_v0, 16  ;;  %v4150_v58 = vld [vmem:[%s5187_s1 + $0xa0] sm:$0xff]   ;;  %v4171_v50 = vld [vmem:[%s5187_s1 + $0x78] sm:$0xff]  }
  0xa0   : > { %3686 = vmatmul.mubr.bf16.vlgmr.msra.gmra.mrb[0].mxu1 %v4580_v38  ;;  %3794 = vmatmul.mubr.bf16.gmra.mrb[12].mxu0 %v4864_v59  ;;  %v4870_v17 = vpack.c.bf16 %v994_v12, %v994_v12  ;;  %v4896_v35 = vpack.c.bf16 %v967_v22, %v967_v22  ;;  %v2410_v53 = vrot.slane %v4805_v14, 1  ;;  %v2411_v3 = vrot.slane %v4830_v45, 1  ;;  %v4153_v45 = vld [vmem:[%s5187_s1 + $0x1b0] sm:$0xff]   ;;  %v4152_v12 = vld [vmem:[%s5187_s1 + $0xa8] sm:$0xff]   ;;  %v4158_v22 = vld [vmem:[%s5187_s1 + $0x140] sm:$0xff]  }
  0xa1   : > { %3702 = vmatpush3.bf16.msra.mxu1 %v4141_v25  ;;  %3813 = vmatprep.mubr.bf16.mxu0 %v4645_v31  ;;  %v1991_v38 = vshrl.u32 %v4868_v39, 16  ;;  %v1993_v19 = vshll.u32 %v4868_v39, 16  ;;  %v1522_v60 = vrot.slane %v1520_v54, 1  ;;  %v2594_v6 = vrot.slane %v4868_v39, 1 }
  0xa2   : > { %3703 = vmatprep.subr.bf16.mxu1 %v4143_v56  ;;  %3689 = vmatprep.mubr.bf16.mxu1 %v4586_v42  ;;  %v1998_v18 = vshll.u32 %v4870_v17, 16  ;;  %v1525_v55 = vshll.u32 %v4896_v35, 16  ;;  %v4933_v9 = vsel %vm2197_vm3, %v2410_v53, %v2411_v3  ;;  %v2198_v62 = vrot.slane %v4845_v0, 1  ;;  %v4161_v0 = vld [vmem:[%s5187_s1 + $0x50] sm:$0xff]  }
  0xa3   : > { %v1995_v25 = vrot.slane %v1993_v19, 1  ;;  %v1523_v61 = vor.u32 %v1522_v60, %v1518_v49  ;;  %v2204_v24 = vrot.slane %v4586_v42, 1 }
  0xa4   : > { %v2000_v27 = vrot.slane %v1998_v18, 1  ;;  %v1527_v47 = vrot.slane %v1525_v55, 1  ;;  %v4159_v18 = vld [vmem:[%s5187_s1 + $0x48] sm:$0xff]  }
  0xa5   : > { %3704 = vmatpush3.bf16.msra.mxu1 %v4143_v56  ;;  %v1996_v36 = vor.u32 %v1995_v25, %v1991_v38  ;;  %v2595_v56 = vrot.slane %v4870_v17, 1  ;;  %v4157_v17 = vld [vmem:[%s5187_s1 + $0x40] sm:$0xff]   ;;  %v2199_v38 = vrot.slane %v4896_v35, 1  ;;  %v2205_v25 = vrot.slane %v4608_v2, 1  ;;  %v4170_v35 = vld [vmem:[%s5187_s1 + $0x170] sm:$0xff]  }
  0xa6   : > { %3705 = vmatprep.subr.bf16.mxu1 %v4145_v44  ;;  %v4928_v4 = vsel %vm1516_vm2, %v1523_v61, %v1527_v47  ;;  %v2208_v2 = vrot.slane %v4636_v26, 1  ;;  %v4164_v26 = vld [vmem:[%s5187_s1 + $0x158] sm:$0xff]  }
  0xa7   : > { %v2001_v46 = vsel %vm1516_vm2, %v1996_v36, %v2000_v27  ;;  %v4944_v8 = vsel %vm2197_vm3, %v2594_v6, %v2595_v56  ;;  %v2200_v19 = vsel %vm2197_vm3, %v2198_v62, %v2199_v38  ;;  %v4160_v27 = vld [vmem:[%s5187_s1 + $0x148] sm:$0xff]   ;;  %v4986_v11 = vsel %vm2197_vm3, %v2204_v24, %v2205_v25 }
  0xa8   : > { %3690 = vmatmul.mubr.bf16.gmra.mrb[4].mxu1 %v4618_v13  ;;  %3814 = vmatmul.mubr.bf16.vlgmr.msra.gmra.mrb[0].mxu0 %v4676_v1  ;;  %v2211_v36 = vrot.slane %v4682_v7, 1  ;;  %v4169_v7 = vld [vmem:[%s5187_s1 + $0x70] sm:$0xff]  }
  0xa9   : > { %3706 = vmatpush3.bf16.msra.mxu1 %v4145_v44  ;;  %3830 = vmatpush3.bf16.msra.mxu0 %v4824_v33  ;;  %v4148_v33 = vld [vmem:[%s5187_s1 + $0x98] sm:$0xff]   ;;  %v4154_v44 = vld [vmem:[%s5187_s1 + $0xb0] sm:$0xff]  }
  0xaa   : > { %3817 = vmatprep.mubr.bf16.mxu0 %v4724_v48  ;;  %3831 = vmatprep.subr.bf16.mxu0 %v4144_v32 }
  0xab   : > { %3707 = vmatprep.subr.bf16.mxu1 %v4147_v34  ;;  %3693 = vmatprep.mubr.bf16.mxu1 %v4652_v37 }
  0xad   : > { %3708 = vmatpush3.bf16.msra.mxu1 %v4147_v34  ;;  %3832 = vmatpush3.bf16.msra.mxu0 %v4144_v32  ;;  %v4165_v32 = vld [vmem:[%s5187_s1 + $0x60] sm:$0xff]   ;;  %v4162_v34 = vld [vmem:[%s5187_s1 + $0x150] sm:$0xff]  }
  0xae   : > { %3709 = vmatprep.subr.bf16.mxu1 %v4149_v5  ;;  %3833 = vmatprep.subr.bf16.mxu0 %v4146_v23 }
  0xb0   : > { %3694 = vmatmul.mubr.bf16.gmra.mrb[8].mxu1 %v4698_v21  ;;  %3818 = vmatmul.mubr.bf16.gmra.mrb[4].mxu0 %v4757_v20 }
  0xb1   : > { %3710 = vmatpush3.bf16.msra.mxu1 %v4149_v5  ;;  %3834 = vmatpush3.bf16.msra.mxu0 %v4146_v23  ;;  %v4174_v23 = vld [vmem:[%s5187_s1 + $0x208] sm:$0xff]  }
  0xb2   : > { %3821 = vmatprep.mubr.bf16.mxu0 %v4803_v10  ;;  %3835 = vmatprep.subr.bf16.mxu0 %v4148_v33 }
  0xb3   : > { %3711 = vmatprep.subr.bf16.mxu1 %v4151_v63  ;;  %3697 = vmatprep.mubr.bf16.mxu1 %v4733_v57 }
  0xb5   : > { %3712 = vmatpush3.bf16.msra.mxu1 %v4151_v63  ;;  %3836 = vmatpush3.bf16.msra.mxu0 %v4148_v33 }
  0xb6   : > { %3713 = vmatprep.subr.bf16.mxu1 %v4153_v45  ;;  %3837 = vmatprep.subr.bf16.mxu0 %v4150_v58 }
  0xb8   : > { %3698 = vmatmul.mubr.bf16.gmra.mrb[12].mxu1 %v4765_v28  ;;  %3822 = vmatmul.mubr.bf16.gmra.mrb[8].mxu0 %v4836_v51 }
  0xb9   : > { %3714 = vmatpush3.bf16.msra.mxu1 %v4153_v45  ;;  %3838 = vmatpush3.bf16.msra.mxu0 %v4150_v58 }
  0xba   : > { %3825 = vmatprep.mubr.bf16.mxu0 %v4864_v59  ;;  %3839 = vmatprep.subr.bf16.mxu0 %v4152_v12  ;;  %v4156_v59 = vld [vmem:[%s5187_s1 + $0xb8] sm:$0xff]  }
  0xbb   : > { %3715 = vmatprep.subr.bf16.mxu1 %v4155_v15  ;;  %3717 = vmatprep.mubr.bf16.mxu1 %v4586_v42  ;;  %v2207_v42 = vrot.slane %v4618_v13, 1 }
  0xbd   : > { %3716 = vmatpush3.bf16.msra.mxu1 %v4155_v15  ;;  %3840 = vmatpush3.bf16.msra.mxu0 %v4152_v12 }
  0xbe   : > { %3733 = vmatprep.subr.bf16.mxu1 %v4157_v17  ;;  %3841 = vmatprep.subr.bf16.mxu0 %v4154_v44 }
  0xc0   : > { %3718 = vmatmul.mubr.bf16.vlgmr.msra.gmra.mrb[0].mxu1 %v4618_v13  ;;  %3826 = vmatmul.mubr.bf16.gmra.mrb[12].mxu0 %v2001_v46  ;;  %v5006_v13 = vsel %vm2197_vm3, %v2207_v42, %v2208_v2  ;;  %v4175_v46 = vld [vmem:[%s5187_s1 + $0x210] sm:$0xff]  }
  0xc1   : > { %3734 = vmatpush3.bf16.msra.mxu1 %v4157_v17  ;;  %3842 = vmatpush3.bf16.msra.mxu0 %v4154_v44 }
  0xc2   : > { %3845 = vmatprep.mubr.bf16.mxu0 %v2200_v19  ;;  %3843 = vmatprep.subr.bf16.mxu0 %v4156_v59 }
  0xc3   : > { %3735 = vmatprep.subr.bf16.mxu1 %v4159_v18  ;;  %3721 = vmatprep.mubr.bf16.mxu1 %v4652_v37 }
  0xc5   : > { %3736 = vmatpush3.bf16.msra.mxu1 %v4159_v18  ;;  %3844 = vmatpush3.bf16.msra.mxu0 %v4156_v59 }
  0xc6   : > { %3737 = vmatprep.subr.bf16.mxu1 %v4161_v0  ;;  %3861 = vmatprep.subr.bf16.mxu0 %v4158_v22 }
  0xc8   : > { %3722 = vmatmul.mubr.bf16.gmra.mrb[4].mxu1 %v4698_v21  ;;  %3846 = vmatmul.mubr.bf16.vlgmr.msra.gmra.mrb[0].mxu0 %v4859_v52  ;;  %v2210_v21 = vrot.slane %v4652_v37, 1  ;;  %v4167_v37 = vld [vmem:[%s5187_s1 + $0x68] sm:$0xff]  }
  0xc9   : > { %3738 = vmatpush3.bf16.msra.mxu1 %v4161_v0  ;;  %3862 = vmatpush3.bf16.msra.mxu0 %v4158_v22 }
  0xca   : > { %3849 = vmatprep.mubr.bf16.mxu0 %v4986_v11  ;;  %3863 = vmatprep.subr.bf16.mxu0 %v4160_v27  ;;  %v5012_v41 = vsel %vm2197_vm3, %v2210_v21, %v2211_v36 }
  0xcb   : > { %3739 = vmatprep.subr.bf16.mxu1 %v4163_v30  ;;  %3725 = vmatprep.mubr.bf16.mxu1 %v4733_v57  ;;  %v4166_v57 = vld [vmem:[%s5187_s1 + $0x160] sm:$0xff]  }
  0xcd   : > { %3740 = vmatpush3.bf16.msra.mxu1 %v4163_v30  ;;  %3864 = vmatpush3.bf16.msra.mxu0 %v4160_v27 }
  0xce   : > { %3741 = vmatprep.subr.bf16.mxu1 %v4165_v32  ;;  %3865 = vmatprep.subr.bf16.mxu0 %v4162_v34 }
  0xd0   : > { %3726 = vmatmul.mubr.bf16.gmra.mrb[8].mxu1 %v4765_v28  ;;  %3850 = vmatmul.mubr.bf16.gmra.mrb[4].mxu0 %v5006_v13  ;;  %v4168_v28 = vld [vmem:[%s5187_s1 + $0x168] sm:$0xff]  }
  0xd1   : > { %3742 = vmatpush3.bf16.msra.mxu1 %v4165_v32  ;;  %3866 = vmatpush3.bf16.msra.mxu0 %v4162_v34 }
  0xd2   : > { %3853 = vmatprep.mubr.bf16.mxu0 %v5012_v41  ;;  %3867 = vmatprep.subr.bf16.mxu0 %v4164_v26 }
  0xd3   : > { %3743 = vmatprep.subr.bf16.mxu1 %v4167_v37  ;;  %3729 = vmatprep.mubr.bf16.mxu1 %v4805_v14  ;;  %v4173_v14 = vld [vmem:[%s5187_s1 + $0x200] sm:$0xff]  }
  0xd5   : > { %3744 = vmatpush3.bf16.msra.mxu1 %v4167_v37  ;;  %3868 = vmatpush3.bf16.msra.mxu0 %v4164_v26 }
  0xd6   : > { %3745 = vmatprep.subr.bf16.mxu1 %v4169_v7  ;;  %3869 = vmatprep.subr.bf16.mxu0 %v4166_v57 }
  0xd8   : > { %3730 = vmatmul.mubr.bf16.gmra.mrb[12].mxu1 %v4868_v39  ;;  %3854 = vmatmul.mubr.bf16.gmra.mrb[8].mxu0 %v4883_v29  ;;  %v4172_v39 = vld [vmem:[%s5187_s1 + $0x178] sm:$0xff]  }
  0xd9   : > { %3746 = vmatpush3.bf16.msra.mxu1 %v4169_v7  ;;  %3870 = vmatpush3.bf16.msra.mxu0 %v4166_v57 }
  0xda   : > { %3857 = vmatprep.mubr.bf16.mxu0 %v4899_v43  ;;  %3871 = vmatprep.subr.bf16.mxu0 %v4168_v28 }
  0xdb   : > { %3747 = vmatprep.subr.bf16.mxu1 %v4171_v50  ;;  %3749 = vmatprep.mubr.bf16.mxu1 %v4928_v4 }
  0xdd   : > { %3748 = vmatpush3.bf16.msra.mxu1 %v4171_v50  ;;  %3872 = vmatpush3.bf16.msra.mxu0 %v4168_v28 }
  0xde   : > { %3925 = vmatprep.subr.bf16.mxu1 %v4173_v14  ;;  %3873 = vmatprep.subr.bf16.mxu0 %v4170_v35 }
  0xe0   : > { %3750 = vmatmul.mubr.bf16.vlgmr.msra.gmra.mrb[0].mxu1 %v4623_v16  ;;  %3858 = vmatmul.mubr.bf16.gmra.mrb[12].mxu0 %v4907_v40  ;;  %v4176_v16 = vld [vmem:[%s5187_s1 + $0x218] sm:$0xff]  }
  0xe1   : > { %3933 = vmatpush3.bf16.msra.mxu1 %v4173_v14  ;;  %3874 = vmatpush3.bf16.msra.mxu0 %v4170_v35 }
  0xe2   : > { %3877 = vmatprep.mubr.bf16.mxu0 %v4859_v52  ;;  %3875 = vmatprep.subr.bf16.mxu0 %v4172_v39 }
  0xe3   : > { %3926 = vmatprep.subr.bf16.mxu1 %v4174_v23  ;;  %3753 = vmatprep.mubr.bf16.mxu1 %v4645_v31  ;;  %v4177_v31 = vld [vmem:[%s5187_s1 + $0x220] sm:$0xff]  }
  0xe5   : > { %3934 = vmatpush3.bf16.msra.mxu1 %v4174_v23  ;;  %3876 = vmatpush3.bf16.msra.mxu0 %v4172_v39 }
  0xe6   : > { %3927 = vmatprep.subr.bf16.mxu1 %v4175_v46  ;;  %3893 = vmatprep.subr.bf16.mxu0 %v4173_v14 }
  0xe8   : > { %3754 = vmatmul.mubr.bf16.gmra.mrb[4].mxu1 %v4676_v1  ;;  %3878 = vmatmul.mubr.bf16.vlgmr.msra.gmra.mrb[0].mxu0 %v4986_v11  ;;  %v4178_v1 = vld [vmem:[%s5187_s1 + $0x228] sm:$0xff]  }
  0xe9   : > { %3935 = vmatpush3.bf16.msra.mxu1 %v4175_v46  ;;  %3894 = vmatpush3.bf16.msra.mxu0 %v4173_v14 }
  0xea   : > { %3881 = vmatprep.mubr.bf16.mxu0 %v5006_v13  ;;  %3895 = vmatprep.subr.bf16.mxu0 %v4174_v23 }
  0xeb   : > { %3928 = vmatprep.subr.bf16.mxu1 %v4176_v16  ;;  %3757 = vmatprep.mubr.bf16.mxu1 %v4724_v48  ;;  %v4179_v48 = vld [vmem:[%s5187_s1 + $0x230] sm:$0xff]  }
  0xed   : > { %3936 = vmatpush3.bf16.msra.mxu1 %v4176_v16  ;;  %3896 = vmatpush3.bf16.msra.mxu0 %v4174_v23 }
  0xee   : > { %3929 = vmatprep.subr.bf16.mxu1 %v4177_v31  ;;  %3897 = vmatprep.subr.bf16.mxu0 %v4175_v46 }
  0xf0   : > { %3758 = vmatmul.mubr.bf16.gmra.mrb[8].mxu1 %v4757_v20  ;;  %3882 = vmatmul.mubr.bf16.gmra.mrb[4].mxu0 %v5012_v41  ;;  %v4180_v20 = vld [vmem:[%s5187_s1 + $0x238] sm:$0xff]  }
  0xf1   : > { %3937 = vmatpush3.bf16.msra.mxu1 %v4177_v31  ;;  %3898 = vmatpush3.bf16.msra.mxu0 %v4175_v46 }
  0xf2   : > { %3885 = vmatprep.mubr.bf16.mxu0 %v4883_v29  ;;  %3899 = vmatprep.subr.bf16.mxu0 %v4176_v16 }
  0xf3   : > { %3930 = vmatprep.subr.bf16.mxu1 %v4178_v1  ;;  %3761 = vmatprep.mubr.bf16.mxu1 %v4803_v10 }
  0xf5   : > { %3938 = vmatpush3.bf16.msra.mxu1 %v4178_v1  ;;  %3900 = vmatpush3.bf16.msra.mxu0 %v4176_v16 }
  0xf6   : > { %3931 = vmatprep.subr.bf16.mxu1 %v4179_v48  ;;  %3901 = vmatprep.subr.bf16.mxu0 %v4177_v31 }
  0xf8   : > { %3762 = vmatmul.mubr.bf16.gmra.mrb[12].mxu1 %v4836_v51  ;;  %3886 = vmatmul.mubr.bf16.gmra.mrb[8].mxu0 %v4899_v43 }
  0xf9   : > { %3939 = vmatpush3.bf16.msra.mxu1 %v4179_v48  ;;  %3902 = vmatpush3.bf16.msra.mxu0 %v4177_v31 }
  0xfa   : > { %3889 = vmatprep.mubr.bf16.mxu0 %v4907_v40  ;;  %3903 = vmatprep.subr.bf16.mxu0 %v4178_v1 }
  0xfb   : > { %3932 = vmatprep.subr.bf16.mxu1 %v4180_v20  ;;  %3917 = vmatprep.mubr.bf16.mxu1 %v4899_v43 }
  0xfd   : > { %3940 = vmatpush3.bf16.msra.mxu1 %v4180_v20  ;;  %3904 = vmatpush3.bf16.msra.mxu0 %v4178_v1 }
  0xfe   : > { %3905 = vmatprep.subr.bf16.mxu0 %v4179_v48 }
 0x100   : > { %3918 = vmatmul.mubr.bf16.vlgmr.msra.gmra.mrb[16].mxu1 %v4907_v40  ;;  %3890 = vmatmul.mubr.bf16.gmra.mrb[12].mxu0 %v4933_v9 }
 0x101   : > { %3921 = vmatprep.mubr.bf16.mxu1 %v4933_v9  ;;  %3906 = vmatpush3.bf16.msra.mxu0 %v4179_v48 }
 0x102   : > { %3909 = vmatprep.mubr.bf16.mxu0 %v4986_v11  ;;  %3907 = vmatprep.subr.bf16.mxu0 %v4180_v20 }
 0x105   : > { %3908 = vmatpush3.bf16.msra.mxu0 %v4180_v20 }
 0x108   : > { %3922 = vmatmul.mubr.bf16.gmra.mrb[20].mxu1 %v4944_v8  ;;  %3910 = vmatmul.mubr.bf16.vlgmr.msra.gmra.mrb[0].mxu0 %v5006_v13 }
 0x109   : > { %3913 = vmatprep.mubr.bf16.mxu0 %v5012_v41 }
 0x110   : > { %3914 = vmatmul.mubr.bf16.gmra.mrb[4].mxu0 %v4883_v29 }
 0x1b3   : > { %v3751_v10 = vpop.f32.mrb[0].mxu1 }
 0x1b4   : > { %v1720_v51 = vpop.f32.mrb[1].mxu1 }
 0x1b5   : > { %v3752_v52 = vpop.f32.mrb[2].mxu1 }
 0x1b6   : > { %v1723_v43 = vpop.f32.mrb[3].mxu1 }
 0x1bb   : > { %v5091_v40 = vpop.f32.mrb[4].mxu1 }
 0x1bc   : > { %v5093_v5 = vpop.f32.mrb[5].mxu1 }
 0x1bd   : > { %v5095_v49 = vpop.f32.mrb[6].mxu1 }
 0x1be   : > { %v5097_v54 = vpop.f32.mrb[7].mxu1 }
 0x1c3   : > { %v3759_v55 = vpop.f32.mrb[8].mxu1 }
 0x1c4   : > { %v1752_v60 = vpop.f32.mrb[9].mxu1 }
 0x1c5   : > { %v3760_v47 = vpop.f32.mrb[10].mxu1 }
 0x1c6   : > { %v1755_v33 = vpop.f32.mrb[11].mxu1 }
 0x1cb   : > { %v3763_v61 = vpop.f32.mrb[12].mxu1  ;;  %v3887_v53 = vpop.f32.mrb[8].mxu0 }
 0x1cc   : > { %v1768_v63 = vpop.f32.mrb[13].mxu1  ;;  %v3949_v29 = vadd.f32 %v3887_v53, %v3759_v55  ;;  %v2545_v3 = vpop.f32.mrb[9].mxu0 }
 0x1cd   : > { %v3764_v4 = vpop.f32.mrb[14].mxu1  ;;  %v3951_v6 = vadd.f32 %v2545_v3, %v1752_v60  ;;  %v3888_v9 = vpop.f32.mrb[10].mxu0 }
 0x1ce   : > { %v1771_v56 = vpop.f32.mrb[15].mxu1  ;;  %v3953_v45 = vadd.f32 %v3888_v9, %v3760_v47  ;;  %v2548_v58 = vpop.f32.mrb[11].mxu0 }
 0x1cf   : > { %v3955_v8 = vadd.f32 %v2548_v58, %v1755_v33 }
 0x1d3   : > { %v3919_v12 = vpop.f32.mrb[16].mxu1  ;;  %v3891_v15 = vpop.f32.mrb[12].mxu0 }
 0x1d4   : > { %v5099_v17 = vadd.f32 %v3949_v29, %v3919_v12  ;;  %v2729_v44 = vpop.f32.mrb[17].mxu1  ;;  %v3957_v62 = vadd.f32 %v3891_v15, %v3763_v61  ;;  %v2561_v38 = vpop.f32.mrb[13].mxu0 }
 0x1d5   : > { %v5101_v59 = vadd.f32 %v3951_v6, %v2729_v44  ;;  %v3920_v19 = vpop.f32.mrb[18].mxu1  ;;  %v3959_v18 = vadd.f32 %v2561_v38, %v1768_v63  ;;  %v3892_v0 = vpop.f32.mrb[14].mxu0 }
 0x1d6   : > { %2786 = vst [vmem:[%s4310_s16 + $0x50] sm:$0xff] %v5099_v17  ;;  %v5105_v22 = vadd.f32 %v3953_v45, %v3920_v19  ;;  %v2732_v24 = vpop.f32.mrb[19].mxu1  ;;  %v3961_v25 = vadd.f32 %v3892_v0, %v3764_v4  ;;  %v2564_v27 = vpop.f32.mrb[15].mxu0 }
 0x1d7   : > { %2784 = vst [vmem:[%s4310_s16 + $0x40] sm:$0xff] %v5101_v59  ;;  %v5109_v11 = vadd.f32 %v3955_v8, %v2732_v24  ;;  %v3963_v30 = vadd.f32 %v2564_v27, %v1771_v56 }
 0x1d8   : > { %2787 = vst [vmem:[%s4310_s16 + $0x58] sm:$0xff] %v5105_v22 }
 0x1d9   : > { %2785 = vst [vmem:[%s4310_s16 + $0x48] sm:$0xff] %v5109_v11 }
 0x1db   : > { %v3923_v42 = vpop.f32.mrb[20].mxu1  ;;  %v3911_v2 = vpop.f32.mrb[0].mxu0 }
 0x1dc   : > { %v5115_v32 = vadd.f32 %v3957_v62, %v3923_v42  ;;  %v2745_v34 = vpop.f32.mrb[21].mxu1  ;;  %v3941_v21 = vadd.f32 %v3911_v2, %v3751_v10  ;;  %v2697_v36 = vpop.f32.mrb[1].mxu0  ;;  %v2824_v62 = vmul.f32 %v5099_v17, %v5099_v17 }
 0x1dd   : > { %v5117_v13 = vadd.f32 %v3959_v18, %v2745_v34  ;;  %v3924_v26 = vpop.f32.mrb[22].mxu1  ;;  %v3942_v41 = vadd.f32 %v2697_v36, %v1720_v51  ;;  %v3912_v37 = vpop.f32.mrb[2].mxu0  ;;  %v2825_v18 = vmul.f32 %v5105_v22, %v5105_v22 }
 0x1de   : > { %2790 = vst [vmem:[%s4310_s16 + $0x70] sm:$0xff] %v5115_v32  ;;  %v5121_v7 = vadd.f32 %v3961_v25, %v3924_v26  ;;  %v2748_v57 = vpop.f32.mrb[23].mxu1  ;;  %2778 = vst [vmem:[%s4310_s16 + $0x10] sm:$0xff] %v3941_v21  ;;  %v3943_v28 = vadd.f32 %v3912_v37, %v3752_v52  ;;  %v2700_v50 = vpop.f32.mrb[3].mxu0  ;;  %v2816_v16 = vmul.f32 %v3941_v21, %v3941_v21 }
 0x1df   : > { %2788 = vst [vmem:[%s4310_s16 + $0x60] sm:$0xff] %v5117_v13  ;;  %v3964_v14 = vadd.f32 %v3963_v30, %v2748_v57  ;;  %2776 = vst [vmem:[%s4310_s16] sm:$0xff] %v3942_v41  ;;  %v3944_v35 = vadd.f32 %v2700_v50, %v1723_v43  ;;  %v2814_v39 = vmul.f32 %v3942_v41, %v3942_v41 }
 0x1e0   : > { %2791 = vst [vmem:[%s4310_s16 + $0x78] sm:$0xff] %v5121_v7  ;;  %2779 = vst [vmem:[%s4310_s16 + $0x18] sm:$0xff] %v3943_v28  ;;  %v2817_v51 = vmul.f32 %v3943_v28, %v3943_v28  ;;  %v2828_v2 = vmul.f32 %v5115_v32, %v5115_v32 }
 0x1e1   : > { %2789 = vst [vmem:[%s4310_s16 + $0x68] sm:$0xff] %v3964_v14  ;;  %2777 = vst [vmem:[%s4310_s16 + $0x8] sm:$0xff] %v3944_v35  ;;  %v2792_v23 = vadd.f32 %v3944_v35, %v3942_v41  ;;  %v2815_v46 = vmul.f32 %v3944_v35, %v3944_v35 }
 0x1e3   : > { %v2793_v31 = vadd.f32 %v3941_v21, %v2792_v23  ;;  %v2830_v1 = vadd.f32 %v2815_v46, %v2814_v39  ;;  %v3915_v48 = vpop.f32.mrb[4].mxu0 }
 0x1e4   : > { %v3945_v20 = vadd.f32 %v3915_v48, %v5091_v40  ;;  %v2713_v10 = vpop.f32.mrb[5].mxu0 }
 0x1e5   : > { %v2831_v52 = vadd.f32 %v2830_v1, %v2816_v16  ;;  %v3946_v43 = vadd.f32 %v2713_v10, %v5093_v5  ;;  %v2794_v55 = vadd.f32 %v3943_v28, %v2793_v31  ;;  %v3916_v60 = vpop.f32.mrb[6].mxu0 }
 0x1e6   : > { %2782 = vst [vmem:[%s4310_s16 + $0x30] sm:$0xff] %v3945_v20  ;;  %v3947_v47 = vadd.f32 %v3916_v60, %v5095_v49  ;;  %v2716_v33 = vpop.f32.mrb[7].mxu0  ;;  %v2820_v6 = vmul.f32 %v3945_v20, %v3945_v20  ;;  %v2822_v49 = vmul.f32 %v5101_v59, %v5101_v59 }
 0x1e7   : > { %2780 = vst [vmem:[%s4310_s16 + $0x20] sm:$0xff] %v3946_v43  ;;  %v2795_v61 = vadd.f32 %v3946_v43, %v2794_v55  ;;  %v2818_v53 = vmul.f32 %v3946_v43, %v3946_v43  ;;  %v2832_v63 = vadd.f32 %v2831_v52, %v2817_v51  ;;  %v3948_v29 = vadd.f32 %v2716_v33, %v5097_v54 }
 0x1e8   : > { %2783 = vst [vmem:[%s4310_s16 + $0x38] sm:$0xff] %v3947_v47  ;;  %v2821_v56 = vmul.f32 %v3947_v47, %v3947_v47  ;;  %v2823_v54 = vmul.f32 %v5109_v11, %v5109_v11 }
 0x1e9   : > { %v2833_v40 = vadd.f32 %v2832_v63, %v2818_v53  ;;  %2781 = vst [vmem:[%s4310_s16 + $0x28] sm:$0xff] %v3948_v29  ;;  %v2796_v3 = vadd.f32 %v3948_v29, %v2795_v61  ;;  %v2819_v4 = vmul.f32 %v3948_v29, %v3948_v29 }
 0x1eb   : > { %v2797_v9 = vadd.f32 %v3945_v20, %v2796_v3  ;;  %v2834_v5 = vadd.f32 %v2833_v40, %v2819_v4 }
 0x1ed   : > { %v2798_v45 = vadd.f32 %v3947_v47, %v2797_v9  ;;  %v2835_v58 = vadd.f32 %v2834_v5, %v2820_v6 }
 0x1ef   : > { %v2799_v8 = vadd.f32 %v5101_v59, %v2798_v45  ;;  %v2836_v12 = vadd.f32 %v2835_v58, %v2821_v56  ;;  %v2826_v59 = vmul.f32 %v5117_v13, %v5117_v13 }
 0x1f1   : > { %v2837_v15 = vadd.f32 %v2836_v12, %v2822_v49  ;;  %v2800_v44 = vadd.f32 %v5109_v11, %v2799_v8  ;;  %v2827_v11 = vmul.f32 %v3964_v14, %v3964_v14 }
 0x1f3   : > { %v2801_v38 = vadd.f32 %v5099_v17, %v2800_v44  ;;  %v2838_v19 = vadd.f32 %v2837_v15, %v2823_v54 }
 0x1f5   : > { %v2802_v0 = vadd.f32 %v5105_v22, %v2801_v38  ;;  %v2839_v24 = vadd.f32 %v2838_v19, %v2824_v62  ;;  %v2829_v22 = vmul.f32 %v5121_v7, %v5121_v7 }
 0x1f7   : > { %v2803_v25 = vadd.f32 %v5117_v13, %v2802_v0  ;;  %v2840_v27 = vadd.f32 %v2839_v24, %v2825_v18 }
 0x1f9   : > { %v2804_v30 = vadd.f32 %v3964_v14, %v2803_v25  ;;  %v2841_v42 = vadd.f32 %v2840_v27, %v2826_v59 }
 0x1fb   : > { %v2805_v17 = vadd.f32 %v5115_v32, %v2804_v30  ;;  %v2842_v34 = vadd.f32 %v2841_v42, %v2827_v11 }
 0x1fd   : > { %v2806_v21 = vadd.f32 %v5121_v7, %v2805_v17  ;;  %v2843_v36 = vadd.f32 %v2842_v34, %v2828_v2 }
 0x1ff   : > { %v2807_v26 = vrot.slane %v2806_v21, 4  ;;  %v2844_v13 = vadd.f32 %v2843_v36, %v2829_v22 }
 0x201   : > { %v2808_v41 = vadd.f32 %v2807_v26, %v2806_v21  ;;  %v2845_v37 = vrot.slane %v2844_v13, 4 }
 0x203   : > { %v2809_v57 = vrot.slane %v2808_v41, 2  ;;  %v2846_v28 = vadd.f32 %v2845_v37, %v2844_v13 }
 0x205   : > { %v2810_v50 = vadd.f32 %v2809_v57, %v2808_v41  ;;  %v2847_v14 = vrot.slane %v2846_v28, 2 }
 0x207   : > { %v2811_v35 = vrot.slane %v2810_v50, 1  ;;  %v2848_v39 = vadd.f32 %v2847_v14, %v2846_v28 }
 0x209   : > { %v2812_v32 = vadd.f32 %v2811_v35, %v2810_v50  ;;  %v2849_v23 = vrot.slane %v2848_v39, 1 }
 0x20b   : > { %2813 = vst [vmem:[%s260_s29] sm:$0x1] %v2812_v32  ;;  %v2850_v7 = vadd.f32 %v2849_v23, %v2848_v39 }
 0x20d   : > { %2851 = vst [vmem:[%s267_s9] sm:$0x1] %v2850_v7 }
 0x20e PF: > { %s17_s25 = sadd.s32 1, %s4225_s25   ;;  %s5195_s30 = sld [smem:[#allocation13_spill]] }
 0x20f   : > { %p14_p1 = scmp.ge.s32.totalorder %s17_s25, 6   ;;  %s5196_s12 = sld [smem:[#allocation14_spill]] }
 0x210   : > { %s5197_s21 = smov %s4217_s23  ;;  %s5198_s22 = smov %s4221_s24 }
 0x211   :  { %16 = sbr.rel (!%p14_p1) target bundleno = 3 (0x3), region = 378 }
 0x214   : > { %s5199_s23 = smov %s5195_s30 }
 0x215   : > { %s5200_s24 = smov %s5196_s12 }
 0x218   :  { %2924 = vsyncmov [#allocation3] }
 0x21b   :  { %s2925_s20 = vpop.sfrf %2924 }
 0x21c   :  { %p3484_p2 = scmp.ne.s32.totalorder %s2925_s20, 0 }
 0x21e   :  { %2929 = shalt.err (%p3484_p2)  }
 0x21f   :  { %2931 = vsyncmov [#allocation3 + $0x1] }
 0x222   :  { %s2932_s29 = vpop.sfrf %2931 }
 0x223   :  { %p3485_p3 = scmp.ne.s32.totalorder %s2932_s29, 0 }
 0x225   :  { %2936 = shalt.err (%p3485_p3)  }
 0x226   :  { %2938 = vsyncmov [#allocation3 + $0x2] }
 0x229   :  { %s2939_s9 = vpop.sfrf %2938 }
 0x22a   :  { %p3486_p4 = scmp.ne.s32.totalorder %s2939_s9, 0 }
 0x22c   :  { %2943 = shalt.err (%p3486_p4)  }
 0x22d   :  { %2945 = vsyncmov [#allocation3 + $0x3] }
 0x230   :  { %s2946_s15 = vpop.sfrf %2945 }
 0x231   :  { %p3487_p5 = scmp.ne.s32.totalorder %s2946_s15, 0 }
 0x233   :  { %2950 = shalt.err (%p3487_p5)  }
 0x234   :  { %2952 = vsyncmov [#allocation3 + $0x4] }
 0x237   :  { %s2953_s17 = vpop.sfrf %2952 }
 0x238   :  { %p3488_p6 = scmp.ne.s32.totalorder %s2953_s17, 0 }
 0x23a   :  { %2957 = shalt.err (%p3488_p6)  }
 0x23b   :  { %2959 = vsyncmov [#allocation3 + $0x5] }
 0x23e   :  { %s2960_s0 = vpop.sfrf %2959 }
 0x23f   :  { %p3489_p7 = scmp.ne.s32.totalorder %s2960_s0, 0 }
 0x241   :  { %2964 = shalt.err (%p3489_p7)  }

// kernel: resnet_block_forward.3
= control target key start
LH: loop header
LB: loop body
LE: loop exit
PB: predicated region body
PF: predicated region fallthrough
CT: control target
= control target key end

     0   :  { %s4092_s15 = smov 0   ;;  %s4094_s16 = smov 0   ;;  %s4895_s0 = inlined_call_operand.vmem [shape: f32[2,16,16,128], index: 0, kind: input, shape index: {}]   ;;  %s4896_s1 = inlined_call_operand.vmem [shape: bf16[9,128,128], index: 1, kind: input, shape index: {}]   ;;  %s4897_s2 = inlined_call_operand.vmem [shape: f32[2,16,16,128], index: 2, kind: output, shape index: {0}]   ;;  %s4898_s3 = inlined_call_operand.vmem [shape: f32[2,2,1,128], index: 3, kind: output, shape index: {1}]   ;;  %s4899_s4 = inlined_call_operand.vmem [shape: f32[2,2,1,128], index: 4, kind: output, shape index: {2}]  }
   0x1   :  { %s4096_s17 = smov 0   ;;  %s4098_s18 = smov 0  }
   0x2   :  { %s4100_s19 = smov 0  }
   0x3 LB: > { %s24_s20 = sadd.s32 1, %s4057_s17  ;;  %s27_s21 = sadd.s32 1, %s4061_s18  ;;  %s4065_s19 = sphi %s4100_s19, %s15_s19   ;;  %s4061_s18 = sphi %s4098_s18, %s4903_s18   ;;  %s4057_s17 = sphi %s4096_s17, %s4902_s17   ;;  %s4053_s16 = sphi %s4094_s16, %s4901_s16   ;;  %s4049_s15 = sphi %s4092_s15, %s4900_s15  }
   0x4   : > { %p25_p0 = scmp.ge.s32.totalorder %s24_s20, 2  ;;  %p3015_p1 = scmp.ge.s32.totalorder %s4065_s19, 1 }
   0x5   : > { %p151_p2 = scmp.lt.s32.totalorder %s4065_s19, 5 }
   0x6   : > { %s4905_s20 = smov (%p25_p0, %s24_s20), 0  ;;  %s4907_s21 = smov (!%p25_p0, %s27_s21), %s4061_s18 }
   0x7   : > { %p152_p3 = pnand %p3015_p1, %p151_p2  ;;  %p29_p4 = scmp.ge.s32.totalorder %s4907_s21, 2 }
   0x8   : > { %s4127_s22 = sshll.u32 (!%p152_p3), %s4049_s15, 3  ;;  %p190_p5 = scmp.lt.s32.totalorder (!%p152_p3), %s4053_s16, 1 }
   0x9   : > { %s4909_s21 = smov (%p29_p4, %s4907_s21), 0  ;;  %155 = sbr.rel (%p152_p3) target bundleno = 517 (0x205), region = 24 }
   0xa   : > { %p192_p6 = scmp.lt.s32.totalorder (!%p152_p3), %s4127_s22, 15  ;;  %p202_p7 = scmp.lt.s32.totalorder (!%p152_p3), %s4049_s15, 1 }
   0xb   : > { %p215_p8 = scmp.lt.s32.totalorder (!%p152_p3), %s4049_s15, 0  ;;  %s216_s29 = ssub.s32 (!%p152_p3), 0, %s4049_s15 }
   0xc   : > { %s3022_s5 = smin.u32 (!%p152_p3), %s4049_s15, %s216_s29  ;;  %p3023_p9 = scmp.ne.s32.totalorder (!%p152_p3), %s4049_s15, 0 }
   0xd   : > { %s218_s9 = sand.u32 (!%p152_p3), 1, %s3022_s5  }
   0xe   : > { %s219_s11 = ssub.s32 (!%p152_p3), 0, %s218_s9 }
  0x10   : > { %s191_s23 = scalar_select %p190_p5, %s4053_s16, 1 }
  0x11   : > { %s193_s24 = scalar_select %p192_p6, %s4127_s22, 15 }
  0x12   : > { %s3018_s25 = sshll.u32 %s191_s23, 5  ;;  %s3020_s26 = sshll.u32 %s191_s23, 1 }
  0x13   : > { %s3017_s27 = sshll.u32 %s193_s24, 1  ;;  %s4911_s11 = smov (!%p215_p8, %s219_s11), %s218_s9 }
  0x14   : > { %s196_s28 = sadd.s32 %s3018_s25, %s3017_s27  ;;  %224 = sbr.rel (%p3023_p9) target bundleno = 51 (0x33), region = 28 }
  0x15   : > { %s3019_s30 = sshll.u32 %s196_s28, 3  ;;  %p226_p10 = scmp.eq.s32.totalorder (!%p3023_p9), %s4127_s22, 0 }
  0x16   : > { %s4140_s8 = scalar_lea.vmem %s4897_s2, %s3019_s30  ;;  %s229_s28 = sadd.s32 (!%p3023_p9), 8, %s4127_s22 }
  0x17   : > { %s203_s10 = scalar_select %p202_p7, %s4049_s15, 1 }
  0x18   : > { %s4160_s29 = sshll.u32 (!%p3023_p9), %s4053_s16, 8  ;;  %p230_p11 = scmp.eq.s32.totalorder (!%p3023_p9), %s229_s28, 16 }
  0x19   : > { %s4143_s12 = sadd.s32 %s3020_s26, %s203_s10  ;;  %s3025_s26 = sadd.s32 (!%p3023_p9), 4294967295, %s4127_s22 }
  0x1a   : > { %s206_s23 = scalar_lea.vmem %s4898_s3, %s4143_s12  ;;  %s213_s27 = scalar_lea.vmem %s4899_s4, %s4143_s12 }
  0x1b   : > { %s4913_s26 = smov (%p226_p10, %s3025_s26), 1  ;;  %s2833_s30 = smul.u32 240, %s4911_s11 }
  0x1c   : > { %s3026_s5 = sshll.u32 %s4913_s26, 4  ;;  %s239_s6 = smul.u32 3, %s4911_s11 }
  0x1d   : > { %s4915_s28 = smov (%p230_p11, %s229_s28), 14  ;;  %s234_s7 = sadd.s32 %s4160_s29, %s3026_s5 }
  0x1e   : > { %s235_s13 = scalar_lea.vmem %s4895_s0, %s234_s7  ;;  %s4170_s14 = scalar_lea.vmem [#allocation2], %s2833_s30 }
  0x1f   : > { %v273_v0 = vld [vmem:[%s235_s13] sm:$0xff]  ;;  %v275_v1 = vld [vmem:[%s235_s13 + $0x8] sm:$0xff]  ;;  %s4174_s24 = scalar_lea.sflag [#allocation3], %s239_s6 }
  0x20   : > { %3028 = vst [vmem:[%s4170_s14 + $0x1] sm:$0xff] %v273_v0  ;;  %3029 = vst [vmem:[%s4170_s14 + $0x9] sm:$0xff] %v275_v1 }
  0x21   : > { %284 = vsyncadd %s4174_s24, 256  ;;  %s3330_s25 = sshll.u32 %s4049_s15, 7  ;;  %s2847_s26 = scalar_lea.sflag %s4174_s24, 1 [#allocation3] }
  0x22   : > { %s286_s30 = sadd.s32 %s3330_s25, %s4160_s29 }
  0x23   : > { %s4183_s9 = scalar_lea.vmem %s4895_s0, %s286_s30 }
  0x24   : > { %v338_v2 = vld [vmem:[%s4183_s9] sm:$0xff]  ;;  %v340_v3 = vld [vmem:[%s4183_s9 + $0x8] sm:$0xff]  ;;  %v342_v4 = vld [vmem:[%s4183_s9 + $0x10] sm:$0xff] }
  0x25   : > { %3032 = vst [vmem:[%s4170_s14 + $0x19] sm:$0xff] %v338_v2  ;;  %3033 = vst [vmem:[%s4170_s14 + $0x21] sm:$0xff] %v340_v3  ;;  %v344_v5 = vld [vmem:[%s4183_s9 + $0x18] sm:$0xff]  ;;  %v346_v6 = vld [vmem:[%s4183_s9 + $0x20] sm:$0xff] }
  0x26   : > { %3034 = vst [vmem:[%s4170_s14 + $0x31] sm:$0xff] %v342_v4  ;;  %v348_v7 = vld [vmem:[%s4183_s9 + $0x28] sm:$0xff]  ;;  %3035 = vst [vmem:[%s4170_s14 + $0x39] sm:$0xff] %v344_v5  ;;  %v350_v8 = vld [vmem:[%s4183_s9 + $0x30] sm:$0xff] }
  0x27   : > { %3036 = vst [vmem:[%s4170_s14 + $0x49] sm:$0xff] %v346_v6  ;;  %3037 = vst [vmem:[%s4170_s14 + $0x51] sm:$0xff] %v348_v7  ;;  %v352_v9 = vld [vmem:[%s4183_s9 + $0x38] sm:$0xff]  ;;  %v354_v10 = vld [vmem:[%s4183_s9 + $0x40] sm:$0xff] }
  0x28   : > { %3038 = vst [vmem:[%s4170_s14 + $0x61] sm:$0xff] %v350_v8  ;;  %3039 = vst [vmem:[%s4170_s14 + $0x69] sm:$0xff] %v352_v9  ;;  %v356_v11 = vld [vmem:[%s4183_s9 + $0x48] sm:$0xff]  ;;  %v358_v12 = vld [vmem:[%s4183_s9 + $0x50] sm:$0xff] }
  0x29   : > { %3040 = vst [vmem:[%s4170_s14 + $0x79] sm:$0xff] %v354_v10  ;;  %v360_v13 = vld [vmem:[%s4183_s9 + $0x58] sm:$0xff]  ;;  %3041 = vst [vmem:[%s4170_s14 + $0x81] sm:$0xff] %v356_v11  ;;  %v362_v14 = vld [vmem:[%s4183_s9 + $0x60] sm:$0xff] }
  0x2a   : > { %3042 = vst [vmem:[%s4170_s14 + $0x91] sm:$0xff] %v358_v12  ;;  %3043 = vst [vmem:[%s4170_s14 + $0x99] sm:$0xff] %v360_v13  ;;  %v364_v15 = vld [vmem:[%s4183_s9 + $0x68] sm:$0xff]  ;;  %v366_v16 = vld [vmem:[%s4183_s9 + $0x70] sm:$0xff] }
  0x2b   : > { %3044 = vst [vmem:[%s4170_s14 + $0xa9] sm:$0xff] %v362_v14  ;;  %3045 = vst [vmem:[%s4170_s14 + $0xb1] sm:$0xff] %v364_v15  ;;  %v368_v17 = vld [vmem:[%s4183_s9 + $0x78] sm:$0xff] }
  0x2c   : > { %3046 = vst [vmem:[%s4170_s14 + $0xc1] sm:$0xff] %v366_v16  ;;  %3047 = vst [vmem:[%s4170_s14 + $0xc9] sm:$0xff] %v368_v17 }
  0x2d   : > { %377 = vsyncadd %s2847_s26, 2048  ;;  %s3056_s6 = sshll.u32 %s4915_s28, 4  ;;  %s2857_s10 = scalar_lea.sflag %s4174_s24, 2 [#allocation3] }
  0x2e   : > { %s379_s13 = sadd.s32 %s3056_s6, %s4160_s29 }
  0x2f   : > { %s380_s5 = scalar_lea.vmem %s4895_s0, %s379_s13 }
  0x30   : > { %v417_v18 = vld [vmem:[%s380_s5] sm:$0xff]  ;;  %v419_v19 = vld [vmem:[%s380_s5 + $0x8] sm:$0xff] }
  0x31   : > { %3057 = vst [vmem:[%s4170_s14 + $0xd9] sm:$0xff] %v417_v18  ;;  %3058 = vst [vmem:[%s4170_s14 + $0xe1] sm:$0xff] %v419_v19 }
  0x32   : > { %428 = vsyncadd %s2857_s10, 256 }
  0x33 PF: > { %s429_s26 = smul.u32 3, %s4911_s11 }
  0x35   : > { %s430_s7 = scalar_lea.sflag [#allocation3], %s429_s26 }
  0x36   : > { %4041 = dma.done.wait %s430_s7, 256 }
  0x37   : > { %4042 = vsyncadd %s430_s7, 4294967040  ;;  %s2862_s9 = scalar_lea.sflag %s430_s7, 1 [#allocation3] }
  0x38   : > { %4043 = dma.done.wait %s2862_s9, 2048 }
  0x39   : > { %4044 = vsyncadd %s2862_s9, 4294965248  ;;  %s2865_s28 = scalar_lea.sflag %s430_s7, 2 [#allocation3] }
  0x3a   : > { %4045 = dma.done.wait %s2865_s28, 256 }
  0x3b   : > { %4046 = vsyncadd %s2865_s28, 4294967040  ;;  %s445_s29 = sadd.s32 1, %s4049_s15 }
  0x3c   : > { %p3060_p12 = scmp.ge.s32.totalorder %s445_s29, 2 }
  0x3d   : > { %s450_s14 = ssub.s32 (!%p3060_p12), 1, %s4911_s11  ;;  %s3332_s24 = sadd.s32 (!%p3060_p12), 8, %s4127_s22 }
  0x3e   : > { %449 = sbr.rel (%p3060_p12) target bundleno = 93 (0x5d), region = 134  ;;  %p452_p13 = scmp.eq.s32.totalorder (!%p3060_p12), %s3332_s24, 0 }
  0x3f   : > { %s3062_s6 = sadd.s32 (!%p3060_p12), 4294967295, %s3332_s24  ;;  %s455_s10 = sadd.s32 (!%p3060_p12), 8, %s3332_s24 }
  0x40   : > { %s4232_s13 = sshll.u32 (!%p3060_p12), %s4053_s16, 8  ;;  %p456_p0 = scmp.eq.s32.totalorder (!%p3060_p12), %s455_s10, 16 }
  0x41   : > { %s2870_s25 = smul.u32 (!%p3060_p12), 240, %s450_s14 }
  0x42   : > { %s465_s5 = smul.u32 (!%p3060_p12), 3, %s450_s14 }
  0x43   : > { %s4240_s22 = scalar_lea.vmem (!%p3060_p12), [#allocation2], %s2870_s25 }
  0x44   : > { %s4244_s16 = scalar_lea.sflag (!%p3060_p12), [#allocation3], %s465_s5 }
  0x45   : > { %s4917_s6 = smov (%p452_p13, %s3062_s6), 1  ;;  %s4919_s10 = smov (%p456_p0, %s455_s10), 14 }
  0x46   : > { %s3063_s30 = sshll.u32 %s4917_s6, 4 }
  0x47   : > { %s460_s26 = sadd.s32 %s4232_s13, %s3063_s30 }
  0x48   : > { %s461_s28 = scalar_lea.vmem %s4895_s0, %s460_s26 }
  0x49   : > { %v499_v20 = vld [vmem:[%s461_s28] sm:$0xff]  ;;  %v501_v21 = vld [vmem:[%s461_s28 + $0x8] sm:$0xff] }
  0x4a   : > { %3065 = vst [vmem:[%s4240_s22 + $0x1] sm:$0xff] %v499_v20  ;;  %3066 = vst [vmem:[%s4240_s22 + $0x9] sm:$0xff] %v501_v21 }
  0x4b   : > { %510 = vsyncadd %s4244_s16, 256  ;;  %s3068_s29 = sshll.u32 %s4049_s15, 7  ;;  %s2885_s14 = scalar_lea.sflag %s4244_s16, 1 [#allocation3] }
  0x4c   : > { %s2877_s24 = sadd.s32 %s3068_s29, %s4232_s13 }
  0x4d   : > { %s4253_s30 = scalar_lea.vmem %s4895_s0, %s2877_s24 }
  0x4e   : > { %v3070_v22 = vld [vmem:[%s4253_s30 + $0x80] sm:$0xff]  ;;  %v3072_v23 = vld [vmem:[%s4253_s30 + $0x88] sm:$0xff]  ;;  %v3074_v24 = vld [vmem:[%s4253_s30 + $0x90] sm:$0xff] }
  0x4f   : > { %3071 = vst [vmem:[%s4240_s22 + $0x19] sm:$0xff] %v3070_v22  ;;  %3073 = vst [vmem:[%s4240_s22 + $0x21] sm:$0xff] %v3072_v23  ;;  %v3076_v25 = vld [vmem:[%s4253_s30 + $0x98] sm:$0xff]  ;;  %v3078_v26 = vld [vmem:[%s4253_s30 + $0xa0] sm:$0xff] }
  0x50   : > { %3075 = vst [vmem:[%s4240_s22 + $0x31] sm:$0xff] %v3074_v24  ;;  %v3080_v27 = vld [vmem:[%s4253_s30 + $0xa8] sm:$0xff]  ;;  %3077 = vst [vmem:[%s4240_s22 + $0x39] sm:$0xff] %v3076_v25  ;;  %v3082_v28 = vld [vmem:[%s4253_s30 + $0xb0] sm:$0xff] }
  0x51   : > { %3079 = vst [vmem:[%s4240_s22 + $0x49] sm:$0xff] %v3078_v26  ;;  %3081 = vst [vmem:[%s4240_s22 + $0x51] sm:$0xff] %v3080_v27  ;;  %v3084_v29 = vld [vmem:[%s4253_s30 + $0xb8] sm:$0xff]  ;;  %v3086_v30 = vld [vmem:[%s4253_s30 + $0xc0] sm:$0xff] }
  0x52   : > { %3083 = vst [vmem:[%s4240_s22 + $0x61] sm:$0xff] %v3082_v28  ;;  %3085 = vst [vmem:[%s4240_s22 + $0x69] sm:$0xff] %v3084_v29  ;;  %v3088_v31 = vld [vmem:[%s4253_s30 + $0xc8] sm:$0xff]  ;;  %v3090_v32 = vld [vmem:[%s4253_s30 + $0xd0] sm:$0xff] }
  0x53   : > { %3087 = vst [vmem:[%s4240_s22 + $0x79] sm:$0xff] %v3086_v30  ;;  %v3092_v33 = vld [vmem:[%s4253_s30 + $0xd8] sm:$0xff]  ;;  %3089 = vst [vmem:[%s4240_s22 + $0x81] sm:$0xff] %v3088_v31  ;;  %v3094_v34 = vld [vmem:[%s4253_s30 + $0xe0] sm:$0xff] }
  0x54   : > { %3091 = vst [vmem:[%s4240_s22 + $0x91] sm:$0xff] %v3090_v32  ;;  %3093 = vst [vmem:[%s4240_s22 + $0x99] sm:$0xff] %v3092_v33  ;;  %v3096_v35 = vld [vmem:[%s4253_s30 + $0xe8] sm:$0xff]  ;;  %v3098_v36 = vld [vmem:[%s4253_s30 + $0xf0] sm:$0xff] }
  0x55   : > { %3095 = vst [vmem:[%s4240_s22 + $0xa9] sm:$0xff] %v3094_v34  ;;  %3097 = vst [vmem:[%s4240_s22 + $0xb1] sm:$0xff] %v3096_v35  ;;  %v3100_v37 = vld [vmem:[%s4253_s30 + $0xf8] sm:$0xff] }
  0x56   : > { %3099 = vst [vmem:[%s4240_s22 + $0xc1] sm:$0xff] %v3098_v36  ;;  %3101 = vst [vmem:[%s4240_s22 + $0xc9] sm:$0xff] %v3100_v37 }
  0x57   : > { %603 = vsyncadd %s2885_s14, 2048  ;;  %s3118_s15 = sshll.u32 %s4919_s10, 4  ;;  %s2895_s5 = scalar_lea.sflag %s4244_s16, 2 [#allocation3] }
  0x58   : > { %s605_s26 = sadd.s32 %s3118_s15, %s4232_s13 }
  0x59   : > { %s606_s28 = scalar_lea.vmem %s4895_s0, %s605_s26 }
  0x5a   : > { %v643_v38 = vld [vmem:[%s606_s28] sm:$0xff]  ;;  %v645_v39 = vld [vmem:[%s606_s28 + $0x8] sm:$0xff] }
  0x5b   : > { %3119 = vst [vmem:[%s4240_s22 + $0xd9] sm:$0xff] %v643_v38  ;;  %3120 = vst [vmem:[%s4240_s22 + $0xe1] sm:$0xff] %v645_v39 }
  0x5c   : > { %654 = vsyncadd %s2895_s5, 256 }
  0x5d PF: > { %v3949_v40 = vld [vmem:[%s4896_s1 + $0xc0] sm:$0xff]   ;;  %v3951_v42 = vld [vmem:[%s4896_s1 + $0xc8] sm:$0xff]   ;;  %v687_v44 = vlaneseq  ;;  %v3953_v45 = vld [vmem:[%s4896_s1 + $0xd0] sm:$0xff]   ;;  %s655_s26 = smul.u32 240, %s4911_s11  ;;  %vm1358_vm2 = vsmask.f32 7424 }
  0x5e   : > { %v3950_v41 = vld [vmem:[%s4896_s1 + $0x100] sm:$0xff]   ;;  %3477 = vmatprep.subr.bf16.mxu1 %v3949_v40  ;;  %v3952_v43 = vld [vmem:[%s4896_s1 + $0x108] sm:$0xff]   ;;  %v3954_v46 = vld [vmem:[%s4896_s1 + $0x110] sm:$0xff]   ;;  %vm2039_vm3 = vcmask 1046528  }
  0x5f   : > { %3605 = vmatprep.subr.bf16.mxu0 %v3950_v41  ;;  %3478 = vmatpush3.bf16.msra.mxu1 %v3949_v40  ;;  %v4316_v47 = vshrl.u32 %v687_v44, 7  ;;  %v3955_v48 = vld [vmem:[%s4896_s1 + $0xd8] sm:$0xff]   ;;  %v3957_v51 = vld [vmem:[%s4896_s1 + $0xe0] sm:$0xff]   ;;  %v3959_v55 = vld [vmem:[%s4896_s1 + $0xe8] sm:$0xff]   ;;  %s4345_s25 = scalar_lea.vmem [#allocation2], %s655_s26 }
  0x60   : > { %3606 = vmatpush3.bf16.msra.mxu0 %v3950_v41  ;;  %3479 = vmatprep.subr.bf16.mxu1 %v3951_v42  ;;  %v3956_v49 = vld [vmem:[%s4896_s1 + $0x118] sm:$0xff]   ;;  %v3958_v53 = vld [vmem:[%s4896_s1 + $0x120] sm:$0xff]   ;;  %v3960_v56 = vld [vmem:[%s4896_s1 + $0x128] sm:$0xff]  }
  0x61   : > { %3607 = vmatprep.subr.bf16.mxu0 %v3952_v43  ;;  %v4325_v50 = vsub.s32 2, %v4316_v47  ;;  %v4331_v52 = vadd.s32 16, %v4316_v47  ;;  %v4337_v54 = vsub.s32 7, %v4316_v47  ;;  %vm691_vm0 = vcmp.eq.s32.totalorder %v4316_v47, 0  ;;  %v3961_v3 = vld [vmem:[%s4896_s1 + $0xf0] sm:$0xff]   ;;  %v3963_v12 = vld [vmem:[%s4896_s1 + $0xf8] sm:$0xff]  }
  0x62   : > { %v660_v57 = vld [vmem:[%s4345_s25 + $0x18] sm:$0xff]  ;;  %v661_v58 = vld [vmem:[%s4345_s25 + $0x20] sm:$0xff]  ;;  %v662_v59 = vld [vmem:[%s4345_s25 + $0x28] sm:$0x3] }
  0x63   : > { %3480 = vmatpush3.bf16.msra.mxu1 %v3951_v42  ;;  %vm766_vm1 = vcmp.eq.s32.totalorder %v4331_v52, 17  ;;  %v701_v60 = vrot.slane %v660_v57, %v4325_v50  ;;  %v774_v61 = vrot.slane %v661_v58, %v4337_v54  ;;  %v663_v62 = vld [vmem:[%s4345_s25 + $0x30] sm:$0xff]  ;;  %v664_v63 = vld [vmem:[%s4345_s25 + $0x38] sm:$0xff]  ;;  %v665_v1 = vld [vmem:[%s4345_s25 + $0x40] sm:$0x3] }
  0x64   : > { %3608 = vmatpush3.bf16.msra.mxu0 %v3952_v43  ;;  %3481 = vmatprep.subr.bf16.mxu1 %v3953_v45  ;;  %v705_v0 = vrot.slane %v663_v62, %v4325_v50  ;;  %v778_v2 = vrot.slane %v664_v63, %v4337_v54  ;;  %v3962_v6 = vld [vmem:[%s4896_s1 + $0x130] sm:$0xff]   ;;  %v666_v16 = vld [vmem:[%s4345_s25 + $0x48] sm:$0xff]  ;;  %v668_v22 = vld [vmem:[%s4345_s25 + $0x58] sm:$0x3] }
  0x65   : > { %3609 = vmatprep.subr.bf16.mxu0 %v3954_v46  ;;  %v737_v4 = vsel %vm691_vm0, %v701_v60, %v660_v57  ;;  %v812_v5 = vsel %vm766_vm1, %v774_v61, %v662_v59  ;;  %v667_v17 = vld [vmem:[%s4345_s25 + $0x50] sm:$0xff]  ;;  %v709_v21 = vrot.slane %v666_v16, %v4325_v50  ;;  %v669_v23 = vld [vmem:[%s4345_s25 + $0x60] sm:$0xff]  ;;  %v670_v24 = vld [vmem:[%s4345_s25 + $0x68] sm:$0xff] }
  0x66   : > { %v4369_v7 = vpack.c.bf16 %v661_v58, %v737_v4  ;;  %v4371_v8 = vpack.c.bf16 %v812_v5, %v812_v5  ;;  %v740_v9 = vsel %vm691_vm0, %v705_v0, %v663_v62  ;;  %v815_v11 = vsel %vm766_vm1, %v778_v2, %v665_v1  ;;  %v3964_v29 = vld [vmem:[%s4896_s1 + $0x138] sm:$0xff]   ;;  %v671_v33 = vld [vmem:[%s4345_s25 + $0x70] sm:$0x3]  ;;  %v673_v58 = vld [vmem:[%s4345_s25 + $0x80] sm:$0xff] }
  0x67   : > { %3482 = vmatpush3.bf16.msra.mxu1 %v3953_v45  ;;  %v4375_v10 = vpack.c.bf16 %v664_v63, %v740_v9  ;;  %v4388_v18 = vpack.c.bf16 %v815_v11, %v815_v11  ;;  %v782_v27 = vrot.slane %v667_v17, %v4337_v54  ;;  %v713_v28 = vrot.slane %v669_v23, %v4325_v50  ;;  %v3965_v39 = vld [vmem:[%s4896_s1] sm:$0xff]   ;;  %v674_v59 = vld [vmem:[%s4345_s25 + $0x88] sm:$0x3]  ;;  %v676_v1 = vld [vmem:[%s4345_s25 + $0x98] sm:$0xff] }
  0x68   : > { %3610 = vmatpush3.bf16.msra.mxu0 %v3954_v46  ;;  %3483 = vmatprep.subr.bf16.mxu1 %v3955_v48  ;;  %v1372_v13 = vshrl.u32 %v4369_v7, 16  ;;  %v1374_v14 = vshll.u32 %v4369_v7, 16  ;;  %v1379_v15 = vshll.u32 %v4371_v8, 16  ;;  %v743_v32 = vsel %vm691_vm0, %v709_v21, %v666_v16  ;;  %v3966_v45 = vld [vmem:[%s4896_s1 + $0x1c0] sm:$0xff]   ;;  %v3967_v9 = vld [vmem:[%s4896_s1 + $0x8] sm:$0xff]   ;;  %v3986_v47 = vld [vmem:[%s4896_s1 + $0x90] sm:$0xff]  }
  0x69   : > { %3611 = vmatprep.subr.bf16.mxu0 %v3956_v49  ;;  %3493 = vmatprep.mubr.bf16.mxu1 %v4369_v7  ;;  %v1384_v19 = vshrl.u32 %v4375_v10, 16  ;;  %v1386_v20 = vshll.u32 %v4375_v10, 16  ;;  %v1391_v31 = vshll.u32 %v4388_v18, 16  ;;  %v786_v34 = vrot.slane %v670_v24, %v4337_v54  ;;  %v675_v60 = vld [vmem:[%s4345_s25 + $0x90] sm:$0xff]  ;;  %v677_v5 = vld [vmem:[%s4345_s25 + $0xa0] sm:$0x3] }
  0x6a   : > { %v1376_v25 = vrot.slane %v1374_v14, 1  ;;  %v1381_v26 = vrot.slane %v1379_v15, 1  ;;  %v4406_v36 = vpack.c.bf16 %v667_v17, %v743_v32  ;;  %v818_v37 = vsel %vm766_vm1, %v782_v27, %v668_v22  ;;  %v3968_v15 = vld [vmem:[%s4896_s1 + $0x1c8] sm:$0xff]   ;;  %v3987_v52 = vld [vmem:[%s4896_s1 + $0x198] sm:$0xff]  }
  0x6b   : > { %3484 = vmatpush3.bf16.msra.mxu1 %v3955_v48  ;;  %v1388_v30 = vrot.slane %v1386_v20, 1  ;;  %v746_v38 = vsel %vm691_vm0, %v713_v28, %v669_v23  ;;  %v1393_v41 = vrot.slane %v1391_v31, 1  ;;  %v4415_v42 = vpack.c.bf16 %v818_v37, %v818_v37  ;;  %v678_v28 = vld [vmem:[%s4345_s25 + $0xa8] sm:$0xff]  ;;  %v3969_v31 = vld [vmem:[%s4896_s1 + $0x10] sm:$0xff]   ;;  %v680_v37 = vld [vmem:[%s4345_s25 + $0xb8] sm:$0x3] }
  0x6c   : > { %3612 = vmatpush3.bf16.msra.mxu0 %v3956_v49  ;;  %3485 = vmatprep.subr.bf16.mxu1 %v3957_v51  ;;  %v1377_v35 = vor.u32 %v1376_v25, %v1372_v13  ;;  %v4417_v43 = vpack.c.bf16 %v670_v24, %v746_v38  ;;  %v1396_v46 = vshrl.u32 %v4406_v36, 16  ;;  %v1398_v48 = vshll.u32 %v4406_v36, 16  ;;  %v682_v38 = vld [vmem:[%s4345_s25 + $0xc8] sm:$0xff] }
  0x6d   : > { %3613 = vmatprep.subr.bf16.mxu0 %v3958_v53  ;;  %v1389_v40 = vor.u32 %v1388_v30, %v1384_v19  ;;  %v821_v49 = vsel %vm766_vm1, %v786_v34, %v671_v33  ;;  %v790_v0 = vrot.slane %v673_v58, %v4337_v54  ;;  %v721_v4 = vrot.slane %v675_v60, %v4325_v50  ;;  %v681_v30 = vld [vmem:[%s4345_s25 + $0xc0] sm:$0xff] }
  0x6e   : > { %v4420_v44 = vsel %vm1358_vm2, %v1377_v35, %v1381_v26  ;;  %v1408_v57 = vshrl.u32 %v4417_v43, 16  ;;  %v1400_v61 = vrot.slane %v1398_v48, 1  ;;  %v1410_v62 = vshll.u32 %v4417_v43, 16  ;;  %v3971_v48 = vld [vmem:[%s4896_s1 + $0x18] sm:$0xff]  }
  0x6f   : > { %3486 = vmatpush3.bf16.msra.mxu1 %v3957_v51  ;;  %v672_v51 = vld [vmem:[%s4345_s25 + $0x78] sm:$0xff]  ;;  %3621 = vmatprep.mubr.bf16.mxu0 %v4420_v44  ;;  %v752_v19 = vsel %vm691_vm0, %v721_v4, %v675_v60  ;;  %v725_v35 = vrot.slane %v678_v28, %v4325_v50  ;;  %v2044_v4 = vrot.slane %v4371_v8, 1 }
  0x70   : > { %3614 = vmatpush3.bf16.msra.mxu0 %v3958_v53  ;;  %3487 = vmatprep.subr.bf16.mxu1 %v3959_v55  ;;  %v4432_v53 = vsel %vm1358_vm2, %v1389_v40, %v1393_v41  ;;  %v717_v63 = vrot.slane %v672_v51, %v4325_v50  ;;  %v1401_v11 = vor.u32 %v1400_v61, %v1396_v46  ;;  %v1412_v13 = vrot.slane %v1410_v62, 1  ;;  %v683_v61 = vld [vmem:[%s4345_s25 + $0xd0] sm:$0x3] }
  0x71   : > { %3615 = vmatprep.subr.bf16.mxu0 %v3960_v56  ;;  %v4469_v22 = vpack.c.bf16 %v676_v1, %v752_v19 }
  0x72   : > { %v749_v14 = vsel %vm691_vm0, %v717_v63, %v672_v51  ;;  %v1413_v32 = vor.u32 %v1412_v13, %v1408_v57  ;;  %v755_v51 = vsel %vm691_vm0, %v725_v35, %v678_v28  ;;  %v802_v57 = vrot.slane %v682_v38, %v4337_v54 }
  0x73   : > { %3488 = vmatpush3.bf16.msra.mxu1 %v3959_v55  ;;  %v1403_v55 = vshll.u32 %v4415_v42, 16  ;;  %v4459_v16 = vpack.c.bf16 %v673_v58, %v749_v14  ;;  %v1432_v33 = vshrl.u32 %v4469_v22, 16  ;;  %v1434_v34 = vshll.u32 %v4469_v22, 16 }
  0x74   : > { %3616 = vmatpush3.bf16.msra.mxu0 %v3960_v56  ;;  %3489 = vmatprep.subr.bf16.mxu1 %v3961_v3  ;;  %v4435_v56 = vpack.c.bf16 %v821_v49, %v821_v49 }
  0x75   : > { %3617 = vmatprep.subr.bf16.mxu0 %v3962_v6  ;;  %v1405_v2 = vrot.slane %v1403_v55, 1  ;;  %v1420_v24 = vshrl.u32 %v4459_v16, 16  ;;  %v1422_v25 = vshll.u32 %v4459_v16, 16  ;;  %v1436_v49 = vrot.slane %v1434_v34, 1  ;;  %v3976_v34 = vld [vmem:[%s4896_s1 + $0x1e8] sm:$0xff]  }
  0x76   : > { %v729_v55 = vrot.slane %v681_v30, %v4325_v50 }
  0x77   : > { %3490 = vmatpush3.bf16.msra.mxu1 %v3961_v3  ;;  %v1415_v3 = vshll.u32 %v4435_v56, 16  ;;  %v4467_v20 = vsel %vm1358_vm2, %v1401_v11, %v1405_v2  ;;  %v1424_v40 = vrot.slane %v1422_v25, 1  ;;  %v1437_v14 = vor.u32 %v1436_v49, %v1432_v33  ;;  %v3979_v49 = vld [vmem:[%s4896_s1 + $0x38] sm:$0xff]  }
  0x78   : > { %3618 = vmatpush3.bf16.msra.mxu0 %v3962_v6  ;;  %3491 = vmatprep.subr.bf16.mxu1 %v3963_v12  ;;  %v794_v6 = vrot.slane %v676_v1, %v4337_v54  ;;  %v3972_v1 = vld [vmem:[%s4896_s1 + $0x1d8] sm:$0xff]   ;;  %v2043_v25 = vrot.slane %v4369_v7, 1 }
  0x79   : > { %3619 = vmatprep.subr.bf16.mxu0 %v3964_v29  ;;  %v1417_v21 = vrot.slane %v1415_v3, 1  ;;  %v1425_v58 = vor.u32 %v1424_v40, %v1420_v24  ;;  %v657_v24 = vld [vmem:[%s4345_s25] sm:$0xff] }
  0x7a   : > { %v827_v23 = vsel %vm766_vm1, %v794_v6, %v677_v5  ;;  %v833_v5 = vsel %vm766_vm1, %v802_v57, %v683_v61  ;;  %v4554_v33 = vsel %vm2039_vm3, %v2043_v25, %v2044_v4  ;;  %v697_v35 = vrot.slane %v657_v24, %v4325_v50  ;;  %v659_v61 = vld [vmem:[%s4345_s25 + $0x10] sm:$0x3]  ;;  %v3983_v4 = vld [vmem:[%s4896_s1 + $0x188] sm:$0xff]  }
  0x7b   : > { %3492 = vmatpush3.bf16.msra.mxu1 %v3963_v12  ;;  %v824_v12 = vsel %vm766_vm1, %v790_v0, %v674_v59  ;;  %v4477_v27 = vpack.c.bf16 %v827_v23, %v827_v23  ;;  %v4510_v62 = vsel %vm1358_vm2, %v1413_v32, %v1417_v21  ;;  %v758_v0 = vsel %vm691_vm0, %v729_v55, %v681_v30  ;;  %v3974_v21 = vld [vmem:[%s4896_s1 + $0x1e0] sm:$0xff]   ;;  %v3975_v23 = vld [vmem:[%s4896_s1 + $0x28] sm:$0xff]   ;;  %v3980_v55 = vld [vmem:[%s4896_s1 + $0x1f8] sm:$0xff]  }
  0x7c   : > { %3620 = vmatpush3.bf16.msra.mxu0 %v3964_v29  ;;  %3509 = vmatprep.subr.bf16.mxu1 %v3965_v39  ;;  %v4461_v17 = vpack.c.bf16 %v824_v12, %v824_v12  ;;  %v679_v29 = vld [vmem:[%s4345_s25 + $0xb0] sm:$0xff]  ;;  %v4520_v3 = vpack.c.bf16 %v682_v38, %v758_v0  ;;  %v684_v0 = vld [vmem:[%s4345_s25 + $0xd8] sm:$0xff] }
  0x7d   : > { %3637 = vmatprep.subr.bf16.mxu0 %v3966_v45  ;;  %v798_v46 = vrot.slane %v679_v29, %v4337_v54  ;;  %v4504_v59 = vpack.c.bf16 %v679_v29, %v755_v51  ;;  %v3977_v38 = vld [vmem:[%s4896_s1 + $0x30] sm:$0xff]  }
  0x7e   : > { %3494 = vmatmul.mubr.bf16.vlgmr.msra.gmra.mrb[0].mxu1 %v4375_v10  ;;  %v1427_v26 = vshll.u32 %v4461_v17, 16  ;;  %v1644_v19 = vshll.u32 %v4520_v3, 16  ;;  %v1642_v29 = vshrl.u32 %v4520_v3, 16 }
  0x7f   : > { %3622 = vmatmul.mubr.bf16.vlgmr.msra.gmra.mrb[0].mxu0 %v4432_v53  ;;  %3510 = vmatpush3.bf16.msra.mxu1 %v3965_v39  ;;  %v3970_v39 = vld [vmem:[%s4896_s1 + $0x1d0] sm:$0xff]   ;;  %v830_v60 = vsel %vm766_vm1, %v798_v46, %v680_v37  ;;  %v1446_v2 = vshll.u32 %v4504_v59, 16  ;;  %v1444_v11 = vshrl.u32 %v4504_v59, 16  ;;  %v734_v46 = vsel %vm691_vm0, %v697_v35, %v657_v24  ;;  %v3989_v35 = vld [vmem:[%s4896_s1 + $0x1a0] sm:$0xff]  }
  0x80   : > { %3638 = vmatpush3.bf16.msra.mxu0 %v3966_v45  ;;  %3511 = vmatprep.subr.bf16.mxu1 %v3967_v9  ;;  %v1429_v41 = vrot.slane %v1427_v26, 1  ;;  %v1439_v45 = vshll.u32 %v4477_v27, 16  ;;  %v4512_v63 = vpack.c.bf16 %v830_v60, %v830_v60  ;;  %v3982_v60 = vld [vmem:[%s4896_s1 + $0x80] sm:$0xff]  }
  0x81   : > { %3639 = vmatprep.subr.bf16.mxu0 %v3968_v15  ;;  %3497 = vmatprep.mubr.bf16.mxu1 %v4406_v36  ;;  %v1448_v13 = vrot.slane %v1446_v2, 1  ;;  %v685_v2 = vld [vmem:[%s4345_s25 + $0xe0] sm:$0xff] }
  0x82   : > { %3625 = vmatprep.mubr.bf16.mxu0 %v4467_v20  ;;  %v4528_v6 = vsel %vm1358_vm2, %v1425_v58, %v1429_v41  ;;  %v1451_v8 = vshll.u32 %v4512_v63, 16  ;;  %v1441_v12 = vrot.slane %v1439_v45, 1  ;;  %v3978_v41 = vld [vmem:[%s4896_s1 + $0x1f0] sm:$0xff]   ;;  %v658_v45 = vld [vmem:[%s4345_s25 + $0x8] sm:$0xff]  ;;  %v3981_v58 = vld [vmem:[%s4896_s1 + $0x180] sm:$0xff]  }
  0x83   : > { %3512 = vmatpush3.bf16.msra.mxu1 %v3967_v9  ;;  %v3973_v9 = vld [vmem:[%s4896_s1 + $0x20] sm:$0xff]   ;;  %v1449_v26 = vor.u32 %v1448_v13, %v1444_v11  ;;  %v770_v51 = vrot.slane %v658_v45, %v4337_v54  ;;  %v4586_v57 = vpack.c.bf16 %v658_v45, %v734_v46  ;;  %v686_v11 = vld [vmem:[%s4345_s25 + $0xe8] sm:$0x3]  ;;  %v806_v13 = vrot.slane %v685_v2, %v4337_v54  ;;  %v3985_v54 = vld [vmem:[%s4896_s1 + $0x190] sm:$0xff]  }
  0x84   : > { %3640 = vmatpush3.bf16.msra.mxu0 %v3968_v15  ;;  %3513 = vmatprep.subr.bf16.mxu1 %v3969_v31  ;;  %v4535_v15 = vpack.c.bf16 %v833_v5, %v833_v5  ;;  %v1453_v28 = vrot.slane %v1451_v8, 1  ;;  %v4550_v30 = vsel %vm1358_vm2, %v1437_v14, %v1441_v12  ;;  %v3984_v5 = vld [vmem:[%s4896_s1 + $0x88] sm:$0xff]  }
  0x85   : > { %3641 = vmatprep.subr.bf16.mxu0 %v3970_v39  ;;  %v1360_v14 = vshrl.u32 %v4586_v57, 16  ;;  %v1362_v12 = vshll.u32 %v4586_v57, 16 }
  0x86   : > { %3498 = vmatmul.mubr.bf16.gmra.mrb[4].mxu1 %v4417_v43  ;;  %v1649_v32 = vshll.u32 %v4535_v15, 16  ;;  %v4563_v37 = vsel %vm1358_vm2, %v1449_v26, %v1453_v28 }
  0x87   : > { %3626 = vmatmul.mubr.bf16.gmra.mrb[4].mxu0 %v4510_v62  ;;  %3514 = vmatpush3.bf16.msra.mxu1 %v3969_v31  ;;  %v1646_v31 = vrot.slane %v1644_v19, 1 }
  0x88   : > { %3642 = vmatpush3.bf16.msra.mxu0 %v3970_v39  ;;  %3515 = vmatprep.subr.bf16.mxu1 %v3971_v48  ;;  %v1651_v40 = vrot.slane %v1649_v32, 1 }
  0x89   : > { %3643 = vmatprep.subr.bf16.mxu0 %v3972_v1  ;;  %3501 = vmatprep.mubr.bf16.mxu1 %v4459_v16  ;;  %v1647_v39 = vor.u32 %v1646_v31, %v1642_v29  ;;  %v3988_v31 = vld [vmem:[%s4896_s1 + $0x98] sm:$0xff]  }
  0x8a   : > { %3629 = vmatprep.mubr.bf16.mxu0 %v4528_v6 }
  0x8b   : > { %3516 = vmatpush3.bf16.msra.mxu1 %v3971_v48  ;;  %v4577_v48 = vsel %vm1358_vm2, %v1647_v39, %v1651_v40  ;;  %v3990_v39 = vld [vmem:[%s4896_s1 + $0xa0] sm:$0xff]   ;;  %v3991_v40 = vld [vmem:[%s4896_s1 + $0x1a8] sm:$0xff]  }
  0x8c   : > { %3644 = vmatpush3.bf16.msra.mxu0 %v3972_v1  ;;  %3517 = vmatprep.subr.bf16.mxu1 %v3973_v9  ;;  %v809_v1 = vsel %vm766_vm1, %v770_v51, %v659_v61  ;;  %v3993_v51 = vld [vmem:[%s4896_s1 + $0x1b0] sm:$0xff]   ;;  %v2040_v61 = vrot.slane %v4586_v57, 1 }
  0x8d   : > { %3645 = vmatprep.subr.bf16.mxu0 %v3974_v21  ;;  %v4612_v8 = vpack.c.bf16 %v809_v1, %v809_v1 }
  0x8e   : > { %3502 = vmatmul.mubr.bf16.gmra.mrb[8].mxu1 %v4469_v22 }
  0x8f   : > { %3630 = vmatmul.mubr.bf16.gmra.mrb[8].mxu0 %v4550_v30  ;;  %3518 = vmatpush3.bf16.msra.mxu1 %v3973_v9  ;;  %v733_v9 = vrot.slane %v684_v0, %v4325_v50  ;;  %v1367_v19 = vshll.u32 %v4612_v8, 16 }
  0x90   : > { %3646 = vmatpush3.bf16.msra.mxu0 %v3974_v21  ;;  %3519 = vmatprep.subr.bf16.mxu1 %v3975_v23  ;;  %v1364_v21 = vrot.slane %v1362_v12, 1  ;;  %v2050_v12 = vrot.slane %v4415_v42, 1  ;;  %v4003_v42 = vld [vmem:[%s4896_s1 + $0x58] sm:$0xff]  }
  0x91   : > { %3647 = vmatprep.subr.bf16.mxu0 %v3976_v34  ;;  %3505 = vmatprep.mubr.bf16.mxu1 %v4504_v59  ;;  %v761_v50 = vsel %vm691_vm0, %v733_v9, %v684_v0  ;;  %v2041_v0 = vrot.slane %v4612_v8, 1  ;;  %v2046_v9 = vrot.slane %v4375_v10, 1  ;;  %v4000_v8 = vld [vmem:[%s4896_s1 + $0x148] sm:$0xff]  }
  0x92   : > { %3633 = vmatprep.mubr.bf16.mxu0 %v4563_v37  ;;  %v4631_v24 = vpack.c.bf16 %v685_v2, %v761_v50  ;;  %v1365_v25 = vor.u32 %v1364_v21, %v1360_v14  ;;  %v3995_v2 = vld [vmem:[%s4896_s1 + $0x1b8] sm:$0xff]   ;;  %v2049_v14 = vrot.slane %v4406_v36, 1  ;;  %v4002_v50 = vld [vmem:[%s4896_s1 + $0x150] sm:$0xff]   ;;  %v2055_v21 = vrot.slane %v4459_v16, 1 }
  0x93   : > { %3520 = vmatpush3.bf16.msra.mxu1 %v3975_v23  ;;  %v1369_v23 = vrot.slane %v1367_v19, 1  ;;  %v2052_v19 = vrot.slane %v4417_v43, 1 }
  0x94   : > { %3648 = vmatpush3.bf16.msra.mxu0 %v3976_v34  ;;  %3521 = vmatprep.subr.bf16.mxu1 %v3977_v38  ;;  %v2436_v29 = vrot.slane %v4631_v24, 1 }
  0x95   : > { %3649 = vmatprep.subr.bf16.mxu0 %v3978_v41  ;;  %v4637_v28 = vsel %vm1358_vm2, %v1365_v25, %v1369_v23  ;;  %v4006_v23 = vld [vmem:[%s4896_s1 + $0x160] sm:$0xff]   ;;  %v2058_v25 = vrot.slane %v4469_v22, 1 }
  0x96   : > { %3506 = vmatmul.mubr.bf16.gmra.mrb[12].mxu1 %v4520_v3 }
  0x97   : > { %3634 = vmatmul.mubr.bf16.gmra.mrb[12].mxu0 %v4577_v48  ;;  %3522 = vmatpush3.bf16.msra.mxu1 %v3977_v38  ;;  %v1835_v38 = vshll.u32 %v4631_v24, 16 }
  0x98   : > { %3650 = vmatpush3.bf16.msra.mxu0 %v3978_v41  ;;  %3523 = vmatprep.subr.bf16.mxu1 %v3979_v49  ;;  %v1833_v41 = vshrl.u32 %v4631_v24, 16 }
  0x99   : > { %3651 = vmatprep.subr.bf16.mxu0 %v3980_v55  ;;  %3525 = vmatprep.mubr.bf16.mxu1 %v4586_v57  ;;  %v1837_v45 = vrot.slane %v1835_v38, 1  ;;  %v3997_v57 = vld [vmem:[%s4896_s1 + $0x40] sm:$0xff]  }
  0x9a   : > { %3653 = vmatprep.mubr.bf16.mxu0 %v4432_v53  ;;  %v4013_v38 = vld [vmem:[%s4896_s1 + $0x200] sm:$0xff]  }
  0x9b   : > { %3524 = vmatpush3.bf16.msra.mxu1 %v3979_v49  ;;  %v3992_v49 = vld [vmem:[%s4896_s1 + $0xa8] sm:$0xff]  }
  0x9c   : > { %3652 = vmatpush3.bf16.msra.mxu0 %v3980_v55  ;;  %3541 = vmatprep.subr.bf16.mxu1 %v3981_v58  ;;  %v1838_v55 = vor.u32 %v1837_v45, %v1833_v41 }
  0x9d   : > { %3669 = vmatprep.subr.bf16.mxu0 %v3982_v60 }
  0x9e   : > { %3526 = vmatmul.mubr.bf16.vlgmr.msra.gmra.mrb[0].mxu1 %v4369_v7  ;;  %v836_v7 = vsel %vm766_vm1, %v806_v13, %v686_v11  ;;  %v2047_v11 = vrot.slane %v4388_v18, 1  ;;  %v3999_v13 = vld [vmem:[%s4896_s1 + $0x48] sm:$0xff]   ;;  %v4001_v18 = vld [vmem:[%s4896_s1 + $0x50] sm:$0xff]  }
  0x9f   : > { %3654 = vmatmul.mubr.bf16.vlgmr.msra.gmra.mrb[0].mxu0 %v4467_v20  ;;  %3542 = vmatpush3.bf16.msra.mxu1 %v3981_v58  ;;  %v856_v26 = vpack.c.bf16 %v836_v7, %v836_v7  ;;  %v4004_v7 = vld [vmem:[%s4896_s1 + $0x158] sm:$0xff]  }
  0xa0   : > { %3670 = vmatpush3.bf16.msra.mxu0 %v3982_v60  ;;  %3543 = vmatprep.subr.bf16.mxu1 %v3983_v4  ;;  %v3994_v60 = vld [vmem:[%s4896_s1 + $0xb0] sm:$0xff]  }
  0xa1   : > { %3671 = vmatprep.subr.bf16.mxu0 %v3984_v5  ;;  %3529 = vmatprep.mubr.bf16.mxu1 %v4375_v10  ;;  %v2437_v32 = vrot.slane %v856_v26, 1  ;;  %v1840_v46 = vshll.u32 %v856_v26, 16  ;;  %v2059_v26 = vrot.slane %v4477_v27, 1  ;;  %v4009_v27 = vld [vmem:[%s4896_s1 + $0x70] sm:$0xff]  }
  0xa2   : > { %3657 = vmatprep.mubr.bf16.mxu0 %v4510_v62 }
  0xa3   : > { %3544 = vmatpush3.bf16.msra.mxu1 %v3983_v4  ;;  %v4646_v34 = vsel %vm2039_vm3, %v2436_v29, %v2437_v32  ;;  %v1842_v58 = vrot.slane %v1840_v46, 1  ;;  %v3996_v4 = vld [vmem:[%s4896_s1 + $0xb8] sm:$0xff]   ;;  %v2061_v29 = vrot.slane %v4504_v59, 1  ;;  %v4010_v32 = vld [vmem:[%s4896_s1 + $0x170] sm:$0xff]  }
  0xa4   : > { %3672 = vmatpush3.bf16.msra.mxu0 %v3984_v5  ;;  %3545 = vmatprep.subr.bf16.mxu1 %v3985_v54  ;;  %v3998_v5 = vld [vmem:[%s4896_s1 + $0x140] sm:$0xff]  }
  0xa5   : > { %3673 = vmatprep.subr.bf16.mxu0 %v3986_v47  ;;  %v1843_v1 = vsel %vm1358_vm2, %v1838_v55, %v1842_v58 }
  0xa6   : > { %3530 = vmatmul.mubr.bf16.gmra.mrb[4].mxu1 %v4406_v36 }
  0xa7   : > { %3658 = vmatmul.mubr.bf16.gmra.mrb[4].mxu0 %v4528_v6  ;;  %3546 = vmatpush3.bf16.msra.mxu1 %v3985_v54  ;;  %v2053_v54 = vrot.slane %v4435_v56, 1  ;;  %v4005_v56 = vld [vmem:[%s4896_s1 + $0x60] sm:$0xff]  }
  0xa8   : > { %3674 = vmatpush3.bf16.msra.mxu0 %v3986_v47  ;;  %3547 = vmatprep.subr.bf16.mxu1 %v3987_v52  ;;  %v2056_v47 = vrot.slane %v4461_v17, 1  ;;  %v4007_v17 = vld [vmem:[%s4896_s1 + $0x68] sm:$0xff]  }
  0xa9   : > { %3675 = vmatprep.subr.bf16.mxu0 %v3988_v31  ;;  %3533 = vmatprep.mubr.bf16.mxu1 %v4417_v43 }
  0xaa   : > { %3661 = vmatprep.mubr.bf16.mxu0 %v4550_v30 }
  0xab   : > { %3548 = vmatpush3.bf16.msra.mxu1 %v3987_v52  ;;  %v4008_v52 = vld [vmem:[%s4896_s1 + $0x168] sm:$0xff]  }
  0xac   : > { %3676 = vmatpush3.bf16.msra.mxu0 %v3988_v31  ;;  %3549 = vmatprep.subr.bf16.mxu1 %v3989_v35  ;;  %v2062_v31 = vrot.slane %v4512_v63, 1  ;;  %v4012_v63 = vld [vmem:[%s4896_s1 + $0x178] sm:$0xff]  }
  0xad   : > { %3677 = vmatprep.subr.bf16.mxu0 %v3990_v39 }
  0xae   : > { %3534 = vmatmul.mubr.bf16.gmra.mrb[8].mxu1 %v4459_v16 }
  0xaf   : > { %3662 = vmatmul.mubr.bf16.gmra.mrb[8].mxu0 %v4563_v37  ;;  %3550 = vmatpush3.bf16.msra.mxu1 %v3989_v35  ;;  %v4768_v35 = vsel %vm2039_vm3, %v2061_v29, %v2062_v31 }
  0xb0   : > { %3678 = vmatpush3.bf16.msra.mxu0 %v3990_v39  ;;  %3551 = vmatprep.subr.bf16.mxu1 %v3991_v40  ;;  %v4019_v39 = vld [vmem:[%s4896_s1 + $0x230] sm:$0xff]  }
  0xb1   : > { %3679 = vmatprep.subr.bf16.mxu0 %v3992_v49  ;;  %3537 = vmatprep.mubr.bf16.mxu1 %v4469_v22 }
  0xb2   : > { %3665 = vmatprep.mubr.bf16.mxu0 %v4577_v48  ;;  %v2042_v48 = vsel %vm2039_vm3, %v2040_v61, %v2041_v0 }
  0xb3   : > { %3552 = vmatpush3.bf16.msra.mxu1 %v3991_v40 }
  0xb4   : > { %3680 = vmatpush3.bf16.msra.mxu0 %v3992_v49  ;;  %3553 = vmatprep.subr.bf16.mxu1 %v3993_v51 }
  0xb5   : > { %3681 = vmatprep.subr.bf16.mxu0 %v3994_v60 }
  0xb6   : > { %3538 = vmatmul.mubr.bf16.gmra.mrb[12].mxu1 %v4504_v59 }
  0xb7   : > { %3666 = vmatmul.mubr.bf16.gmra.mrb[12].mxu0 %v1843_v1  ;;  %3554 = vmatpush3.bf16.msra.mxu1 %v3993_v51 }
  0xb8   : > { %3682 = vmatpush3.bf16.msra.mxu0 %v3994_v60  ;;  %3555 = vmatprep.subr.bf16.mxu1 %v3995_v2 }
  0xb9   : > { %3683 = vmatprep.subr.bf16.mxu0 %v3996_v4  ;;  %3557 = vmatprep.mubr.bf16.mxu1 %v4375_v10  ;;  %v4703_v10 = vsel %vm2039_vm3, %v2046_v9, %v2047_v11 }
  0xba   : > { %3685 = vmatprep.mubr.bf16.mxu0 %v2042_v48 }
  0xbb   : > { %3556 = vmatpush3.bf16.msra.mxu1 %v3995_v2 }
  0xbc   : > { %3684 = vmatpush3.bf16.msra.mxu0 %v3996_v4  ;;  %3573 = vmatprep.subr.bf16.mxu1 %v3997_v57 }
  0xbd   : > { %3701 = vmatprep.subr.bf16.mxu0 %v3998_v5 }
  0xbe   : > { %3558 = vmatmul.mubr.bf16.vlgmr.msra.gmra.mrb[0].mxu1 %v4406_v36  ;;  %v4718_v36 = vsel %vm2039_vm3, %v2049_v14, %v2050_v12 }
  0xbf   : > { %3686 = vmatmul.mubr.bf16.vlgmr.msra.gmra.mrb[0].mxu0 %v4554_v33  ;;  %3574 = vmatpush3.bf16.msra.mxu1 %v3997_v57 }
  0xc0   : > { %3702 = vmatpush3.bf16.msra.mxu0 %v3998_v5  ;;  %3575 = vmatprep.subr.bf16.mxu1 %v3999_v13 }
  0xc1   : > { %3703 = vmatprep.subr.bf16.mxu0 %v4000_v8  ;;  %3561 = vmatprep.mubr.bf16.mxu1 %v4417_v43  ;;  %v4729_v43 = vsel %vm2039_vm3, %v2052_v19, %v2053_v54 }
  0xc2   : > { %3689 = vmatprep.mubr.bf16.mxu0 %v4703_v10 }
  0xc3   : > { %3576 = vmatpush3.bf16.msra.mxu1 %v3999_v13 }
  0xc4   : > { %3704 = vmatpush3.bf16.msra.mxu0 %v4000_v8  ;;  %3577 = vmatprep.subr.bf16.mxu1 %v4001_v18 }
  0xc5   : > { %3705 = vmatprep.subr.bf16.mxu0 %v4002_v50 }
  0xc6   : > { %3562 = vmatmul.mubr.bf16.gmra.mrb[4].mxu1 %v4459_v16  ;;  %v4744_v16 = vsel %vm2039_vm3, %v2055_v21, %v2056_v47 }
  0xc7   : > { %3690 = vmatmul.mubr.bf16.gmra.mrb[4].mxu0 %v4718_v36  ;;  %3578 = vmatpush3.bf16.msra.mxu1 %v4001_v18 }
  0xc8   : > { %3706 = vmatpush3.bf16.msra.mxu0 %v4002_v50  ;;  %3579 = vmatprep.subr.bf16.mxu1 %v4003_v42 }
  0xc9   : > { %3707 = vmatprep.subr.bf16.mxu0 %v4004_v7  ;;  %3565 = vmatprep.mubr.bf16.mxu1 %v4469_v22  ;;  %v4755_v22 = vsel %vm2039_vm3, %v2058_v25, %v2059_v26 }
  0xca   : > { %3693 = vmatprep.mubr.bf16.mxu0 %v4729_v43 }
  0xcb   : > { %3580 = vmatpush3.bf16.msra.mxu1 %v4003_v42 }
  0xcc   : > { %3708 = vmatpush3.bf16.msra.mxu0 %v4004_v7  ;;  %3581 = vmatprep.subr.bf16.mxu1 %v4005_v56 }
  0xcd   : > { %3709 = vmatprep.subr.bf16.mxu0 %v4006_v23 }
  0xce   : > { %3566 = vmatmul.mubr.bf16.gmra.mrb[8].mxu1 %v4504_v59  ;;  %v4011_v59 = vld [vmem:[%s4896_s1 + $0x78] sm:$0xff]  }
  0xcf   : > { %3694 = vmatmul.mubr.bf16.gmra.mrb[8].mxu0 %v4744_v16  ;;  %3582 = vmatpush3.bf16.msra.mxu1 %v4005_v56 }
  0xd0   : > { %3710 = vmatpush3.bf16.msra.mxu0 %v4006_v23  ;;  %3583 = vmatprep.subr.bf16.mxu1 %v4007_v17 }
  0xd1   : > { %3711 = vmatprep.subr.bf16.mxu0 %v4008_v52  ;;  %3569 = vmatprep.mubr.bf16.mxu1 %v4520_v3 }
  0xd2   : > { %3697 = vmatprep.mubr.bf16.mxu0 %v4755_v22 }
  0xd3   : > { %3584 = vmatpush3.bf16.msra.mxu1 %v4007_v17 }
  0xd4   : > { %3712 = vmatpush3.bf16.msra.mxu0 %v4008_v52  ;;  %3585 = vmatprep.subr.bf16.mxu1 %v4009_v27 }
  0xd5   : > { %3713 = vmatprep.subr.bf16.mxu0 %v4010_v32 }
  0xd6   : > { %3570 = vmatmul.mubr.bf16.gmra.mrb[12].mxu1 %v4631_v24  ;;  %v4014_v24 = vld [vmem:[%s4896_s1 + $0x208] sm:$0xff]  }
  0xd7   : > { %3698 = vmatmul.mubr.bf16.gmra.mrb[12].mxu0 %v4768_v35  ;;  %3586 = vmatpush3.bf16.msra.mxu1 %v4009_v27 }
  0xd8   : > { %3714 = vmatpush3.bf16.msra.mxu0 %v4010_v32  ;;  %3587 = vmatprep.subr.bf16.mxu1 %v4011_v59 }
  0xd9   : > { %3715 = vmatprep.subr.bf16.mxu0 %v4012_v63  ;;  %3589 = vmatprep.mubr.bf16.mxu1 %v4637_v28  ;;  %v4015_v28 = vld [vmem:[%s4896_s1 + $0x210] sm:$0xff]  }
  0xda   : > { %3717 = vmatprep.mubr.bf16.mxu0 %v4554_v33  ;;  %v2252_v33 = vrot.slane %v4520_v3, 1  ;;  %v4020_v3 = vld [vmem:[%s4896_s1 + $0x238] sm:$0xff]  }
  0xdb   : > { %3588 = vmatpush3.bf16.msra.mxu1 %v4011_v59 }
  0xdc   : > { %3716 = vmatpush3.bf16.msra.mxu0 %v4012_v63  ;;  %3765 = vmatprep.subr.bf16.mxu1 %v4013_v38 }
  0xdd   : > { %3733 = vmatprep.subr.bf16.mxu0 %v4013_v38 }
  0xde   : > { %3590 = vmatmul.mubr.bf16.vlgmr.msra.gmra.mrb[0].mxu1 %v4420_v44  ;;  %v4016_v44 = vld [vmem:[%s4896_s1 + $0x218] sm:$0xff]  }
  0xdf   : > { %3718 = vmatmul.mubr.bf16.vlgmr.msra.gmra.mrb[0].mxu0 %v4703_v10  ;;  %3773 = vmatpush3.bf16.msra.mxu1 %v4013_v38 }
  0xe0   : > { %3734 = vmatpush3.bf16.msra.mxu0 %v4013_v38  ;;  %3766 = vmatprep.subr.bf16.mxu1 %v4014_v24 }
  0xe1   : > { %3735 = vmatprep.subr.bf16.mxu0 %v4014_v24  ;;  %3593 = vmatprep.mubr.bf16.mxu1 %v4432_v53  ;;  %v4017_v53 = vld [vmem:[%s4896_s1 + $0x220] sm:$0xff]  }
  0xe2   : > { %3721 = vmatprep.mubr.bf16.mxu0 %v4718_v36 }
  0xe3   : > { %3774 = vmatpush3.bf16.msra.mxu1 %v4014_v24 }
  0xe4   : > { %3736 = vmatpush3.bf16.msra.mxu0 %v4014_v24  ;;  %3767 = vmatprep.subr.bf16.mxu1 %v4015_v28 }
  0xe5   : > { %3737 = vmatprep.subr.bf16.mxu0 %v4015_v28 }
  0xe6   : > { %3594 = vmatmul.mubr.bf16.gmra.mrb[4].mxu1 %v4467_v20  ;;  %v4018_v20 = vld [vmem:[%s4896_s1 + $0x228] sm:$0xff]  }
  0xe7   : > { %3722 = vmatmul.mubr.bf16.gmra.mrb[4].mxu0 %v4729_v43  ;;  %3775 = vmatpush3.bf16.msra.mxu1 %v4015_v28 }
  0xe8   : > { %3738 = vmatpush3.bf16.msra.mxu0 %v4015_v28  ;;  %3768 = vmatprep.subr.bf16.mxu1 %v4016_v44 }
  0xe9   : > { %3739 = vmatprep.subr.bf16.mxu0 %v4016_v44  ;;  %3597 = vmatprep.mubr.bf16.mxu1 %v4510_v62  ;;  %v2253_v62 = vrot.slane %v4535_v15, 1 }
  0xea   : > { %3725 = vmatprep.mubr.bf16.mxu0 %v4744_v16 }
  0xeb   : > { %3776 = vmatpush3.bf16.msra.mxu1 %v4016_v44 }
  0xec   : > { %3740 = vmatpush3.bf16.msra.mxu0 %v4016_v44  ;;  %3769 = vmatprep.subr.bf16.mxu1 %v4017_v53 }
  0xed   : > { %3741 = vmatprep.subr.bf16.mxu0 %v4017_v53 }
  0xee   : > { %3598 = vmatmul.mubr.bf16.gmra.mrb[8].mxu1 %v4528_v6  ;;  %v2254_v6 = vsel %vm2039_vm3, %v2252_v33, %v2253_v62 }
  0xef   : > { %3726 = vmatmul.mubr.bf16.gmra.mrb[8].mxu0 %v4755_v22  ;;  %3777 = vmatpush3.bf16.msra.mxu1 %v4017_v53 }
  0xf0   : > { %3742 = vmatpush3.bf16.msra.mxu0 %v4017_v53  ;;  %3770 = vmatprep.subr.bf16.mxu1 %v4018_v20 }
  0xf1   : > { %3743 = vmatprep.subr.bf16.mxu0 %v4018_v20  ;;  %3601 = vmatprep.mubr.bf16.mxu1 %v4550_v30 }
  0xf2   : > { %3729 = vmatprep.mubr.bf16.mxu0 %v4768_v35 }
  0xf3   : > { %3778 = vmatpush3.bf16.msra.mxu1 %v4018_v20 }
  0xf4   : > { %3744 = vmatpush3.bf16.msra.mxu0 %v4018_v20  ;;  %3771 = vmatprep.subr.bf16.mxu1 %v4019_v39 }
  0xf5   : > { %3745 = vmatprep.subr.bf16.mxu0 %v4019_v39 }
  0xf6   : > { %3602 = vmatmul.mubr.bf16.gmra.mrb[12].mxu1 %v4563_v37 }
  0xf7   : > { %3730 = vmatmul.mubr.bf16.gmra.mrb[12].mxu0 %v2254_v6  ;;  %3779 = vmatpush3.bf16.msra.mxu1 %v4019_v39 }
  0xf8   : > { %3746 = vmatpush3.bf16.msra.mxu0 %v4019_v39  ;;  %3772 = vmatprep.subr.bf16.mxu1 %v4020_v3 }
  0xf9   : > { %3747 = vmatprep.subr.bf16.mxu0 %v4020_v3  ;;  %3749 = vmatprep.mubr.bf16.mxu0 %v4703_v10 }
  0xfa   : > { %3757 = vmatprep.mubr.bf16.mxu1 %v4755_v22 }
  0xfb   : > { %3780 = vmatpush3.bf16.msra.mxu1 %v4020_v3 }
  0xfc   : > { %3748 = vmatpush3.bf16.msra.mxu0 %v4020_v3 }
  0xfe   : > { %3758 = vmatmul.mubr.bf16.vlgmr.msra.gmra.mrb[16].mxu1 %v4768_v35 }
  0xff   : > { %3750 = vmatmul.mubr.bf16.vlgmr.msra.gmra.mrb[0].mxu0 %v4718_v36  ;;  %3761 = vmatprep.mubr.bf16.mxu1 %v2254_v6 }
 0x100   : > { %3753 = vmatprep.mubr.bf16.mxu0 %v4729_v43 }
 0x106   : > { %3762 = vmatmul.mubr.bf16.gmra.mrb[20].mxu1 %v4646_v34 }
 0x107   : > { %3754 = vmatmul.mubr.bf16.gmra.mrb[4].mxu0 %v4744_v16 }
 0x1b1   : > { %v3591_v15 = vpop.f32.mrb[0].mxu1 }
 0x1b2   : > { %v1562_v30 = vpop.f32.mrb[1].mxu1 }
 0x1b3   : > { %v3592_v37 = vpop.f32.mrb[2].mxu1 }
 0x1b4   : > { %v1565_v40 = vpop.f32.mrb[3].mxu1 }
 0x1b9   : > { %v3595_v41 = vpop.f32.mrb[4].mxu1 }
 0x1ba   : > { %v4827_v45 = vpop.f32.mrb[5].mxu1 }
 0x1bb   : > { %v4829_v46 = vpop.f32.mrb[6].mxu1 }
 0x1bc   : > { %v4831_v49 = vpop.f32.mrb[7].mxu1 }
 0x1c1   : > { %v3599_v51 = vpop.f32.mrb[8].mxu1 }
 0x1c2   : > { %v3727_v55 = vpop.f32.mrb[8].mxu0  ;;  %v1594_v58 = vpop.f32.mrb[9].mxu1 }
 0x1c3   : > { %v3789_v60 = vadd.f32 %v3727_v55, %v3599_v51  ;;  %v2387_v61 = vpop.f32.mrb[9].mxu0  ;;  %v3600_v0 = vpop.f32.mrb[10].mxu1 }
 0x1c4   : > { %v3791_v34 = vadd.f32 %v2387_v61, %v1594_v58  ;;  %v3728_v1 = vpop.f32.mrb[10].mxu0  ;;  %v1597_v2 = vpop.f32.mrb[11].mxu1 }
 0x1c5   : > { %v3793_v4 = vadd.f32 %v3728_v1, %v3600_v0  ;;  %v2390_v48 = vpop.f32.mrb[11].mxu0 }
 0x1c6   : > { %v3795_v57 = vadd.f32 %v2390_v48, %v1597_v2 }
 0x1c9   : > { %v3603_v5 = vpop.f32.mrb[12].mxu1 }
 0x1ca   : > { %v3731_v9 = vpop.f32.mrb[12].mxu0  ;;  %v1610_v11 = vpop.f32.mrb[13].mxu1 }
 0x1cb   : > { %v3797_v13 = vadd.f32 %v3731_v9, %v3603_v5  ;;  %v2403_v8 = vpop.f32.mrb[13].mxu0  ;;  %v3604_v10 = vpop.f32.mrb[14].mxu1 }
 0x1cc   : > { %v3799_v18 = vadd.f32 %v2403_v8, %v1610_v11  ;;  %v3732_v14 = vpop.f32.mrb[14].mxu0  ;;  %v1613_v12 = vpop.f32.mrb[15].mxu1 }
 0x1cd   : > { %v3801_v50 = vadd.f32 %v3732_v14, %v3604_v10  ;;  %v2406_v19 = vpop.f32.mrb[15].mxu0 }
 0x1ce   : > { %v3803_v54 = vadd.f32 %v2406_v19, %v1613_v12 }
 0x1d1   : > { %v3759_v36 = vpop.f32.mrb[16].mxu1 }
 0x1d2   : > { %v3751_v42 = vpop.f32.mrb[0].mxu0  ;;  %v4833_v7 = vadd.f32 %v3789_v60, %v3759_v36  ;;  %v2571_v43 = vpop.f32.mrb[17].mxu1 }
 0x1d3   : > { %v3781_v56 = vadd.f32 %v3751_v42, %v3591_v15  ;;  %v2539_v21 = vpop.f32.mrb[1].mxu0  ;;  %v4835_v47 = vadd.f32 %v3791_v34, %v2571_v43  ;;  %v3760_v23 = vpop.f32.mrb[18].mxu1 }
 0x1d4   : > { %2628 = vst [vmem:[%s4140_s8 + $0x50] sm:$0xff] %v4833_v7  ;;  %v3782_v25 = vadd.f32 %v2539_v21, %v1562_v30  ;;  %v3752_v26 = vpop.f32.mrb[2].mxu0  ;;  %v4839_v16 = vadd.f32 %v3793_v4, %v3760_v23  ;;  %v2574_v17 = vpop.f32.mrb[19].mxu1  ;;  %v2666_v14 = vmul.f32 %v4833_v7, %v4833_v7 }
 0x1d5   : > { %2620 = vst [vmem:[%s4140_s8 + $0x10] sm:$0xff] %v3781_v56  ;;  %2626 = vst [vmem:[%s4140_s8 + $0x40] sm:$0xff] %v4835_v47  ;;  %v3783_v52 = vadd.f32 %v3752_v26, %v3592_v37  ;;  %v2542_v22 = vpop.f32.mrb[3].mxu0  ;;  %v3796_v27 = vadd.f32 %v3795_v57, %v2574_v17  ;;  %v2658_v63 = vmul.f32 %v3781_v56, %v3781_v56 }
 0x1d6   : > { %2618 = vst [vmem:[%s4140_s8] sm:$0xff] %v3782_v25  ;;  %2629 = vst [vmem:[%s4140_s8 + $0x58] sm:$0xff] %v4839_v16  ;;  %v3784_v29 = vadd.f32 %v2542_v22, %v1565_v40  ;;  %v2656_v31 = vmul.f32 %v3782_v25, %v3782_v25  ;;  %v2664_v11 = vmul.f32 %v4835_v47, %v4835_v47 }
 0x1d7   : > { %2621 = vst [vmem:[%s4140_s8 + $0x18] sm:$0xff] %v3783_v52  ;;  %2627 = vst [vmem:[%s4140_s8 + $0x48] sm:$0xff] %v3796_v27  ;;  %v2659_v6 = vmul.f32 %v3783_v52, %v3783_v52  ;;  %v2665_v8 = vmul.f32 %v3796_v27, %v3796_v27  ;;  %v2667_v19 = vmul.f32 %v4839_v16, %v4839_v16 }
 0x1d8   : > { %2619 = vst [vmem:[%s4140_s8 + $0x8] sm:$0xff] %v3784_v29  ;;  %v2634_v32 = vadd.f32 %v3784_v29, %v3782_v25  ;;  %v2657_v35 = vmul.f32 %v3784_v29, %v3784_v29 }
 0x1d9   : > { %v3763_v59 = vpop.f32.mrb[20].mxu1 }
 0x1da   : > { %v2635_v38 = vadd.f32 %v3781_v56, %v2634_v32  ;;  %v2672_v24 = vadd.f32 %v2657_v35, %v2656_v31  ;;  %v3755_v28 = vpop.f32.mrb[4].mxu0  ;;  %v3798_v44 = vadd.f32 %v3797_v13, %v3763_v59  ;;  %v2587_v53 = vpop.f32.mrb[21].mxu1 }
 0x1db   : > { %v3785_v20 = vadd.f32 %v3755_v28, %v3595_v41  ;;  %v2555_v33 = vpop.f32.mrb[5].mxu0  ;;  %v3800_v62 = vadd.f32 %v3799_v18, %v2587_v53  ;;  %v3764_v39 = vpop.f32.mrb[22].mxu1 }
 0x1dc   : > { %v2673_v3 = vadd.f32 %v2672_v24, %v2658_v63  ;;  %2632 = vst [vmem:[%s4140_s8 + $0x70] sm:$0xff] %v3798_v44  ;;  %v3786_v15 = vadd.f32 %v2555_v33, %v4827_v45  ;;  %v2636_v30 = vadd.f32 %v3783_v52, %v2635_v38  ;;  %v3756_v37 = vpop.f32.mrb[6].mxu0  ;;  %v2590_v40 = vpop.f32.mrb[23].mxu1  ;;  %v3802_v51 = vadd.f32 %v3801_v50, %v3764_v39 }
 0x1dd   : > { %2624 = vst [vmem:[%s4140_s8 + $0x30] sm:$0xff] %v3785_v20  ;;  %2630 = vst [vmem:[%s4140_s8 + $0x60] sm:$0xff] %v3800_v62  ;;  %v3787_v41 = vadd.f32 %v3756_v37, %v4829_v46  ;;  %v2558_v55 = vpop.f32.mrb[7].mxu0  ;;  %v3804_v45 = vadd.f32 %v3803_v54, %v2590_v40  ;;  %v2662_v4 = vmul.f32 %v3785_v20, %v3785_v20 }
 0x1de   : > { %2622 = vst [vmem:[%s4140_s8 + $0x20] sm:$0xff] %v3786_v15  ;;  %v2637_v58 = vadd.f32 %v3786_v15, %v2636_v30  ;;  %v2660_v60 = vmul.f32 %v3786_v15, %v3786_v15  ;;  %v2674_v61 = vadd.f32 %v2673_v3, %v2659_v6  ;;  %v3788_v0 = vadd.f32 %v2558_v55, %v4831_v49 }
 0x1df   : > { %2625 = vst [vmem:[%s4140_s8 + $0x38] sm:$0xff] %v3787_v41  ;;  %2633 = vst [vmem:[%s4140_s8 + $0x78] sm:$0xff] %v3802_v51  ;;  %v2663_v46 = vmul.f32 %v3787_v41, %v3787_v41  ;;  %v2668_v42 = vmul.f32 %v3800_v62, %v3800_v62  ;;  %v2670_v25 = vmul.f32 %v3798_v44, %v3798_v44 }
 0x1e0   : > { %v2675_v34 = vadd.f32 %v2674_v61, %v2660_v60  ;;  %2623 = vst [vmem:[%s4140_s8 + $0x28] sm:$0xff] %v3788_v0  ;;  %v2638_v1 = vadd.f32 %v3788_v0, %v2637_v58  ;;  %v2661_v2 = vmul.f32 %v3788_v0, %v3788_v0  ;;  %2631 = vst [vmem:[%s4140_s8 + $0x68] sm:$0xff] %v3804_v45 }
 0x1e1   : > { %v2671_v52 = vmul.f32 %v3802_v51, %v3802_v51 }
 0x1e2   : > { %v2639_v48 = vadd.f32 %v3785_v20, %v2638_v1  ;;  %v2676_v57 = vadd.f32 %v2675_v34, %v2661_v2 }
 0x1e4   : > { %v2640_v5 = vadd.f32 %v3787_v41, %v2639_v48  ;;  %v2677_v9 = vadd.f32 %v2676_v57, %v2662_v4 }
 0x1e6   : > { %v2641_v13 = vadd.f32 %v4835_v47, %v2640_v5  ;;  %v2678_v49 = vadd.f32 %v2677_v9, %v2663_v46  ;;  %v2669_v47 = vmul.f32 %v3804_v45, %v3804_v45 }
 0x1e8   : > { %v2679_v10 = vadd.f32 %v2678_v49, %v2664_v11  ;;  %v2642_v18 = vadd.f32 %v3796_v27, %v2641_v13 }
 0x1ea   : > { %v2643_v12 = vadd.f32 %v4833_v7, %v2642_v18  ;;  %v2680_v50 = vadd.f32 %v2679_v10, %v2665_v8 }
 0x1ec   : > { %v2644_v54 = vadd.f32 %v4839_v16, %v2643_v12  ;;  %v2681_v36 = vadd.f32 %v2680_v50, %v2666_v14 }
 0x1ee   : > { %v2645_v43 = vadd.f32 %v3800_v62, %v2644_v54  ;;  %v2682_v56 = vadd.f32 %v2681_v36, %v2667_v19 }
 0x1f0   : > { %v2646_v21 = vadd.f32 %v3804_v45, %v2645_v43  ;;  %v2683_v23 = vadd.f32 %v2682_v56, %v2668_v42 }
 0x1f2   : > { %v2647_v26 = vadd.f32 %v3798_v44, %v2646_v21  ;;  %v2684_v17 = vadd.f32 %v2683_v23, %v2669_v47 }
 0x1f4   : > { %v2648_v22 = vadd.f32 %v3802_v51, %v2647_v26  ;;  %v2685_v7 = vadd.f32 %v2684_v17, %v2670_v25 }
 0x1f6   : > { %v2649_v27 = vrot.slane %v2648_v22, 4  ;;  %v2686_v29 = vadd.f32 %v2685_v7, %v2671_v52 }
 0x1f8   : > { %v2650_v31 = vadd.f32 %v2649_v27, %v2648_v22  ;;  %v2687_v32 = vrot.slane %v2686_v29, 4 }
 0x1fa   : > { %v2651_v16 = vrot.slane %v2650_v31, 2  ;;  %v2688_v35 = vadd.f32 %v2687_v32, %v2686_v29 }
 0x1fc   : > { %v2652_v59 = vadd.f32 %v2651_v16, %v2650_v31  ;;  %v2689_v63 = vrot.slane %v2688_v35, 2 }
 0x1fe   : > { %v2653_v38 = vrot.slane %v2652_v59, 1  ;;  %v2690_v24 = vadd.f32 %v2689_v63, %v2688_v35 }
 0x200   : > { %v2654_v28 = vadd.f32 %v2653_v38, %v2652_v59  ;;  %v2691_v53 = vrot.slane %v2690_v24, 1 }
 0x202   : > { %2655 = vst [vmem:[%s206_s23] sm:$0x1] %v2654_v28  ;;  %v2692_v44 = vadd.f32 %v2691_v53, %v2690_v24 }
 0x204   : > { %2693 = vst [vmem:[%s213_s27] sm:$0x1] %v2692_v44 }
 0x205 PF: > { %s15_s19 = sadd.s32 1, %s4065_s19   ;;  %s4900_s15 = smov %s4057_s17 }
 0x206   : > { %p12_p1 = scmp.ge.s32.totalorder %s15_s19, 6   ;;  %s4901_s16 = smov %s4061_s18 }
 0x207   : > { %s4902_s17 = smov %s4905_s20  ;;  %s4903_s18 = smov %s4909_s21 }
 0x208   :  { %14 = sbr.rel (!%p12_p1) target bundleno = 3 (0x3), region = 370 }
 0x20f   :  { %2766 = vsyncmov [#allocation3] }
 0x212   :  { %s2767_s12 = vpop.sfrf %2766 }
 0x213   :  { %p3324_p2 = scmp.ne.s32.totalorder %s2767_s12, 0 }
 0x215   :  { %2771 = shalt.err (%p3324_p2)  }
 0x216   :  { %2773 = vsyncmov [#allocation3 + $0x1] }
 0x219   :  { %s2774_s23 = vpop.sfrf %2773 }
 0x21a   :  { %p3325_p3 = scmp.ne.s32.totalorder %s2774_s23, 0 }
 0x21c   :  { %2778 = shalt.err (%p3325_p3)  }
 0x21d   :  { %2780 = vsyncmov [#allocation3 + $0x2] }
 0x220   :  { %s2781_s27 = vpop.sfrf %2780 }
 0x221   :  { %p3326_p4 = scmp.ne.s32.totalorder %s2781_s27, 0 }
 0x223   :  { %2785 = shalt.err (%p3326_p4)  }
 0x224   :  { %2787 = vsyncmov [#allocation3 + $0x3] }
 0x227   :  { %s2788_s28 = vpop.sfrf %2787 }
 0x228   :  { %p3327_p5 = scmp.ne.s32.totalorder %s2788_s28, 0 }
 0x22a   :  { %2792 = shalt.err (%p3327_p5)  }
 0x22b   :  { %2794 = vsyncmov [#allocation3 + $0x4] }
 0x22e   :  { %s2795_s20 = vpop.sfrf %2794 }
 0x22f   :  { %p3328_p6 = scmp.ne.s32.totalorder %s2795_s20, 0 }
 0x231   :  { %2799 = shalt.err (%p3328_p6)  }
 0x232   :  { %2801 = vsyncmov [#allocation3 + $0x5] }
 0x235   :  { %s2802_s0 = vpop.sfrf %2801 }
 0x236   :  { %p3329_p7 = scmp.ne.s32.totalorder %s2802_s0, 0 }
 0x238   :  { %2806 = shalt.err (%p3329_p7)  }

</bundles_post_ra>
